<compile_context>
chip_gen: v7x
topology: tpu7x:2x2x1
jax: 0.10.0
libtpu: 0.0.40
codegen_flags: <defaults>
</compile_context>

<pallas_src>
import functools

import jax
import jax.numpy as jnp
from jax import lax
from jax.experimental import pallas as pl
from jax.experimental.pallas import tpu as pltpu

EPS = 1e-5
LANES = 128


def _round_up(x, m):
    return (x + m - 1) // m * m


def _vmem_budget_bytes():
    """Generation-aware scoped-VMEM budget: ~3/4 of physical, capped at 96 MiB."""
    cap = 64 * 1024 * 1024                     # conservative default (v7x-sized)
    try:
        cap = pltpu.get_tpu_info().vmem_capacity_bytes
    except Exception:
        pass
    return min((3 * cap) // 4, 96 * 1024 * 1024)


def _pick_row_tile(hh, ww, cin, cop, budget):
    """Largest divisor of H (<= 64) whose double-buffered working set fits."""
    def working_set(th):
        in_rows = (th + 2) * ww * cin * 2           # bf16 main tile + 2 halo rows
        out_tile = th * ww * cop * 2                # bf16 conv-output tile
        stats = 2 * cop * 4
        weight = 9 * cin * cop * 2
        temps = 3 * (th + 2) * ww * cin * 2         # slab + two shifted copies (bf16)
        temps += (th + 2) * ww * 3 * cin * 2        # kx-concatenated slab (bf16)
        temps += th * ww * cop * 4                  # f32 accumulator
        return 2 * (in_rows + out_tile + stats) + weight + temps

    best = 1
    for th in range(1, min(hh, 64) + 1):
        if hh % th == 0 and working_set(th) <= budget:
            best = th
    return best


# ---------------------------------------------------------------------------
# Passes 1 & 2: [optional fused BN-affine + ReLU] -> 3x3 conv -> partial stats
# ---------------------------------------------------------------------------
def _conv_pass_kernel(xc_ref, xt_ref, xb_ref, w_ref, s_ref, b_ref,
                      o_ref, st_ref, *, apply_act):
    h = pl.program_id(1)
    nh = pl.num_programs(1)
    th, wlen, cin = xc_ref.shape
    cop = o_ref.shape[-1]

    def prep(v):
        # fused BatchNorm affine + ReLU of the previous layer (f32), then bf16
        if apply_act:
            v = jnp.maximum(v.astype(jnp.float32) * s_ref[...] + b_ref[...], 0.0)
        return v.astype(jnp.bfloat16)

    xc = prep(xc_ref[...])                                      # (TH, W, Cin)
    top = prep(xt_ref[...])                                     # (1,  W, Cin)
    bot = prep(xb_ref[...])                                     # (1,  W, Cin)
    # zero the halo rows that fall outside the image AFTER the activation:
    # conv2's zero padding acts on the activated tensor (NaN-safe select).
    top = jnp.where(h > 0, top, jnp.zeros_like(top))
    bot = jnp.where(h < nh - 1, bot, jnp.zeros_like(bot))
    slab = jnp.concatenate([top, xc, bot], axis=0)              # (TH+2, W, Cin) bf16

    # kx-concatenated slab: [col j-1 | col j | col j+1] stacked along channels
    zcol = jnp.zeros((th + 2, 1, cin), slab.dtype)
    x_m = jnp.concatenate([zcol, slab[:, :-1, :]], axis=1)      # kx = 0
    x_p = jnp.concatenate([slab[:, 1:, :], zcol], axis=1)       # kx = 2
    kx_cat = jnp.concatenate([x_m, slab, x_p], axis=-1)         # (TH+2, W, 3*Cin)

    # three accumulating MXU contractions (one per ky), flattened M = TH*W
    acc = jnp.zeros((th * wlen, cop), jnp.float32)
    for ky in range(3):
        lhs = kx_cat[ky:ky + th].reshape(th * wlen, 3 * cin)
        acc = acc + lax.dot_general(
            lhs, w_ref[ky],
            dimension_numbers=(((1,), (0,)), ((), ())),
            preferred_element_type=jnp.float32)                 # (TH*W, Cout_p)

    # stats on the values actually stored/fed forward (bf16-rounded), in f32
    acc_q = acc.astype(o_ref.dtype).astype(jnp.float32)
    st_ref[...] = jnp.concatenate(
        [jnp.sum(acc_q, axis=0, keepdims=True),
         jnp.sum(acc_q * acc_q, axis=0, keepdims=True)], axis=0)

    o_ref[...] = acc_q.reshape(th, wlen, cop).astype(o_ref.dtype)


def _conv_pass(x, w_folded, scale, bias, *, th, cop, apply_act, vmem):
    n, hh, ww, cin = x.shape
    assert hh % th == 0
    nh = hh // th

    def row_main(i, j):
        return (i, j, 0, 0)

    def row_top(i, j):      # single halo row above the tile (clamped; masked in-kernel)
        return (i, jnp.maximum(j * th - 1, 0), 0, 0)

    def row_bot(i, j):      # single halo row below the tile (clamped; masked in-kernel)
        return (i, jnp.minimum((j + 1) * th, hh - 1), 0, 0)

    out, stats = pl.pallas_call(
        functools.partial(_conv_pass_kernel, apply_act=apply_act),
        grid=(n, nh),
        in_specs=[
            pl.BlockSpec((None, th, ww, cin), row_main),            # current rows
            pl.BlockSpec((None, 1, ww, cin), row_top),              # top halo row
            pl.BlockSpec((None, 1, ww, cin), row_bot),              # bottom halo row
            pl.BlockSpec((3, 3 * cin, cop), lambda i, j: (0, 0, 0)),  # folded weight
            pl.BlockSpec((1, cin), lambda i, j: (0, 0)),            # BN scale
            pl.BlockSpec((1, cin), lambda i, j: (0, 0)),            # BN bias
        ],
        out_specs=[
            pl.BlockSpec((None, th, ww, cop), row_main),
            pl.BlockSpec((None, None, 2, cop), lambda i, j: (i, j, 0, 0)),
        ],
        out_shape=(
            jax.ShapeDtypeStruct((n, hh, ww, cop), jnp.bfloat16),   # pre-BN conv out
            jax.ShapeDtypeStruct((n, nh, 2, cop), jnp.float32),     # per-tile stats
        ),
        compiler_params=pltpu.CompilerParams(
            dimension_semantics=("parallel", "parallel"),
            vmem_limit_bytes=vmem),
    )(x, x, x, w_folded, scale, bias)
    return out, stats


# ---------------------------------------------------------------------------
# Pass 3: final BN affine + ReLU (elementwise, emits only the real Cout)
# ---------------------------------------------------------------------------
def _bn_relu_kernel(x_ref, s_ref, b_ref, o_ref):
    cout = o_ref.shape[-1]
    x = x_ref[..., :cout].astype(jnp.float32)
    o_ref[...] = jnp.maximum(x * s_ref[...] + b_ref[...], 0.0).astype(o_ref.dtype)


def _bn_relu_apply(x, scale, bias, *, cout, th, vmem):
    n, hh, ww, cop = x.shape
    nh = hh // th
    # NOTE: when W % 128 == 0 the NCHW transpose could also be fused in here
    # (XLU is idle in this pass); for small W the wrapper transpose is cheaper
    # than emitting a non-lane-dense layout.
    return pl.pallas_call(
        _bn_relu_kernel,
        grid=(n, nh),
        in_specs=[
            pl.BlockSpec((None, th, ww, cop), lambda i, j: (i, j, 0, 0)),
            pl.BlockSpec((1, cout), lambda i, j: (0, 0)),
            pl.BlockSpec((1, cout), lambda i, j: (0, 0)),
        ],
        out_specs=pl.BlockSpec((None, th, ww, cout), lambda i, j: (i, j, 0, 0)),
        out_shape=jax.ShapeDtypeStruct((n, hh, ww, cout), jnp.float32),
        compiler_params=pltpu.CompilerParams(
            dimension_semantics=("parallel", "parallel"),
            vmem_limit_bytes=vmem),
    )(x, scale, bias)


# ---------------------------------------------------------------------------
# Wrapper glue
# ---------------------------------------------------------------------------
def _fold_weight(w_oihw, cin_p, cout_p):
    """OIHW -> (3, 3*Cin_p, Cout_p) bf16; kx taps stacked along the contraction axis."""
    cout, cin, _, _ = w_oihw.shape
    w = jnp.transpose(w_oihw, (2, 3, 1, 0)).astype(jnp.float32)   # (ky,kx,Cin,Cout)
    w = jnp.pad(w, ((0, 0), (0, 0), (0, cin_p - cin), (0, cout_p - cout)))
    return w.reshape(3, 3 * cin_p, cout_p).astype(jnp.bfloat16)


def _bn_scale_bias(stats, gamma, beta, tile_count, cop):
    """Combine per-tile (sum, sum_sq) partials with Chan's parallel-variance
    formula (numerically safer than global E[x^2]-E[x]^2) into a fused
    per-channel scale/bias."""
    s = stats[..., 0, :]                                  # (n, nh, Cout_p)
    ss = stats[..., 1, :]
    cnt = float(tile_count)
    n_tiles = s.shape[0] * s.shape[1]
    total = cnt * n_tiles

    mean_t = s / cnt
    m2_t = ss - s * mean_t                                # per-tile sum((x - mean_t)^2)
    mean = jnp.sum(s, axis=(0, 1)) / total
    var = (jnp.sum(m2_t, axis=(0, 1))
           + cnt * jnp.sum((mean_t - mean) ** 2, axis=(0, 1))) / total
    var = jnp.maximum(var, 0.0)                           # biased variance

    g = jnp.pad(gamma.astype(jnp.float32), (0, cop - gamma.shape[0]))
    b = jnp.pad(beta.astype(jnp.float32), (0, cop - beta.shape[0]))
    scale = g * lax.rsqrt(var + EPS)
    bias = b - mean * scale
    return scale.reshape(1, cop), bias.reshape(1, cop)


@jax.jit
def double_conv(x_nchw, w1_oihw, w2_oihw, g1, b1, g2, b2):
    n, cin, hh, ww = x_nchw.shape
    cout = w1_oihw.shape[0]
    cop = _round_up(cout, LANES)

    budget = _vmem_budget_bytes()
    th = _pick_row_tile(hh, ww, cop, cop, budget)   # size for the worst (pass-2) case

    # interface glue: PyTorch NCHW -> NHWC bf16 (and back at the end)
    x = jnp.transpose(x_nchw, (0, 2, 3, 1)).astype(jnp.bfloat16)

    w1f = _fold_weight(w1_oihw, cin, cop)      # conv1 keeps its real Cin (small K)
    w2f = _fold_weight(w2_oihw, cop, cop)      # conv2 consumes the 128-lane a1

    ident_s = jnp.ones((1, cin), jnp.float32)  # unused when apply_act=False
    ident_b = jnp.zeros((1, cin), jnp.float32)

    # pass 1: conv1 -> a1 + BN1 partials
    a1, st1 = _conv_pass(x, w1f, ident_s, ident_b,
                         th=th, cop=cop, apply_act=False, vmem=budget)
    s1, sh1 = _bn_scale_bias(st1, g1, b1, th * ww, cop)

    # pass 2: BN1 affine + ReLU + conv2 -> a2 + BN2 partials
    a2, st2 = _conv_pass(a1, w2f, s1, sh1,
                         th=th, cop=cop, apply_act=True, vmem=budget)
    s2, sh2 = _bn_scale_bias(st2, g2, b2, th * ww, cop)

    # pass 3: BN2 affine + ReLU, emitting only the real Cout channels
    y = _bn_relu_apply(a2, s2[:, :cout], sh2[:, :cout],
                       cout=cout, th=th, vmem=budget)

    return jnp.transpose(y, (0, 3, 1, 2))      # back to NCHW


# ---------------------------------------------------------------------------
# Pure-JAX reference (matches PyTorch training-mode DoubleConv)
# ---------------------------------------------------------------------------
def _reference(x_nchw, w1, w2, g1, b1, g2, b2):
    def conv(x, w):
        return lax.conv_general_dilated(
            x, w, window_strides=(1, 1), padding=((1, 1), (1, 1)),
            dimension_numbers=('NCHW', 'OIHW', 'NCHW'))

    def bn_relu(x, g, b):
        mean = jnp.mean(x, axis=(0, 2, 3), keepdims=True)
        var = jnp.mean((x - mean) ** 2, axis=(0, 2, 3), keepdims=True)
        y = (x - mean) / jnp.sqrt(var + EPS)
        y = y * g.reshape(1, -1, 1, 1) + b.reshape(1, -1, 1, 1)
        return jnp.maximum(y, 0.0)

    y = bn_relu(conv(x_nchw, w1), g1, b1)
    return bn_relu(conv(y, w2), g2, b2)


if __name__ == "__main__":
    N, IN_CH, OUT_CH, H, W = 2, 4, 8, 16, 16

    key = jax.random.PRNGKey(0)
    kx, k1, k2 = jax.random.split(key, 3)
    x = jax.random.normal(kx, (N, IN_CH, H, W), jnp.float32)

    # PyTorch shapes: OIHW conv weights (bias=False), BatchNorm2d default affine
    w1 = 0.1 * jax.random.normal(k1, (OUT_CH, IN_CH, 3, 3), jnp.float32)
    w2 = 0.1 * jax.random.normal(k2, (OUT_CH, OUT_CH, 3, 3), jnp.float32)
    g1 = jnp.ones((OUT_CH,), jnp.float32)
    b1 = jnp.zeros((OUT_CH,), jnp.float32)
    g2 = jnp.ones((OUT_CH,), jnp.float32)
    b2 = jnp.zeros((OUT_CH,), jnp.float32)

    out = jax.block_until_ready(double_conv(x, w1, w2, g1, b1, g2, b2))
    ref = _reference(x, w1, w2, g1, b1, g2, b2)

    assert out.shape == (N, OUT_CH, H, W)
    err = float(jnp.max(jnp.abs(out - ref)))
    # tolerance sized for bf16 MXU operands AND bf16-stored intermediates,
    # amplified by two BatchNorm normalizations (f32 stats/affine in-kernel)
    assert err < 4e-2, err

    print("KERNEL_OK")
</pallas_src>

<mosaic_0001>
module attributes {stable_mosaic.version = 11 : i64} {
  func.func @_conv_pass_kernel(%arg0: i32, %arg1: i32, %arg2: memref<1x16x16x4xbf16, #tpu.memory_space<vmem>>, %arg3: memref<1x1x16x4xbf16, #tpu.memory_space<vmem>>, %arg4: memref<1x1x16x4xbf16, #tpu.memory_space<vmem>>, %arg5: memref<3x12x128xbf16, #tpu.memory_space<vmem>>, %arg6: memref<1x4xf32, #tpu.memory_space<vmem>>, %arg7: memref<1x4xf32, #tpu.memory_space<vmem>>, %arg8: memref<1x16x16x128xbf16, #tpu.memory_space<vmem>>, %arg9: memref<1x1x2x128xf32, #tpu.memory_space<vmem>>) attributes {dimension_semantics = [#tpu.dimension_semantics<parallel>, #tpu.dimension_semantics<parallel>], iteration_bounds = array<i64: 2, 1>, scalar_prefetch = 0 : i64, scratch_operands = 0 : i64, tpu.core_type = #tpu.core_type<tc>, window_params = [{transform_indices = @transform_0, window_bounds = array<i64: 1, 16, 16, 4>}, {transform_indices = @transform_1, window_bounds = array<i64: 1, 1, 16, 4>}, {transform_indices = @transform_2, window_bounds = array<i64: 1, 1, 16, 4>}, {pipeline_mode = #tpu.pipeline_mode<synchronous>, transform_indices = @transform_3, window_bounds = array<i64: 3, 12, 128>}, {pipeline_mode = #tpu.pipeline_mode<synchronous>, transform_indices = @transform_4, window_bounds = array<i64: 1, 4>}, {pipeline_mode = #tpu.pipeline_mode<synchronous>, transform_indices = @transform_5, window_bounds = array<i64: 1, 4>}, {transform_indices = @transform_6, window_bounds = array<i64: 1, 16, 16, 128>}, {transform_indices = @transform_7, window_bounds = array<i64: 1, 1, 2, 128>}]} {
    %c0 = arith.constant 0 : index
    %c0_0 = arith.constant 0 : index
    %c0_1 = arith.constant 0 : index
    %c0_2 = arith.constant 0 : index
    %0 = vector.load %arg2[%c0, %c0_0, %c0_1, %c0_2] : memref<1x16x16x4xbf16, #tpu.memory_space<vmem>>, vector<1x16x16x4xbf16>
    %1 = vector.shape_cast %0 : vector<1x16x16x4xbf16> to vector<16x16x4xbf16>
    %c0_3 = arith.constant 0 : index
    %c0_4 = arith.constant 0 : index
    %c0_5 = arith.constant 0 : index
    %c0_6 = arith.constant 0 : index
    %2 = vector.load %arg3[%c0_3, %c0_4, %c0_5, %c0_6] : memref<1x1x16x4xbf16, #tpu.memory_space<vmem>>, vector<1x1x16x4xbf16>
    %3 = vector.shape_cast %2 : vector<1x1x16x4xbf16> to vector<1x16x4xbf16>
    %c0_7 = arith.constant 0 : index
    %c0_8 = arith.constant 0 : index
    %c0_9 = arith.constant 0 : index
    %c0_10 = arith.constant 0 : index
    %4 = vector.load %arg4[%c0_7, %c0_8, %c0_9, %c0_10] : memref<1x1x16x4xbf16, #tpu.memory_space<vmem>>, vector<1x1x16x4xbf16>
    %5 = vector.shape_cast %4 : vector<1x1x16x4xbf16> to vector<1x16x4xbf16>
    %c0_i32 = arith.constant 0 : i32
    %6 = arith.cmpi sgt, %arg1, %c0_i32 : i32
    %cst = arith.constant 0.000000e+00 : bf16
    %7 = vector.broadcast %cst : bf16 to vector<1x16x4xbf16>
    %8 = arith.select %6, %3, %7 : vector<1x16x4xbf16>
    %c0_i32_11 = arith.constant 0 : i32
    %9 = arith.cmpi slt, %arg1, %c0_i32_11 : i32
    %cst_12 = arith.constant 0.000000e+00 : bf16
    %10 = vector.broadcast %cst_12 : bf16 to vector<1x16x4xbf16>
    %11 = arith.select %9, %5, %10 : vector<1x16x4xbf16>
    %12 = tpu.concatenate %8, %1, %11 in 0 : vector<1x16x4xbf16>, vector<16x16x4xbf16>, vector<1x16x4xbf16> -> vector<18x16x4xbf16>
    %cst_13 = arith.constant 0.000000e+00 : bf16
    %13 = vector.broadcast %cst_13 : bf16 to vector<18x1x4xbf16>
    %14 = vector.extract_strided_slice %12 {offsets = [0, 0, 0], sizes = [18, 15, 4], strides = [1, 1, 1]} : vector<18x16x4xbf16> to vector<18x15x4xbf16>
    %15 = tpu.concatenate %13, %14 in 1 : vector<18x1x4xbf16>, vector<18x15x4xbf16> -> vector<18x16x4xbf16>
    %16 = vector.extract_strided_slice %12 {offsets = [0, 1, 0], sizes = [18, 15, 4], strides = [1, 1, 1]} : vector<18x16x4xbf16> to vector<18x15x4xbf16>
    %17 = tpu.concatenate %16, %13 in 1 : vector<18x15x4xbf16>, vector<18x1x4xbf16> -> vector<18x16x4xbf16>
    %18 = tpu.concatenate %15, %12, %17 in 2 : vector<18x16x4xbf16>, vector<18x16x4xbf16>, vector<18x16x4xbf16> -> vector<18x16x12xbf16>
    %cst_14 = arith.constant 0.000000e+00 : f32
    %19 = vector.broadcast %cst_14 : f32 to vector<256x128xf32>
    %20 = vector.extract_strided_slice %18 {offsets = [0, 0, 0], sizes = [16, 16, 12], strides = [1, 1, 1]} : vector<18x16x12xbf16> to vector<16x16x12xbf16>
    %21 = vector.shape_cast %20 : vector<16x16x12xbf16> to vector<256x12xbf16>
    %c0_15 = arith.constant 0 : index
    %c0_16 = arith.constant 0 : index
    %c0_17 = arith.constant 0 : index
    %22 = vector.load %arg5[%c0_15, %c0_16, %c0_17] : memref<3x12x128xbf16, #tpu.memory_space<vmem>>, vector<1x12x128xbf16>
    %23 = vector.shape_cast %22 : vector<1x12x128xbf16> to vector<12x128xbf16>
    %cst_18 = arith.constant dense<0.000000e+00> : vector<256x128xf32>
    %24 = tpu.matmul %21, %23, %cst_18 {dimension_numbers = #tpu.dot_dimension_numbers<[1], [0], [0], [1], [0, 0, 1, 1], [], []>} : vector<256x12xbf16>, vector<12x128xbf16>, vector<256x128xf32> -> vector<256x128xf32>
    %25 = arith.addf %19, %24 : vector<256x128xf32>
    %26 = vector.extract_strided_slice %18 {offsets = [1, 0, 0], sizes = [16, 16, 12], strides = [1, 1, 1]} : vector<18x16x12xbf16> to vector<16x16x12xbf16>
    %27 = vector.shape_cast %26 : vector<16x16x12xbf16> to vector<256x12xbf16>
    %c1 = arith.constant 1 : index
    %c0_19 = arith.constant 0 : index
    %c0_20 = arith.constant 0 : index
    %28 = vector.load %arg5[%c1, %c0_19, %c0_20] : memref<3x12x128xbf16, #tpu.memory_space<vmem>>, vector<1x12x128xbf16>
    %29 = vector.shape_cast %28 : vector<1x12x128xbf16> to vector<12x128xbf16>
    %cst_21 = arith.constant dense<0.000000e+00> : vector<256x128xf32>
    %30 = tpu.matmul %27, %29, %cst_21 {dimension_numbers = #tpu.dot_dimension_numbers<[1], [0], [0], [1], [0, 0, 1, 1], [], []>} : vector<256x12xbf16>, vector<12x128xbf16>, vector<256x128xf32> -> vector<256x128xf32>
    %31 = arith.addf %25, %30 : vector<256x128xf32>
    %32 = vector.extract_strided_slice %18 {offsets = [2, 0, 0], sizes = [16, 16, 12], strides = [1, 1, 1]} : vector<18x16x12xbf16> to vector<16x16x12xbf16>
    %33 = vector.shape_cast %32 : vector<16x16x12xbf16> to vector<256x12xbf16>
    %c2 = arith.constant 2 : index
    %c0_22 = arith.constant 0 : index
    %c0_23 = arith.constant 0 : index
    %34 = vector.load %arg5[%c2, %c0_22, %c0_23] : memref<3x12x128xbf16, #tpu.memory_space<vmem>>, vector<1x12x128xbf16>
    %35 = vector.shape_cast %34 : vector<1x12x128xbf16> to vector<12x128xbf16>
    %cst_24 = arith.constant dense<0.000000e+00> : vector<256x128xf32>
    %36 = tpu.matmul %33, %35, %cst_24 {dimension_numbers = #tpu.dot_dimension_numbers<[1], [0], [0], [1], [0, 0, 1, 1], [], []>} : vector<256x12xbf16>, vector<12x128xbf16>, vector<256x128xf32> -> vector<256x128xf32>
    %37 = arith.addf %31, %36 : vector<256x128xf32>
    %38 = arith.truncf %37 : vector<256x128xf32> to vector<256x128xbf16>
    %39 = arith.extf %38 : vector<256x128xbf16> to vector<256x128xf32>
    %cst_25 = arith.constant dense<0.000000e+00> : vector<128xf32>
    %40 = vector.multi_reduction <add>, %39, %cst_25 [0] : vector<256x128xf32> to vector<128xf32>
    %41 = vector.shape_cast %40 : vector<128xf32> to vector<1x128xf32>
    %42 = arith.mulf %39, %39 : vector<256x128xf32>
    %cst_26 = arith.constant dense<0.000000e+00> : vector<128xf32>
    %43 = vector.multi_reduction <add>, %42, %cst_26 [0] : vector<256x128xf32> to vector<128xf32>
    %44 = vector.shape_cast %43 : vector<128xf32> to vector<1x128xf32>
    %45 = tpu.concatenate %41, %44 in 0 : vector<1x128xf32>, vector<1x128xf32> -> vector<2x128xf32>
    %c0_27 = arith.constant 0 : index
    %c0_28 = arith.constant 0 : index
    %c0_29 = arith.constant 0 : index
    %c0_30 = arith.constant 0 : index
    %46 = vector.load %arg9[%c0_27, %c0_28, %c0_29, %c0_30] : memref<1x1x2x128xf32, #tpu.memory_space<vmem>>, vector<1x1x2x128xf32>
    %47 = vector.shape_cast %46 : vector<1x1x2x128xf32> to vector<2x128xf32>
    %48 = vector.shape_cast %45 : vector<2x128xf32> to vector<1x1x2x128xf32>
    tpu.vector_store %arg9[%c0_27, %c0_28, %c0_29, %c0_30], %48 {strides = array<i32>} : memref<1x1x2x128xf32, #tpu.memory_space<vmem>>, vector<1x1x2x128xf32>,
    %49 = vector.shape_cast %39 : vector<256x128xf32> to vector<16x16x128xf32>
    %50 = arith.truncf %49 : vector<16x16x128xf32> to vector<16x16x128xbf16>
    %c0_31 = arith.constant 0 : index
    %c0_32 = arith.constant 0 : index
    %c0_33 = arith.constant 0 : index
    %c0_34 = arith.constant 0 : index
    %51 = vector.load %arg8[%c0_31, %c0_32, %c0_33, %c0_34] : memref<1x16x16x128xbf16, #tpu.memory_space<vmem>>, vector<1x16x16x128xbf16>
    %52 = vector.shape_cast %51 : vector<1x16x16x128xbf16> to vector<16x16x128xbf16>
    %53 = vector.shape_cast %50 : vector<16x16x128xbf16> to vector<1x16x16x128xbf16>
    tpu.vector_store %arg8[%c0_31, %c0_32, %c0_33, %c0_34], %53 {strides = array<i32>} : memref<1x16x16x128xbf16, #tpu.memory_space<vmem>>, vector<1x16x16x128xbf16>,
    return
  }
  func.func @transform_0(%arg0: i32, %arg1: i32) -> (i32, i32, i32, i32) {
    %c0_i32 = arith.constant 0 : i32
    %c0_i32_0 = arith.constant 0 : i32
    %c0_i32_1 = arith.constant 0 : i32
    return %arg0, %arg1, %c0_i32, %c0_i32_0 : i32, i32, i32, i32
  }
  func.func @transform_1(%arg0: i32, %arg1: i32) -> (i32, i32, i32, i32) {
    %c16_i32 = arith.constant 16 : i32
    %0 = arith.muli %arg1, %c16_i32 : i32
    %c1_i32 = arith.constant 1 : i32
    %1 = arith.subi %0, %c1_i32 : i32
    %c0_i32 = arith.constant 0 : i32
    %2 = arith.maxsi %1, %c0_i32 : i32
    %c0_i32_0 = arith.constant 0 : i32
    %c0_i32_1 = arith.constant 0 : i32
    %c0_i32_2 = arith.constant 0 : i32
    return %arg0, %2, %c0_i32_0, %c0_i32_1 : i32, i32, i32, i32
  }
  func.func @transform_2(%arg0: i32, %arg1: i32) -> (i32, i32, i32, i32) {
    %c1_i32 = arith.constant 1 : i32
    %0 = arith.addi %arg1, %c1_i32 : i32
    %c16_i32 = arith.constant 16 : i32
    %1 = arith.muli %0, %c16_i32 : i32
    %c15_i32 = arith.constant 15 : i32
    %2 = arith.minsi %1, %c15_i32 : i32
    %c0_i32 = arith.constant 0 : i32
    %c0_i32_0 = arith.constant 0 : i32
    %c0_i32_1 = arith.constant 0 : i32
    return %arg0, %2, %c0_i32, %c0_i32_0 : i32, i32, i32, i32
  }
  func.func @transform_3(%arg0: i32, %arg1: i32) -> (i32, i32, i32) {
    %c0_i32 = arith.constant 0 : i32
    %c0_i32_0 = arith.constant 0 : i32
    %c0_i32_1 = arith.constant 0 : i32
    %c0_i32_2 = arith.constant 0 : i32
    return %c0_i32, %c0_i32_0, %c0_i32_1 : i32, i32, i32
  }
  func.func @transform_4(%arg0: i32, %arg1: i32) -> (i32, i32) {
    %c0_i32 = arith.constant 0 : i32
    %c0_i32_0 = arith.constant 0 : i32
    %c0_i32_1 = arith.constant 0 : i32
    return %c0_i32, %c0_i32_0 : i32, i32
  }
  func.func @transform_5(%arg0: i32, %arg1: i32) -> (i32, i32) {
    %c0_i32 = arith.constant 0 : i32
    %c0_i32_0 = arith.constant 0 : i32
    %c0_i32_1 = arith.constant 0 : i32
    return %c0_i32, %c0_i32_0 : i32, i32
  }
  func.func @transform_6(%arg0: i32, %arg1: i32) -> (i32, i32, i32, i32) {
    %c0_i32 = arith.constant 0 : i32
    %c0_i32_0 = arith.constant 0 : i32
    %c0_i32_1 = arith.constant 0 : i32
    return %arg0, %arg1, %c0_i32, %c0_i32_0 : i32, i32, i32, i32
  }
  func.func @transform_7(%arg0: i32, %arg1: i32) -> (i32, i32, i32, i32) {
    %c0_i32 = arith.constant 0 : i32
    %c0_i32_0 = arith.constant 0 : i32
    %c0_i32_1 = arith.constant 0 : i32
    return %arg0, %arg1, %c0_i32, %c0_i32_0 : i32, i32, i32, i32
  }
}

module attributes {stable_mosaic.version = 11 : i64} {
  func.func @_conv_pass_kernel(%arg0: i32, %arg1: i32, %arg2: memref<1x16x16x128xbf16, #tpu.memory_space<vmem>>, %arg3: memref<1x1x16x128xbf16, #tpu.memory_space<vmem>>, %arg4: memref<1x1x16x128xbf16, #tpu.memory_space<vmem>>, %arg5: memref<3x384x128xbf16, #tpu.memory_space<vmem>>, %arg6: memref<1x128xf32, #tpu.memory_space<vmem>>, %arg7: memref<1x128xf32, #tpu.memory_space<vmem>>, %arg8: memref<1x16x16x128xbf16, #tpu.memory_space<vmem>>, %arg9: memref<1x1x2x128xf32, #tpu.memory_space<vmem>>) attributes {dimension_semantics = [#tpu.dimension_semantics<parallel>, #tpu.dimension_semantics<parallel>], iteration_bounds = array<i64: 2, 1>, scalar_prefetch = 0 : i64, scratch_operands = 0 : i64, tpu.core_type = #tpu.core_type<tc>, window_params = [{transform_indices = @transform_0, window_bounds = array<i64: 1, 16, 16, 128>}, {transform_indices = @transform_1, window_bounds = array<i64: 1, 1, 16, 128>}, {transform_indices = @transform_2, window_bounds = array<i64: 1, 1, 16, 128>}, {pipeline_mode = #tpu.pipeline_mode<synchronous>, transform_indices = @transform_3, window_bounds = array<i64: 3, 384, 128>}, {pipeline_mode = #tpu.pipeline_mode<synchronous>, transform_indices = @transform_4, window_bounds = array<i64: 1, 128>}, {pipeline_mode = #tpu.pipeline_mode<synchronous>, transform_indices = @transform_5, window_bounds = array<i64: 1, 128>}, {transform_indices = @transform_6, window_bounds = array<i64: 1, 16, 16, 128>}, {transform_indices = @transform_7, window_bounds = array<i64: 1, 1, 2, 128>}]} {
    %c0 = arith.constant 0 : index
    %c0_0 = arith.constant 0 : index
    %c0_1 = arith.constant 0 : index
    %c0_2 = arith.constant 0 : index
    %0 = vector.load %arg2[%c0, %c0_0, %c0_1, %c0_2] : memref<1x16x16x128xbf16, #tpu.memory_space<vmem>>, vector<1x16x16x128xbf16>
    %1 = vector.shape_cast %0 : vector<1x16x16x128xbf16> to vector<16x16x128xbf16>
    %2 = arith.extf %1 : vector<16x16x128xbf16> to vector<16x16x128xf32>
    %c0_3 = arith.constant 0 : index
    %c0_4 = arith.constant 0 : index
    %3 = vector.load %arg6[%c0_3, %c0_4] : memref<1x128xf32, #tpu.memory_space<vmem>>, vector<1x128xf32>
    %4 = vector.shape_cast %3 : vector<1x128xf32> to vector<1x1x128xf32>
    %5 = vector.broadcast %4 : vector<1x1x128xf32> to vector<16x16x128xf32>
    %6 = arith.mulf %2, %5 : vector<16x16x128xf32>
    %c0_5 = arith.constant 0 : index
    %c0_6 = arith.constant 0 : index
    %7 = vector.load %arg7[%c0_5, %c0_6] : memref<1x128xf32, #tpu.memory_space<vmem>>, vector<1x128xf32>
    %8 = vector.shape_cast %7 : vector<1x128xf32> to vector<1x1x128xf32>
    %9 = vector.broadcast %8 : vector<1x1x128xf32> to vector<16x16x128xf32>
    %10 = arith.addf %6, %9 : vector<16x16x128xf32>
    %cst = arith.constant 0.000000e+00 : f32
    %11 = vector.broadcast %cst : f32 to vector<16x16x128xf32>
    %12 = arith.maximumf %10, %11 : vector<16x16x128xf32>
    %13 = arith.truncf %12 : vector<16x16x128xf32> to vector<16x16x128xbf16>
    %c0_7 = arith.constant 0 : index
    %c0_8 = arith.constant 0 : index
    %c0_9 = arith.constant 0 : index
    %c0_10 = arith.constant 0 : index
    %14 = vector.load %arg3[%c0_7, %c0_8, %c0_9, %c0_10] : memref<1x1x16x128xbf16, #tpu.memory_space<vmem>>, vector<1x1x16x128xbf16>
    %15 = vector.shape_cast %14 : vector<1x1x16x128xbf16> to vector<1x16x128xbf16>
    %16 = arith.extf %15 : vector<1x16x128xbf16> to vector<1x16x128xf32>
    %c0_11 = arith.constant 0 : index
    %c0_12 = arith.constant 0 : index
    %17 = vector.load %arg6[%c0_11, %c0_12] : memref<1x128xf32, #tpu.memory_space<vmem>>, vector<1x128xf32>
    %18 = vector.shape_cast %17 : vector<1x128xf32> to vector<1x1x128xf32>
    %19 = vector.broadcast %18 : vector<1x1x128xf32> to vector<1x16x128xf32>
    %20 = arith.mulf %16, %19 : vector<1x16x128xf32>
    %c0_13 = arith.constant 0 : index
    %c0_14 = arith.constant 0 : index
    %21 = vector.load %arg7[%c0_13, %c0_14] : memref<1x128xf32, #tpu.memory_space<vmem>>, vector<1x128xf32>
    %22 = vector.shape_cast %21 : vector<1x128xf32> to vector<1x1x128xf32>
    %23 = vector.broadcast %22 : vector<1x1x128xf32> to vector<1x16x128xf32>
    %24 = arith.addf %20, %23 : vector<1x16x128xf32>
    %cst_15 = arith.constant 0.000000e+00 : f32
    %25 = vector.broadcast %cst_15 : f32 to vector<1x16x128xf32>
    %26 = arith.maximumf %24, %25 : vector<1x16x128xf32>
    %27 = arith.truncf %26 : vector<1x16x128xf32> to vector<1x16x128xbf16>
    %c0_16 = arith.constant 0 : index
    %c0_17 = arith.constant 0 : index
    %c0_18 = arith.constant 0 : index
    %c0_19 = arith.constant 0 : index
    %28 = vector.load %arg4[%c0_16, %c0_17, %c0_18, %c0_19] : memref<1x1x16x128xbf16, #tpu.memory_space<vmem>>, vector<1x1x16x128xbf16>
    %29 = vector.shape_cast %28 : vector<1x1x16x128xbf16> to vector<1x16x128xbf16>
    %30 = arith.extf %29 : vector<1x16x128xbf16> to vector<1x16x128xf32>
    %c0_20 = arith.constant 0 : index
    %c0_21 = arith.constant 0 : index
    %31 = vector.load %arg6[%c0_20, %c0_21] : memref<1x128xf32, #tpu.memory_space<vmem>>, vector<1x128xf32>
    %32 = vector.shape_cast %31 : vector<1x128xf32> to vector<1x1x128xf32>
    %33 = vector.broadcast %32 : vector<1x1x128xf32> to vector<1x16x128xf32>
    %34 = arith.mulf %30, %33 : vector<1x16x128xf32>
    %c0_22 = arith.constant 0 : index
    %c0_23 = arith.constant 0 : index
    %35 = vector.load %arg7[%c0_22, %c0_23] : memref<1x128xf32, #tpu.memory_space<vmem>>, vector<1x128xf32>
    %36 = vector.shape_cast %35 : vector<1x128xf32> to vector<1x1x128xf32>
    %37 = vector.broadcast %36 : vector<1x1x128xf32> to vector<1x16x128xf32>
    %38 = arith.addf %34, %37 : vector<1x16x128xf32>
    %cst_24 = arith.constant 0.000000e+00 : f32
    %39 = vector.broadcast %cst_24 : f32 to vector<1x16x128xf32>
    %40 = arith.maximumf %38, %39 : vector<1x16x128xf32>
    %41 = arith.truncf %40 : vector<1x16x128xf32> to vector<1x16x128xbf16>
    %c0_i32 = arith.constant 0 : i32
    %42 = arith.cmpi sgt, %arg1, %c0_i32 : i32
    %cst_25 = arith.constant 0.000000e+00 : bf16
    %43 = vector.broadcast %cst_25 : bf16 to vector<1x16x128xbf16>
    %44 = arith.select %42, %27, %43 : vector<1x16x128xbf16>
    %c0_i32_26 = arith.constant 0 : i32
    %45 = arith.cmpi slt, %arg1, %c0_i32_26 : i32
    %cst_27 = arith.constant 0.000000e+00 : bf16
    %46 = vector.broadcast %cst_27 : bf16 to vector<1x16x128xbf16>
    %47 = arith.select %45, %41, %46 : vector<1x16x128xbf16>
    %48 = tpu.concatenate %44, %13, %47 in 0 : vector<1x16x128xbf16>, vector<16x16x128xbf16>, vector<1x16x128xbf16> -> vector<18x16x128xbf16>
    %cst_28 = arith.constant 0.000000e+00 : bf16
    %49 = vector.broadcast %cst_28 : bf16 to vector<18x1x128xbf16>
    %50 = vector.extract_strided_slice %48 {offsets = [0, 0, 0], sizes = [18, 15, 128], strides = [1, 1, 1]} : vector<18x16x128xbf16> to vector<18x15x128xbf16>
    %51 = tpu.concatenate %49, %50 in 1 : vector<18x1x128xbf16>, vector<18x15x128xbf16> -> vector<18x16x128xbf16>
    %52 = vector.extract_strided_slice %48 {offsets = [0, 1, 0], sizes = [18, 15, 128], strides = [1, 1, 1]} : vector<18x16x128xbf16> to vector<18x15x128xbf16>
    %53 = tpu.concatenate %52, %49 in 1 : vector<18x15x128xbf16>, vector<18x1x128xbf16> -> vector<18x16x128xbf16>
    %54 = tpu.concatenate %51, %48, %53 in 2 : vector<18x16x128xbf16>, vector<18x16x128xbf16>, vector<18x16x128xbf16> -> vector<18x16x384xbf16>
    %cst_29 = arith.constant 0.000000e+00 : f32
    %55 = vector.broadcast %cst_29 : f32 to vector<256x128xf32>
    %56 = vector.extract_strided_slice %54 {offsets = [0, 0, 0], sizes = [16, 16, 384], strides = [1, 1, 1]} : vector<18x16x384xbf16> to vector<16x16x384xbf16>
    %57 = vector.shape_cast %56 : vector<16x16x384xbf16> to vector<256x384xbf16>
    %c0_30 = arith.constant 0 : index
    %c0_31 = arith.constant 0 : index
    %c0_32 = arith.constant 0 : index
    %58 = vector.load %arg5[%c0_30, %c0_31, %c0_32] : memref<3x384x128xbf16, #tpu.memory_space<vmem>>, vector<1x384x128xbf16>
    %59 = vector.shape_cast %58 : vector<1x384x128xbf16> to vector<384x128xbf16>
    %cst_33 = arith.constant dense<0.000000e+00> : vector<256x128xf32>
    %60 = tpu.matmul %57, %59, %cst_33 {dimension_numbers = #tpu.dot_dimension_numbers<[1], [0], [0], [1], [0, 0, 1, 1], [], []>} : vector<256x384xbf16>, vector<384x128xbf16>, vector<256x128xf32> -> vector<256x128xf32>
    %61 = arith.addf %55, %60 : vector<256x128xf32>
    %62 = vector.extract_strided_slice %54 {offsets = [1, 0, 0], sizes = [16, 16, 384], strides = [1, 1, 1]} : vector<18x16x384xbf16> to vector<16x16x384xbf16>
    %63 = vector.shape_cast %62 : vector<16x16x384xbf16> to vector<256x384xbf16>
    %c1 = arith.constant 1 : index
    %c0_34 = arith.constant 0 : index
    %c0_35 = arith.constant 0 : index
    %64 = vector.load %arg5[%c1, %c0_34, %c0_35] : memref<3x384x128xbf16, #tpu.memory_space<vmem>>, vector<1x384x128xbf16>
    %65 = vector.shape_cast %64 : vector<1x384x128xbf16> to vector<384x128xbf16>
    %cst_36 = arith.constant dense<0.000000e+00> : vector<256x128xf32>
    %66 = tpu.matmul %63, %65, %cst_36 {dimension_numbers = #tpu.dot_dimension_numbers<[1], [0], [0], [1], [0, 0, 1, 1], [], []>} : vector<256x384xbf16>, vector<384x128xbf16>, vector<256x128xf32> -> vector<256x128xf32>
    %67 = arith.addf %61, %66 : vector<256x128xf32>
    %68 = vector.extract_strided_slice %54 {offsets = [2, 0, 0], sizes = [16, 16, 384], strides = [1, 1, 1]} : vector<18x16x384xbf16> to vector<16x16x384xbf16>
    %69 = vector.shape_cast %68 : vector<16x16x384xbf16> to vector<256x384xbf16>
    %c2 = arith.constant 2 : index
    %c0_37 = arith.constant 0 : index
    %c0_38 = arith.constant 0 : index
    %70 = vector.load %arg5[%c2, %c0_37, %c0_38] : memref<3x384x128xbf16, #tpu.memory_space<vmem>>, vector<1x384x128xbf16>
    %71 = vector.shape_cast %70 : vector<1x384x128xbf16> to vector<384x128xbf16>
    %cst_39 = arith.constant dense<0.000000e+00> : vector<256x128xf32>
    %72 = tpu.matmul %69, %71, %cst_39 {dimension_numbers = #tpu.dot_dimension_numbers<[1], [0], [0], [1], [0, 0, 1, 1], [], []>} : vector<256x384xbf16>, vector<384x128xbf16>, vector<256x128xf32> -> vector<256x128xf32>
    %73 = arith.addf %67, %72 : vector<256x128xf32>
    %74 = arith.truncf %73 : vector<256x128xf32> to vector<256x128xbf16>
    %75 = arith.extf %74 : vector<256x128xbf16> to vector<256x128xf32>
    %cst_40 = arith.constant dense<0.000000e+00> : vector<128xf32>
    %76 = vector.multi_reduction <add>, %75, %cst_40 [0] : vector<256x128xf32> to vector<128xf32>
    %77 = vector.shape_cast %76 : vector<128xf32> to vector<1x128xf32>
    %78 = arith.mulf %75, %75 : vector<256x128xf32>
    %cst_41 = arith.constant dense<0.000000e+00> : vector<128xf32>
    %79 = vector.multi_reduction <add>, %78, %cst_41 [0] : vector<256x128xf32> to vector<128xf32>
    %80 = vector.shape_cast %79 : vector<128xf32> to vector<1x128xf32>
    %81 = tpu.concatenate %77, %80 in 0 : vector<1x128xf32>, vector<1x128xf32> -> vector<2x128xf32>
    %c0_42 = arith.constant 0 : index
    %c0_43 = arith.constant 0 : index
    %c0_44 = arith.constant 0 : index
    %c0_45 = arith.constant 0 : index
    %82 = vector.load %arg9[%c0_42, %c0_43, %c0_44, %c0_45] : memref<1x1x2x128xf32, #tpu.memory_space<vmem>>, vector<1x1x2x128xf32>
    %83 = vector.shape_cast %82 : vector<1x1x2x128xf32> to vector<2x128xf32>
    %84 = vector.shape_cast %81 : vector<2x128xf32> to vector<1x1x2x128xf32>
    tpu.vector_store %arg9[%c0_42, %c0_43, %c0_44, %c0_45], %84 {strides = array<i32>} : memref<1x1x2x128xf32, #tpu.memory_space<vmem>>, vector<1x1x2x128xf32>,
    %85 = vector.shape_cast %75 : vector<256x128xf32> to vector<16x16x128xf32>
    %86 = arith.truncf %85 : vector<16x16x128xf32> to vector<16x16x128xbf16>
    %c0_46 = arith.constant 0 : index
    %c0_47 = arith.constant 0 : index
    %c0_48 = arith.constant 0 : index
    %c0_49 = arith.constant 0 : index
    %87 = vector.load %arg8[%c0_46, %c0_47, %c0_48, %c0_49] : memref<1x16x16x128xbf16, #tpu.memory_space<vmem>>, vector<1x16x16x128xbf16>
    %88 = vector.shape_cast %87 : vector<1x16x16x128xbf16> to vector<16x16x128xbf16>
    %89 = vector.shape_cast %86 : vector<16x16x128xbf16> to vector<1x16x16x128xbf16>
    tpu.vector_store %arg8[%c0_46, %c0_47, %c0_48, %c0_49], %89 {strides = array<i32>} : memref<1x16x16x128xbf16, #tpu.memory_space<vmem>>, vector<1x16x16x128xbf16>,
    return
  }
  func.func @transform_0(%arg0: i32, %arg1: i32) -> (i32, i32, i32, i32) {
    %c0_i32 = arith.constant 0 : i32
    %c0_i32_0 = arith.constant 0 : i32
    %c0_i32_1 = arith.constant 0 : i32
    return %arg0, %arg1, %c0_i32, %c0_i32_0 : i32, i32, i32, i32
  }
  func.func @transform_1(%arg0: i32, %arg1: i32) -> (i32, i32, i32, i32) {
    %c16_i32 = arith.constant 16 : i32
    %0 = arith.muli %arg1, %c16_i32 : i32
    %c1_i32 = arith.constant 1 : i32
    %1 = arith.subi %0, %c1_i32 : i32
    %c0_i32 = arith.constant 0 : i32
    %2 = arith.maxsi %1, %c0_i32 : i32
    %c0_i32_0 = arith.constant 0 : i32
    %c0_i32_1 = arith.constant 0 : i32
    %c0_i32_2 = arith.constant 0 : i32
    return %arg0, %2, %c0_i32_0, %c0_i32_1 : i32, i32, i32, i32
  }
  func.func @transform_2(%arg0: i32, %arg1: i32) -> (i32, i32, i32, i32) {
    %c1_i32 = arith.constant 1 : i32
    %0 = arith.addi %arg1, %c1_i32 : i32
    %c16_i32 = arith.constant 16 : i32
    %1 = arith.muli %0, %c16_i32 : i32
    %c15_i32 = arith.constant 15 : i32
    %2 = arith.minsi %1, %c15_i32 : i32
    %c0_i32 = arith.constant 0 : i32
    %c0_i32_0 = arith.constant 0 : i32
    %c0_i32_1 = arith.constant 0 : i32
    return %arg0, %2, %c0_i32, %c0_i32_0 : i32, i32, i32, i32
  }
  func.func @transform_3(%arg0: i32, %arg1: i32) -> (i32, i32, i32) {
    %c0_i32 = arith.constant 0 : i32
    %c0_i32_0 = arith.constant 0 : i32
    %c0_i32_1 = arith.constant 0 : i32
    %c0_i32_2 = arith.constant 0 : i32
    return %c0_i32, %c0_i32_0, %c0_i32_1 : i32, i32, i32
  }
  func.func @transform_4(%arg0: i32, %arg1: i32) -> (i32, i32) {
    %c0_i32 = arith.constant 0 : i32
    %c0_i32_0 = arith.constant 0 : i32
    %c0_i32_1 = arith.constant 0 : i32
    return %c0_i32, %c0_i32_0 : i32, i32
  }
  func.func @transform_5(%arg0: i32, %arg1: i32) -> (i32, i32) {
    %c0_i32 = arith.constant 0 : i32
    %c0_i32_0 = arith.constant 0 : i32
    %c0_i32_1 = arith.constant 0 : i32
    return %c0_i32, %c0_i32_0 : i32, i32
  }
  func.func @transform_6(%arg0: i32, %arg1: i32) -> (i32, i32, i32, i32) {
    %c0_i32 = arith.constant 0 : i32
    %c0_i32_0 = arith.constant 0 : i32
    %c0_i32_1 = arith.constant 0 : i32
    return %arg0, %arg1, %c0_i32, %c0_i32_0 : i32, i32, i32, i32
  }
  func.func @transform_7(%arg0: i32, %arg1: i32) -> (i32, i32, i32, i32) {
    %c0_i32 = arith.constant 0 : i32
    %c0_i32_0 = arith.constant 0 : i32
    %c0_i32_1 = arith.constant 0 : i32
    return %arg0, %arg1, %c0_i32, %c0_i32_0 : i32, i32, i32, i32
  }
}

module attributes {stable_mosaic.version = 11 : i64} {
  func.func @_bn_relu_kernel(%arg0: i32, %arg1: i32, %arg2: memref<1x16x16x128xbf16, #tpu.memory_space<vmem>>, %arg3: memref<1x8xf32, #tpu.memory_space<vmem>>, %arg4: memref<1x8xf32, #tpu.memory_space<vmem>>, %arg5: memref<1x16x16x8xf32, #tpu.memory_space<vmem>>) attributes {dimension_semantics = [#tpu.dimension_semantics<parallel>, #tpu.dimension_semantics<parallel>], iteration_bounds = array<i64: 2, 1>, scalar_prefetch = 0 : i64, scratch_operands = 0 : i64, tpu.core_type = #tpu.core_type<tc>, window_params = [{transform_indices = @transform_0, window_bounds = array<i64: 1, 16, 16, 128>}, {pipeline_mode = #tpu.pipeline_mode<synchronous>, transform_indices = @transform_1, window_bounds = array<i64: 1, 8>}, {pipeline_mode = #tpu.pipeline_mode<synchronous>, transform_indices = @transform_2, window_bounds = array<i64: 1, 8>}, {transform_indices = @transform_3, window_bounds = array<i64: 1, 16, 16, 8>}]} {
    %c0 = arith.constant 0 : index
    %c0_0 = arith.constant 0 : index
    %c0_1 = arith.constant 0 : index
    %c0_2 = arith.constant 0 : index
    %0 = vector.load %arg2[%c0, %c0_0, %c0_1, %c0_2] : memref<1x16x16x128xbf16, #tpu.memory_space<vmem>>, vector<1x16x16x8xbf16>
    %1 = vector.shape_cast %0 : vector<1x16x16x8xbf16> to vector<16x16x8xbf16>
    %2 = arith.extf %1 : vector<16x16x8xbf16> to vector<16x16x8xf32>
    %c0_3 = arith.constant 0 : index
    %c0_4 = arith.constant 0 : index
    %3 = vector.load %arg3[%c0_3, %c0_4] : memref<1x8xf32, #tpu.memory_space<vmem>>, vector<1x8xf32>
    %4 = vector.shape_cast %3 : vector<1x8xf32> to vector<1x1x8xf32>
    %5 = vector.broadcast %4 : vector<1x1x8xf32> to vector<16x16x8xf32>
    %6 = arith.mulf %2, %5 : vector<16x16x8xf32>
    %c0_5 = arith.constant 0 : index
    %c0_6 = arith.constant 0 : index
    %7 = vector.load %arg4[%c0_5, %c0_6] : memref<1x8xf32, #tpu.memory_space<vmem>>, vector<1x8xf32>
    %8 = vector.shape_cast %7 : vector<1x8xf32> to vector<1x1x8xf32>
    %9 = vector.broadcast %8 : vector<1x1x8xf32> to vector<16x16x8xf32>
    %10 = arith.addf %6, %9 : vector<16x16x8xf32>
    %cst = arith.constant 0.000000e+00 : f32
    %11 = vector.broadcast %cst : f32 to vector<16x16x8xf32>
    %12 = arith.maximumf %10, %11 : vector<16x16x8xf32>
    %c0_7 = arith.constant 0 : index
    %c0_8 = arith.constant 0 : index
    %c0_9 = arith.constant 0 : index
    %c0_10 = arith.constant 0 : index
    %13 = vector.load %arg5[%c0_7, %c0_8, %c0_9, %c0_10] : memref<1x16x16x8xf32, #tpu.memory_space<vmem>>, vector<1x16x16x8xf32>
    %14 = vector.shape_cast %13 : vector<1x16x16x8xf32> to vector<16x16x8xf32>
    %15 = vector.shape_cast %12 : vector<16x16x8xf32> to vector<1x16x16x8xf32>
    tpu.vector_store %arg5[%c0_7, %c0_8, %c0_9, %c0_10], %15 {strides = array<i32>} : memref<1x16x16x8xf32, #tpu.memory_space<vmem>>, vector<1x16x16x8xf32>,
    return
  }
  func.func @transform_0(%arg0: i32, %arg1: i32) -> (i32, i32, i32, i32) {
    %c0_i32 = arith.constant 0 : i32
    %c0_i32_0 = arith.constant 0 : i32
    %c0_i32_1 = arith.constant 0 : i32
    return %arg0, %arg1, %c0_i32, %c0_i32_0 : i32, i32, i32, i32
  }
  func.func @transform_1(%arg0: i32, %arg1: i32) -> (i32, i32) {
    %c0_i32 = arith.constant 0 : i32
    %c0_i32_0 = arith.constant 0 : i32
    %c0_i32_1 = arith.constant 0 : i32
    return %c0_i32, %c0_i32_0 : i32, i32
  }
  func.func @transform_2(%arg0: i32, %arg1: i32) -> (i32, i32) {
    %c0_i32 = arith.constant 0 : i32
    %c0_i32_0 = arith.constant 0 : i32
    %c0_i32_1 = arith.constant 0 : i32
    return %c0_i32, %c0_i32_0 : i32, i32
  }
  func.func @transform_3(%arg0: i32, %arg1: i32) -> (i32, i32, i32, i32) {
    %c0_i32 = arith.constant 0 : i32
    %c0_i32_0 = arith.constant 0 : i32
    %c0_i32_1 = arith.constant 0 : i32
    return %arg0, %arg1, %c0_i32, %c0_i32_0 : i32, i32, i32, i32
  }
}

</mosaic_0001>

<bundles_post_ra>
// kernel: double_conv.5
= control target key start
LH: loop header
LB: loop body
LE: loop exit
PB: predicated region body
PF: predicated region fallthrough
CT: control target
= control target key end

     0   :  { %s680_s12 = smov 0   ;;  %s682_s13 = smov 0   ;;  %s875_s0 = inlined_call_operand.vmem [shape: bf16[2,16,16,128], index: 0, kind: input, shape index: {}]   ;;  %s876_s1 = inlined_call_operand.vmem [shape: f32[1,8], index: 1, kind: input, shape index: {}]   ;;  %s877_s2 = inlined_call_operand.vmem [shape: f32[1,8], index: 2, kind: input, shape index: {}]   ;;  %s878_s3 = inlined_call_operand.vmem [shape: f32[2,16,16,8], index: 3, kind: output, shape index: {}]  }
   0x1   :  { %s684_s14 = smov 0  }
   0x2 LB: > { %s25_s15 = sadd.s32 1, %s654_s13  ;;  %p522_p0 = scmp.ge.s32.totalorder %s658_s14, 1  ;;  %s658_s14 = sphi %s684_s14, %s13_s14   ;;  %s654_s13 = sphi %s682_s13, %s880_s13   ;;  %s650_s12 = sphi %s680_s12, %s879_s12  }
   0x3   : > { %p27_p1 = scmp.ge.s32.totalorder %s25_s15, 2  ;;  %p159_p2 = scmp.lt.s32.totalorder %s658_s14, 3 }
   0x5   : > { %s882_s15 = smov (%p27_p1, %s25_s15), 0  ;;  %p160_p3 = pnand %p522_p0, %p159_p2 }
   0x6   : > { %p194_p4 = scmp.lt.s32.totalorder (!%p160_p3), %s650_s12, 1  ;;  %v709_v0 = vld [vmem:[%s876_s1] ss:$0 sm:$0xff] (!%p160_p3)  ;;  %vm389_vm0 = vcmask (!%p160_p3), 64512  }
   0x7   : > { %163 = sbr.rel (%p160_p3) target bundleno = 54 (0x36), region = 32  ;;  %v718_v9 = vld [vmem:[%s877_s2] ss:$0 sm:$0xff] (!%p160_p3) }
   0xe   : > { %s884_s12 = smov (!%p194_p4, %s650_s12), 1 }
   0xf   : > { %s531_s16 = sshll.u32 %s884_s12, 7  ;;  %s532_s24 = sshll.u32 %s884_s12, 8 }
  0x10   : > { %s704_s19 = scalar_lea.vmem %s875_s0, %s531_s16  ;;  %s736_s27 = scalar_lea.vmem %s878_s3, %s532_s24 }
  0x11   : > { %v534_v1 = vld [vmem:[%s704_s19] sm:$0xff]   ;;  %v597_v2 = vld [vmem:[%s704_s19 + $0x8] sm:$0xff]   ;;  %v598_v3 = vld [vmem:[%s704_s19 + $0x10] sm:$0xff]  }
  0x12   : > { %v535_v4 = vunpack.c.l.bf16 %v534_v1  ;;  %v536_v5 = vunpack.c.h.bf16 %v534_v1  ;;  %v539_v6 = vunpack.c.l.bf16 %v597_v2  ;;  %v540_v7 = vunpack.c.h.bf16 %v597_v2  ;;  %v599_v8 = vld [vmem:[%s704_s19 + $0x18] sm:$0xff]   ;;  %v600_v30 = vld [vmem:[%s704_s19 + $0x20] sm:$0xff]   ;;  %v601_v31 = vld [vmem:[%s704_s19 + $0x28] sm:$0xff]  }
  0x13   : > { %v543_v10 = vunpack.c.l.bf16 %v598_v3  ;;  %v544_v11 = vunpack.c.h.bf16 %v598_v3  ;;  %v547_v12 = vunpack.c.l.bf16 %v599_v8  ;;  %v548_v13 = vunpack.c.h.bf16 %v599_v8  ;;  %v602_v36 = vld [vmem:[%s704_s19 + $0x30] sm:$0xff]   ;;  %v603_v37 = vld [vmem:[%s704_s19 + $0x38] sm:$0xff]   ;;  %v604_v3 = vld [vmem:[%s704_s19 + $0x40] sm:$0xff]  }
  0x14   : > { %v286_v14 = vmul.f32 %v535_v4, %v709_v0  ;;  %v287_v15 = vmul.f32 %v536_v5, %v709_v0  ;;  %v288_v16 = vmul.f32 %v539_v6, %v709_v0  ;;  %v289_v17 = vmul.f32 %v540_v7, %v709_v0  ;;  %v605_v4 = vld [vmem:[%s704_s19 + $0x48] sm:$0xff]  }
  0x15   : > { %v290_v18 = vmul.f32 %v543_v10, %v709_v0  ;;  %v291_v19 = vmul.f32 %v544_v11, %v709_v0  ;;  %v292_v20 = vmul.f32 %v547_v12, %v709_v0  ;;  %v293_v21 = vmul.f32 %v548_v13, %v709_v0  ;;  %v606_v10 = vld [vmem:[%s704_s19 + $0x50] sm:$0xff]   ;;  %v607_v11 = vld [vmem:[%s704_s19 + $0x58] sm:$0xff]  }
  0x16   : > { %v325_v22 = vadd.f32 %v718_v9, %v286_v14  ;;  %v326_v23 = vadd.f32 %v718_v9, %v287_v15  ;;  %v327_v24 = vadd.f32 %v718_v9, %v288_v16  ;;  %v328_v25 = vadd.f32 %v718_v9, %v289_v17 }
  0x17   : > { %v329_v26 = vadd.f32 %v718_v9, %v290_v18  ;;  %v330_v27 = vadd.f32 %v718_v9, %v291_v19  ;;  %v331_v28 = vadd.f32 %v718_v9, %v292_v20  ;;  %v332_v29 = vadd.f32 %v718_v9, %v293_v21 }
  0x18   : > { %v357_v32 = vmax.f32 %v325_v22, 0.0  ;;  %v358_v33 = vmax.f32 %v326_v23, 0.0  ;;  %v359_v34 = vmax.f32 %v327_v24, 0.0  ;;  %v360_v35 = vmax.f32 %v328_v25, 0.0 }
  0x19   : > { %v361_v38 = vmax.f32 %v329_v26, 0.0  ;;  %v362_v39 = vmax.f32 %v330_v27, 0.0  ;;  %v363_v40 = vmax.f32 %v331_v28, 0.0  ;;  %v364_v41 = vmax.f32 %v332_v29, 0.0 }
  0x1a   : > { %390 = vst.msk [vmem:[%s736_s27] sm:$0xff] %vm389_vm0, %v357_v32  ;;  %391 = vst.msk [vmem:[%s736_s27 + $0x8] sm:$0xff] %vm389_vm0, %v358_v33  ;;  %v551_v42 = vunpack.c.l.bf16 %v600_v30  ;;  %v552_v43 = vunpack.c.h.bf16 %v600_v30  ;;  %v555_v44 = vunpack.c.l.bf16 %v601_v31  ;;  %v556_v45 = vunpack.c.h.bf16 %v601_v31 }
  0x1b   : > { %392 = vst.msk [vmem:[%s736_s27 + $0x10] sm:$0xff] %vm389_vm0, %v359_v34  ;;  %393 = vst.msk [vmem:[%s736_s27 + $0x18] sm:$0xff] %vm389_vm0, %v360_v35  ;;  %v559_v46 = vunpack.c.l.bf16 %v602_v36  ;;  %v560_v47 = vunpack.c.h.bf16 %v602_v36  ;;  %v563_v48 = vunpack.c.l.bf16 %v603_v37  ;;  %v564_v49 = vunpack.c.h.bf16 %v603_v37 }
  0x1c   : > { %394 = vst.msk [vmem:[%s736_s27 + $0x20] sm:$0xff] %vm389_vm0, %v361_v38  ;;  %395 = vst.msk [vmem:[%s736_s27 + $0x28] sm:$0xff] %vm389_vm0, %v362_v39  ;;  %v294_v50 = vmul.f32 %v551_v42, %v709_v0  ;;  %v295_v51 = vmul.f32 %v552_v43, %v709_v0  ;;  %v296_v52 = vmul.f32 %v555_v44, %v709_v0  ;;  %v567_v16 = vunpack.c.l.bf16 %v604_v3 }
  0x1d   : > { %396 = vst.msk [vmem:[%s736_s27 + $0x30] sm:$0xff] %vm389_vm0, %v363_v40  ;;  %397 = vst.msk [vmem:[%s736_s27 + $0x38] sm:$0xff] %vm389_vm0, %v364_v41  ;;  %v297_v53 = vmul.f32 %v556_v45, %v709_v0  ;;  %v298_v54 = vmul.f32 %v559_v46, %v709_v0  ;;  %v299_v55 = vmul.f32 %v560_v47, %v709_v0  ;;  %v568_v17 = vunpack.c.h.bf16 %v604_v3  ;;  %v608_v40 = vld [vmem:[%s704_s19 + $0x60] sm:$0xff]   ;;  %v609_v41 = vld [vmem:[%s704_s19 + $0x68] sm:$0xff]  }
  0x1e   : > { %v300_v56 = vmul.f32 %v563_v48, %v709_v0  ;;  %v301_v57 = vmul.f32 %v564_v49, %v709_v0  ;;  %v333_v58 = vadd.f32 %v718_v9, %v294_v50  ;;  %v334_v59 = vadd.f32 %v718_v9, %v295_v51  ;;  %v610_v46 = vld [vmem:[%s704_s19 + $0x70] sm:$0xff]   ;;  %v611_v47 = vld [vmem:[%s704_s19 + $0x78] sm:$0xff]  }
  0x1f   : > { %v335_v60 = vadd.f32 %v718_v9, %v296_v52  ;;  %v336_v61 = vadd.f32 %v718_v9, %v297_v53  ;;  %v337_v62 = vadd.f32 %v718_v9, %v298_v54  ;;  %v338_v63 = vadd.f32 %v718_v9, %v299_v55 }
  0x20   : > { %v339_v1 = vadd.f32 %v718_v9, %v300_v56  ;;  %v340_v2 = vadd.f32 %v718_v9, %v301_v57  ;;  %v365_v5 = vmax.f32 %v333_v58, 0.0  ;;  %v366_v6 = vmax.f32 %v334_v59, 0.0 }
  0x21   : > { %v367_v7 = vmax.f32 %v335_v60, 0.0  ;;  %v368_v8 = vmax.f32 %v336_v61, 0.0  ;;  %v369_v12 = vmax.f32 %v337_v62, 0.0  ;;  %v370_v13 = vmax.f32 %v338_v63, 0.0 }
  0x22   : > { %v371_v14 = vmax.f32 %v339_v1, 0.0  ;;  %v372_v15 = vmax.f32 %v340_v2, 0.0  ;;  %398 = vst.msk [vmem:[%s736_s27 + $0x40] sm:$0xff] %vm389_vm0, %v365_v5  ;;  %399 = vst.msk [vmem:[%s736_s27 + $0x48] sm:$0xff] %vm389_vm0, %v366_v6  ;;  %v571_v18 = vunpack.c.l.bf16 %v605_v4  ;;  %v572_v19 = vunpack.c.h.bf16 %v605_v4 }
  0x23   : > { %400 = vst.msk [vmem:[%s736_s27 + $0x50] sm:$0xff] %vm389_vm0, %v367_v7  ;;  %401 = vst.msk [vmem:[%s736_s27 + $0x58] sm:$0xff] %vm389_vm0, %v368_v8  ;;  %v575_v20 = vunpack.c.l.bf16 %v606_v10  ;;  %v576_v21 = vunpack.c.h.bf16 %v606_v10  ;;  %v579_v22 = vunpack.c.l.bf16 %v607_v11  ;;  %v580_v23 = vunpack.c.h.bf16 %v607_v11 }
  0x24   : > { %402 = vst.msk [vmem:[%s736_s27 + $0x60] sm:$0xff] %vm389_vm0, %v369_v12  ;;  %403 = vst.msk [vmem:[%s736_s27 + $0x68] sm:$0xff] %vm389_vm0, %v370_v13  ;;  %v302_v24 = vmul.f32 %v567_v16, %v709_v0  ;;  %v303_v25 = vmul.f32 %v568_v17, %v709_v0  ;;  %v304_v26 = vmul.f32 %v571_v18, %v709_v0  ;;  %v583_v52 = vunpack.c.l.bf16 %v608_v40 }
  0x25   : > { %404 = vst.msk [vmem:[%s736_s27 + $0x70] sm:$0xff] %vm389_vm0, %v371_v14  ;;  %405 = vst.msk [vmem:[%s736_s27 + $0x78] sm:$0xff] %vm389_vm0, %v372_v15  ;;  %v305_v27 = vmul.f32 %v572_v19, %v709_v0  ;;  %v306_v28 = vmul.f32 %v575_v20, %v709_v0  ;;  %v307_v29 = vmul.f32 %v576_v21, %v709_v0  ;;  %v584_v53 = vunpack.c.h.bf16 %v608_v40 }
  0x26   : > { %v308_v30 = vmul.f32 %v579_v22, %v709_v0  ;;  %v309_v31 = vmul.f32 %v580_v23, %v709_v0  ;;  %v341_v32 = vadd.f32 %v718_v9, %v302_v24  ;;  %v342_v33 = vadd.f32 %v718_v9, %v303_v25 }
  0x27   : > { %v343_v34 = vadd.f32 %v718_v9, %v304_v26  ;;  %v344_v35 = vadd.f32 %v718_v9, %v305_v27  ;;  %v345_v36 = vadd.f32 %v718_v9, %v306_v28  ;;  %v346_v37 = vadd.f32 %v718_v9, %v307_v29 }
  0x28   : > { %v347_v38 = vadd.f32 %v718_v9, %v308_v30  ;;  %v348_v39 = vadd.f32 %v718_v9, %v309_v31  ;;  %v373_v42 = vmax.f32 %v341_v32, 0.0  ;;  %v374_v43 = vmax.f32 %v342_v33, 0.0 }
  0x29   : > { %v375_v44 = vmax.f32 %v343_v34, 0.0  ;;  %v376_v45 = vmax.f32 %v344_v35, 0.0  ;;  %v377_v48 = vmax.f32 %v345_v36, 0.0  ;;  %v378_v49 = vmax.f32 %v346_v37, 0.0 }
  0x2a   : > { %v379_v50 = vmax.f32 %v347_v38, 0.0  ;;  %v380_v51 = vmax.f32 %v348_v39, 0.0  ;;  %406 = vst.msk [vmem:[%s736_s27 + $0x80] sm:$0xff] %vm389_vm0, %v373_v42  ;;  %407 = vst.msk [vmem:[%s736_s27 + $0x88] sm:$0xff] %vm389_vm0, %v374_v43  ;;  %v587_v54 = vunpack.c.l.bf16 %v609_v41  ;;  %v588_v55 = vunpack.c.h.bf16 %v609_v41 }
  0x2b   : > { %408 = vst.msk [vmem:[%s736_s27 + $0x90] sm:$0xff] %vm389_vm0, %v375_v44  ;;  %409 = vst.msk [vmem:[%s736_s27 + $0x98] sm:$0xff] %vm389_vm0, %v376_v45  ;;  %v591_v56 = vunpack.c.l.bf16 %v610_v46  ;;  %v592_v57 = vunpack.c.h.bf16 %v610_v46  ;;  %v595_v58 = vunpack.c.l.bf16 %v611_v47  ;;  %v596_v59 = vunpack.c.h.bf16 %v611_v47 }
  0x2c   : > { %410 = vst.msk [vmem:[%s736_s27 + $0xa0] sm:$0xff] %vm389_vm0, %v377_v48  ;;  %411 = vst.msk [vmem:[%s736_s27 + $0xa8] sm:$0xff] %vm389_vm0, %v378_v49  ;;  %v310_v60 = vmul.f32 %v583_v52, %v709_v0  ;;  %v311_v61 = vmul.f32 %v584_v53, %v709_v0  ;;  %v312_v62 = vmul.f32 %v587_v54, %v709_v0 }
  0x2d   : > { %412 = vst.msk [vmem:[%s736_s27 + $0xb0] sm:$0xff] %vm389_vm0, %v379_v50  ;;  %413 = vst.msk [vmem:[%s736_s27 + $0xb8] sm:$0xff] %vm389_vm0, %v380_v51  ;;  %v313_v63 = vmul.f32 %v588_v55, %v709_v0  ;;  %v314_v1 = vmul.f32 %v591_v56, %v709_v0  ;;  %v315_v2 = vmul.f32 %v592_v57, %v709_v0 }
  0x2e   : > { %v316_v3 = vmul.f32 %v595_v58, %v709_v0  ;;  %v317_v4 = vmul.f32 %v596_v59, %v709_v0  ;;  %v349_v5 = vadd.f32 %v718_v9, %v310_v60  ;;  %v350_v6 = vadd.f32 %v718_v9, %v311_v61 }
  0x2f   : > { %v351_v7 = vadd.f32 %v718_v9, %v312_v62  ;;  %v352_v8 = vadd.f32 %v718_v9, %v313_v63  ;;  %v353_v10 = vadd.f32 %v718_v9, %v314_v1  ;;  %v354_v11 = vadd.f32 %v718_v9, %v315_v2 }
  0x30   : > { %v355_v0 = vadd.f32 %v718_v9, %v316_v3  ;;  %v356_v12 = vadd.f32 %v718_v9, %v317_v4  ;;  %v381_v13 = vmax.f32 %v349_v5, 0.0  ;;  %v382_v14 = vmax.f32 %v350_v6, 0.0 }
  0x31   : > { %v383_v15 = vmax.f32 %v351_v7, 0.0  ;;  %v384_v16 = vmax.f32 %v352_v8, 0.0  ;;  %v385_v17 = vmax.f32 %v353_v10, 0.0  ;;  %v386_v18 = vmax.f32 %v354_v11, 0.0 }
  0x32   : > { %v387_v19 = vmax.f32 %v355_v0, 0.0  ;;  %v388_v20 = vmax.f32 %v356_v12, 0.0  ;;  %414 = vst.msk [vmem:[%s736_s27 + $0xc0] sm:$0xff] %vm389_vm0, %v381_v13  ;;  %415 = vst.msk [vmem:[%s736_s27 + $0xc8] sm:$0xff] %vm389_vm0, %v382_v14 }
  0x33   : > { %416 = vst.msk [vmem:[%s736_s27 + $0xd0] sm:$0xff] %vm389_vm0, %v383_v15  ;;  %417 = vst.msk [vmem:[%s736_s27 + $0xd8] sm:$0xff] %vm389_vm0, %v384_v16 }
  0x34   : > { %418 = vst.msk [vmem:[%s736_s27 + $0xe0] sm:$0xff] %vm389_vm0, %v385_v17  ;;  %419 = vst.msk [vmem:[%s736_s27 + $0xe8] sm:$0xff] %vm389_vm0, %v386_v18 }
  0x35   : > { %420 = vst.msk [vmem:[%s736_s27 + $0xf0] sm:$0xff] %vm389_vm0, %v387_v19  ;;  %421 = vst.msk [vmem:[%s736_s27 + $0xf8] sm:$0xff] %vm389_vm0, %v388_v20 }
  0x36 PF: > { %s13_s14 = sadd.s32 1, %s658_s14   ;;  %s879_s12 = smov %s654_s13 }
  0x37   : > { %p10_p5 = scmp.ge.s32.totalorder %s13_s14, 4   ;;  %s880_s13 = smov %s882_s15 }
  0x39   :  { %12 = sbr.rel (!%p10_p5) target bundleno = 2 (0x2), region = 62 }

// kernel: double_conv.3
= control target key start
LH: loop header
LB: loop body
LE: loop exit
PB: predicated region body
PF: predicated region fallthrough
CT: control target
= control target key end

     0   :  { %s2697_s24 = smov 0   ;;  %s2699_s1 = smov 0   ;;  %s3085_s0 = inlined_call_operand.vmem [shape: bf16[2,16,16,4], index: 0, kind: input, shape index: {}, may-alias: {0,1,2}]   ;;  %s3086_s1 = inlined_call_operand.vmem [shape: bf16[2,16,16,4], index: 1, kind: input, shape index: {}, may-alias: {0,1,2}]   ;;  %s3087_s2 = inlined_call_operand.vmem [shape: bf16[2,16,16,4], index: 2, kind: input, shape index: {}, may-alias: {0,1,2}]   ;;  %s3088_s3 = inlined_call_operand.vmem [shape: bf16[3,12,128], index: 3, kind: input, shape index: {}]   ;;  %s3089_s4 = inlined_call_operand.vmem [shape: f32[1,4], index: 4, kind: input, shape index: {}]   ;;  %s3090_s5 = inlined_call_operand.vmem [shape: f32[1,4], index: 5, kind: input, shape index: {}]   ;;  %s3091_s6 = inlined_call_operand.vmem [shape: bf16[2,16,16,128], index: 6, kind: output, shape index: {0}]   ;;  %s3092_s7 = inlined_call_operand.vmem [shape: f32[2,1,2,128], index: 7, kind: output, shape index: {1}]  }
   0x1   :  { %s2701_s2 = smov 0  }
   0x2 LB: > { %s30_s4 = sadd.s32 1, %s2648_s1  ;;  %p2112_p0 = scmp.ge.s32.totalorder %s2652_s2, 1  ;;  %s2652_s2 = sphi %s2701_s2, %s18_s2   ;;  %s2648_s1 = sphi %s2699_s1, %s3098_s1   ;;  %s2644_s24 = sphi %s2697_s24, %s3097_s24  }
   0x3   : > { %p32_p1 = scmp.ge.s32.totalorder %s30_s4, 2  ;;  %p328_p2 = scmp.lt.s32.totalorder %s2652_s2, 3 }
   0x5   : > { %s3100_s4 = smov (%p32_p1, %s30_s4), 0  ;;  %p329_p3 = pnand %p2112_p0, %p328_p2 }
   0x6   : > { %p404_p4 = scmp.lt.s32.totalorder (!%p329_p3), %s2644_s24, 1  ;;  %v2654_v0 = vmov (!%p329_p3), 0   ;;  %vm824_vm0 = vcmask (!%p329_p3), 1047552   ;;  %vm825_vm1 = vsmask.f32 (!%p329_p3), 7424  ;;  %vm1070_vm2 = vcmask (!%p329_p3), 1045504  }
   0x7   : > { %332 = sbr.rel (%p329_p3) target bundleno = 475 (0x1db), region = 44  ;;  %v2715_v1 = vcombine.low (!%p329_p3), %v2654_v0, %v2654_v0  ;;  %s2655_s5 = smov (!%p329_p3), 4   ;;  %v2627_v4 = vld [vmem:[%s3088_s3 + $0x8] sm:$0x3f] (!%p329_p3)   ;;  %v2628_v5 = vld [vmem:[%s3088_s3] sm:$0x3f] (!%p329_p3)   ;;  %vm2737_vm3 = vmand (!%p329_p3), %vm824_vm0, %vm825_vm1 }
   0x8   : > { %2580 = vmatprep.subr.msk.bf16.mxu1 (!%p329_p3), %vm1070_vm2, %v2627_v4  ;;  %v1072_v9 = vsel (!%p329_p3), %vm1070_vm2, %v2627_v4, 0  ;;  %2581 = vmatprep.subr.msk.bf16.mxu0 (!%p329_p3), %vm1070_vm2, %v2628_v5  ;;  %v2746_v11 = vsel (!%p329_p3), %vm1070_vm2, %v2628_v5, 0  ;;  %s2656_s10 = smov (!%p329_p3), 8   ;;  %vm749_vm4 = vcmask (!%p329_p3), 1040384   ;;  %vm750_vm5 = vsmask.f32 (!%p329_p3), 256 }
   0x9   : > { %845 = vrot.lane.b32.xlu0 (!%p329_p3), %v2715_v1, %s2655_s5  ;;  %v606_v2 = vshrl.u32 (!%p329_p3), %v2715_v1, 16  ;;  %v609_v3 = vshll.u32 (!%p329_p3), %v2715_v1, 16  ;;  %2413 = vmatpush3.bf16.msra.mxu1 (!%p329_p3), %v1072_v9  ;;  %vm2891_vm6 = vmand (!%p329_p3), %vm749_vm4, %vm750_vm5  ;;  %vm935_vm7 = vcmask (!%p329_p3), 31744   ;;  %vm990_vm8 = vcmask (!%p329_p3), 64512  }
   0xa   : > { %2447 = vmatpush3.bf16.msra.mxu0 (!%p329_p3), %v2746_v11  ;;  %2582 = vmatprep.subr.msk.bf16.mxu1 (!%p329_p3), %vm1070_vm2, %v2628_v5  ;;  %vm1037_vm9 = vcmask (!%p329_p3), 97280  }
   0xb   : > { %v608_v6 = vrot.slane (!%p329_p3), %v606_v2, 7  ;;  %v770_v7 = vrot.slane (!%p329_p3), %v609_v3, 1 }
   0xd   : > { %v771_v13 = vor.u32 (!%p329_p3), %v770_v7, %v606_v2  ;;  %v2749_v14 = vor.u32 (!%p329_p3), %v609_v3, %v608_v6 }
   0xe   : > { %s3102_s24 = smov (!%p404_p4, %s2644_s24), 1 }
   0xf   : > { %s2229_s27 = sshll.u32 %s3102_s24, 7  ;;  %v2757_v17 = vsel %vm2737_vm3, %v771_v13, 0  ;;  %s2121_s16 = sshll.u32 %s3102_s24, 1 }
  0x10   : > { %s2735_s9 = scalar_lea.vmem %s3085_s0, %s2229_s27  ;;  %s3049_s15 = scalar_lea.vmem %s3091_s6, %s2229_s27 }
  0x11   : > { %v2611_v10 = vld [vmem:[%s2735_s9 + $0x8] sm:$0xff]   ;;  %v2612_v12 = vld [vmem:[%s2735_s9] sm:$0xff]   ;;  %v2613_v20 = vld [vmem:[%s2735_s9 + $0x10] sm:$0xff]   ;;  %s465_s19 = scalar_lea.vmem %s3092_s7, %s2121_s16 }
  0x12   : > { %849 = vrot.lane.b32.xlu1 %v2611_v10, %s2655_s5  ;;  %v620_v15 = vshrl.u32 %v2611_v10, 16  ;;  %v623_v16 = vshll.u32 %v2611_v10, 16  ;;  %847 = vrot.lane.b32.xlu0 %v2612_v12, %s2655_s5  ;;  %v613_v18 = vshrl.u32 %v2612_v12, 16  ;;  %v616_v19 = vshll.u32 %v2612_v12, 16  ;;  %v2614_v23 = vld [vmem:[%s2735_s9 + $0x18] sm:$0xff]   ;;  %v2615_v27 = vld [vmem:[%s2735_s9 + $0x20] sm:$0xff]  }
  0x13   : > { %v630_v26 = vshll.u32 %v2613_v20, 16  ;;  %v627_v29 = vshrl.u32 %v2613_v20, 16  ;;  %v637_v30 = vshll.u32 %v2614_v23, 16  ;;  %v634_v34 = vshrl.u32 %v2614_v23, 16  ;;  %v2616_v35 = vld [vmem:[%s2735_s9 + $0x28] sm:$0xff]   ;;  %v2617_v49 = vld [vmem:[%s2735_s9 + $0x30] sm:$0xff]  }
  0x14   : > { %v774_v21 = vrot.slane %v623_v16, 1  ;;  %v622_v22 = vrot.slane %v620_v15, 7  ;;  %v772_v24 = vrot.slane %v616_v19, 1  ;;  %v615_v25 = vrot.slane %v613_v18, 7  ;;  %v2618_v53 = vld [vmem:[%s2735_s9 + $0x38] sm:$0xff]   ;;  %v2619_v3 = vld [vmem:[%s2735_s9 + $0x40] sm:$0xff]  }
  0x15   : > { %v776_v33 = vrot.slane %v630_v26, 1  ;;  %v629_v37 = vrot.slane %v627_v29, 7  ;;  %v778_v38 = vrot.slane %v637_v30, 1  ;;  %v644_v41 = vshll.u32 %v2615_v27, 16  ;;  %v2620_v10 = vld [vmem:[%s2735_s9 + $0x48] sm:$0xff]   ;;  %v2804_v13 = vld [vmem:[%s2735_s9 + $0x50] sm:$0xff]  }
  0x16   : > { %899 = vrot.lane.b32.xlu1 %v2757_v17, %s2656_s10  ;;  %v775_v28 = vor.u32 %v774_v21, %v620_v15  ;;  %v2764_v31 = vor.u32 %v623_v16, %v622_v22  ;;  %v773_v32 = vor.u32 %v772_v24, %v613_v18  ;;  %v2773_v42 = vor.u32 %v616_v19, %v615_v25  ;;  %v2807_v15 = vld [vmem:[%s2735_s9 + $0x58] sm:$0xff]   ;;  %v2629_v24 = vld [vmem:[%s3088_s3 + $0x10] sm:$0x3f]  }
  0x17   : > { %v777_v40 = vor.u32 %v776_v33, %v627_v29  ;;  %v636_v43 = vrot.slane %v634_v34, 7  ;;  %v779_v44 = vor.u32 %v778_v38, %v634_v34  ;;  %v641_v45 = vshrl.u32 %v2615_v27, 16  ;;  %2583 = vmatprep.subr.msk.bf16.mxu0 %vm1070_vm2, %v2629_v24  ;;  %v2623_v38 = vld [vmem:[%s2735_s9 + $0x60] sm:$0xff]  }
  0x18   : > { %v829_v36 = vsel %vm2737_vm3, %v775_v28, 0  ;;  %v828_v39 = vsel %vm2737_vm3, %v773_v32, 0  ;;  %v651_v46 = vshll.u32 %v2616_v35, 16  ;;  %v2775_v47 = vor.u32 %v630_v26, %v629_v37 }
  0x19   : > { %901 = vrot.lane.b32.xlu0 %v828_v39, %s2656_s10  ;;  %v643_v48 = vrot.slane %v641_v45, 7  ;;  %v830_v50 = vsel %vm2737_vm3, %v777_v40, 0  ;;  %v780_v51 = vrot.slane %v644_v41, 1  ;;  %v648_v52 = vshrl.u32 %v2616_v35, 16  ;;  %v2624_v40 = vld [vmem:[%s2735_s9 + $0x68] sm:$0xff]  }
  0x1a   : > { %903 = vrot.lane.b32.xlu1 %v829_v36, %s2656_s10  ;;  %v831_v54 = vsel %vm2737_vm3, %v779_v44, 0  ;;  %v782_v55 = vrot.slane %v651_v46, 1  ;;  %v2785_v56 = vor.u32 %v637_v30, %v636_v43  ;;  %v655_v58 = vshrl.u32 %v2617_v49, 16 }
  0x1b   : > { %v650_v57 = vrot.slane %v648_v52, 7  ;;  %v2787_v59 = vor.u32 %v644_v41, %v643_v48  ;;  %v781_v60 = vor.u32 %v780_v51, %v641_v45  ;;  %v658_v61 = vshll.u32 %v2617_v49, 16 }
  0x1c   : > { %v665_v62 = vshll.u32 %v2618_v53, 16  ;;  %v783_v63 = vor.u32 %v782_v55, %v648_v52  ;;  %v657_v0 = vrot.slane %v655_v58, 7  ;;  %v662_v6 = vshrl.u32 %v2618_v53, 16 }
  0x1d   : > { %851 = vrot.lane.b32.xlu0 %v2613_v20, %s2655_s5  ;;  %v2791_v2 = vor.u32 %v651_v46, %v650_v57  ;;  %v832_v4 = vsel %vm2737_vm3, %v781_v60, 0  ;;  %v784_v5 = vrot.slane %v658_v61, 1  ;;  %v669_v16 = vshrl.u32 %v2619_v3, 16 }
  0x1e   : > { %853 = vrot.lane.b32.xlu1 %v2614_v23, %s2655_s5  ;;  %v786_v7 = vrot.slane %v665_v62, 1  ;;  %v833_v9 = vsel %vm2737_vm3, %v783_v63, 0  ;;  %v2801_v12 = vor.u32 %v658_v61, %v657_v0  ;;  %v672_v18 = vshll.u32 %v2619_v3, 16  ;;  %v2626_v0 = vld [vmem:[%s2735_s9 + $0x78] sm:$0xff]  }
  0x1f   : > { %v676_v19 = vshrl.u32 %v2620_v10, 16  ;;  %v785_v20 = vor.u32 %v784_v5, %v655_v58  ;;  %v683_v22 = vshrl.u32 %v2804_v13, 16  ;;  %v690_v23 = vshrl.u32 %v2807_v15, 16  ;;  %v2625_v58 = vld [vmem:[%s2735_s9 + $0x70] sm:$0xff]  }
  0x20   : > { %v787_v21 = vor.u32 %v786_v7, %v662_v6  ;;  %v664_v25 = vrot.slane %v662_v6, 7  ;;  %v671_v26 = vrot.slane %v669_v16, 7  ;;  %v679_v28 = vshll.u32 %v2620_v10, 16 }
  0x21   : > { %905 = vrot.lane.b32.xlu0 %v830_v50, %s2656_s10  ;;  %v685_v29 = vrot.slane %v683_v22, 7  ;;  %v692_v30 = vrot.slane %v690_v23, 7  ;;  %v788_v32 = vrot.slane %v672_v18, 1  ;;  %v2818_v33 = vsel %vm1070_vm2, %v2629_v24, 0 }
  0x22   : > { %907 = vrot.lane.b32.xlu1 %v831_v54, %s2656_s10  ;;  %v834_v34 = vsel %vm2737_vm3, %v785_v20, 0  ;;  %v686_v36 = vshll.u32 %v2804_v13, 16  ;;  %v693_v37 = vshll.u32 %v2807_v15, 16  ;;  %v790_v39 = vrot.slane %v679_v28, 1 }
  0x23   : > { %v2830_v41 = vor.u32 %v665_v62, %v664_v25  ;;  %v2832_v43 = vor.u32 %v672_v18, %v671_v26  ;;  %v697_v45 = vshrl.u32 %v2623_v38, 16  ;;  %v789_v51 = vor.u32 %v788_v32, %v669_v16 }
  0x24   : > { %v2836_v46 = vor.u32 %v686_v36, %v685_v29  ;;  %v2838_v48 = vor.u32 %v693_v37, %v692_v30  ;;  %v791_v52 = vor.u32 %v790_v39, %v676_v19  ;;  %v700_v54 = vshll.u32 %v2623_v38, 16 }
  0x25   : > { %855 = vrot.lane.b32.xlu0 %v2615_v27, %s2655_s5  ;;  %v678_v27 = vrot.slane %v676_v19, 7  ;;  %v699_v50 = vrot.slane %v697_v45, 7  ;;  %v707_v55 = vshll.u32 %v2624_v40, 16  ;;  %v792_v57 = vrot.slane %v686_v36, 1 }
  0x26   : > { %857 = vrot.lane.b32.xlu1 %v2616_v35, %s2655_s5  ;;  %v835_v35 = vsel %vm2737_vm3, %v787_v21, 0  ;;  %v836_v61 = vsel %vm2737_vm3, %v789_v51, 0  ;;  %v837_v62 = vsel %vm2737_vm3, %v791_v52, 0  ;;  %v794_v63 = vrot.slane %v693_v37, 1 }
  0x27   : > { %v2834_v44 = vor.u32 %v679_v28, %v678_v27  ;;  %v2845_v60 = vor.u32 %v700_v54, %v699_v50  ;;  %v711_v5 = vshrl.u32 %v2625_v58, 16  ;;  %v718_v6 = vshrl.u32 %v2626_v0, 16 }
  0x28   : > { %v714_v16 = vshll.u32 %v2625_v58, 16  ;;  %v721_v18 = vshll.u32 %v2626_v0, 16  ;;  %v798_v24 = vrot.slane %v707_v55, 1  ;;  %v2898_v37 = vsel %vm2891_vm6, 0, %v2749_v14 }
  0x29   : > { %909 = vrot.lane.b32.xlu0 %v832_v4, %s2656_s10  ;;  %v713_v7 = vrot.slane %v711_v5, 7  ;;  %v754_v39 = vsel %vm2891_vm6, 0, %v2764_v31 }
  0x2a   : > { %911 = vrot.lane.b32.xlu1 %v833_v9, %s2656_s10  ;;  %v795_v9 = vor.u32 %v794_v63, %v690_v23  ;;  %v800_v27 = vrot.slane %v714_v16, 1  ;;  %v802_v28 = vrot.slane %v721_v18, 1  ;;  %v757_v63 = vsel %vm2891_vm6, 0, %v2787_v59 }
  0x2b   : > { %v2862_v20 = vor.u32 %v714_v16, %v713_v7  ;;  %v759_v16 = vsel %vm2891_vm6, 0, %v2801_v12 }
  0x2c   : > { %v839_v21 = vsel %vm2737_vm3, %v795_v9, 0  ;;  %v801_v29 = vor.u32 %v800_v27, %v711_v5  ;;  %v803_v30 = vor.u32 %v802_v28, %v718_v6 }
  0x2d   : > { %859 = vrot.lane.b32.xlu0 %v2617_v49, %s2655_s5  ;;  %v704_v49 = vshrl.u32 %v2624_v40, 16 }
  0x2e   : > { %861 = vrot.lane.b32.xlu1 %v2618_v53, %s2655_s5  ;;  %v842_v32 = vsel %vm2737_vm3, %v801_v29, 0 }
  0x2f   : > { %v706_v53 = vrot.slane %v704_v49, 7  ;;  %v799_v25 = vor.u32 %v798_v24, %v704_v49 }
  0x31   : > { %913 = vrot.lane.b32.xlu0 %v834_v34, %s2656_s10  ;;  %v2852_v4 = vor.u32 %v707_v55, %v706_v53  ;;  %v841_v26 = vsel %vm2737_vm3, %v799_v25, 0  ;;  %v843_v34 = vsel %vm2737_vm3, %v803_v30, 0  ;;  %v756_v55 = vsel %vm2891_vm6, 0, %v2785_v56 }
  0x32   : > { %915 = vrot.lane.b32.xlu1 %v835_v35, %s2656_s10 }
  0x35   : > { %863 = vrot.lane.b32.xlu0 %v2619_v3, %s2655_s5  ;;  %v793_v3 = vor.u32 %v792_v57, %v683_v22  ;;  %v796_v22 = vrot.slane %v700_v54, 1  ;;  %v755_v54 = vsel %vm2891_vm6, 0, %v2775_v47 }
  0x36   : > { %865 = vrot.lane.b32.xlu1 %v2620_v10, %s2655_s5  ;;  %v720_v10 = vrot.slane %v718_v6, 7 }
  0x37   : > { %v838_v19 = vsel %vm2737_vm3, %v793_v3, 0 }
  0x38   : > { %v2866_v23 = vor.u32 %v721_v18, %v720_v10  ;;  %v760_v18 = vsel %vm2891_vm6, 0, %v2830_v41 }
  0x39   : > { %917 = vrot.lane.b32.xlu0 %v836_v61, %s2656_s10 }
  0x3a   : > { %919 = vrot.lane.b32.xlu1 %v837_v62, %s2656_s10 }
  0x3d   : > { %867 = vrot.lane.b32.xlu0 %v2804_v13, %s2655_s5  ;;  %v797_v13 = vor.u32 %v796_v22, %v697_v45 }
  0x3e   : > { %869 = vrot.lane.b32.xlu1 %v2807_v15, %s2655_s5 }
  0x3f   : > { %v840_v15 = vsel %vm2737_vm3, %v797_v13, 0 }
  0x41   : > { %921 = vrot.lane.b32.xlu0 %v838_v19, %s2656_s10 }
  0x42   : > { %923 = vrot.lane.b32.xlu1 %v839_v21, %s2656_s10 }
  0x45   : > { %871 = vrot.lane.b32.xlu0 %v2623_v38, %s2655_s5 }
  0x46   : > { %873 = vrot.lane.b32.xlu1 %v2624_v40, %s2655_s5  ;;  %v753_v40 = vsel %vm2891_vm6, 0, %v2773_v42 }
  0x49   : > { %925 = vrot.lane.b32.xlu0 %v840_v15, %s2656_s10  ;;  %v761_v15 = vsel %vm2891_vm6, 0, %v2832_v43 }
  0x4a   : > { %927 = vrot.lane.b32.xlu1 %v841_v26, %s2656_s10  ;;  %v762_v26 = vsel %vm2891_vm6, 0, %v2834_v44 }
  0x4d   : > { %875 = vrot.lane.b32.xlu0 %v2625_v58, %s2655_s5 }
  0x4e   : > { %877 = vrot.lane.b32.xlu1 %v2626_v0, %s2655_s5  ;;  %v758_v0 = vsel %vm2891_vm6, 0, %v2791_v2 }
  0x51   : > { %929 = vrot.lane.b32.xlu0 %v842_v32, %s2656_s10 }
  0x52   : > { %931 = vrot.lane.b32.xlu1 %v843_v34, %s2656_s10 }
  0x55   : > { %879 = vrot.lane.b32.xlu0 %v2715_v1, %s2655_s5 }
  0x56   : > { %933 = vrot.lane.b32.xlu1 %v2757_v17, %s2656_s10 }
  0x7b   : > { %v846_v35 = vpop.permute.xlu0 %845 }
  0x7c   : > { %v938_v1 = vsel %vm935_vm7, %v2898_v37, %v846_v35  ;;  %v763_v35 = vsel %vm2891_vm6, 0, %v2836_v46 }
  0x84   : > { %v850_v8 = vpop.permute.xlu1 %849  ;;  %v848_v38 = vpop.permute.xlu0 %847 }
  0x85   : > { %v944_v14 = vsel %vm935_vm7, %v754_v39, %v850_v8  ;;  %v941_v49 = vsel %vm935_vm7, %v753_v40, %v848_v38  ;;  %v764_v8 = vsel %vm2891_vm6, 0, %v2838_v48 }
  0x88   : > { %v900_v17 = vpop.permute.xlu1 %899 }
  0x89   : > { %v992_v45 = vsel %vm990_vm8, %v938_v1, %v900_v17 }
  0x8a   : > { %2448 = vmatprep.mubr.msk.bf16.mxu0 %vm1037_vm9, %v992_v45 }
  0x8b   : > { %v902_v50 = vpop.permute.xlu0 %901 }
  0x8c   : > { %v904_v51 = vpop.permute.xlu1 %903  ;;  %v994_v53 = vsel %vm990_vm8, %v941_v49, %v902_v50  ;;  %v766_v49 = vsel %vm2891_vm6, 0, %v2852_v4 }
  0x8d   : > { %v996_v52 = vsel %vm990_vm8, %v944_v14, %v904_v51  ;;  %2414 = vmatprep.mubr.msk.bf16.mxu1 %vm1037_vm9, %v994_v53  ;;  %2449 = vmatmul.mubr.msk.bf16.vlgmr.msra.gmra.mrb[0].mxu0 %vm1037_vm9, %v994_v53  ;;  %v765_v14 = vsel %vm2891_vm6, 0, %v2845_v60 }
  0x8e   : > { %2415 = vmatmul.mubr.msk.bf16.vlgmr.msra.gmra.mrb[0].mxu1 %vm1037_vm9, %v996_v52  ;;  %2452 = vmatprep.mubr.msk.bf16.mxu0 %vm1037_vm9, %v996_v52 }
  0x8f   : > { %2515 = vmatpush3.bf16.msra.mxu1 %v2746_v11  ;;  %2481 = vmatpush3.bf16.msra.mxu0 %v2818_v33  ;;  %v852_v31 = vpop.permute.xlu0 %851 }
  0x90   : > { %v854_v42 = vpop.permute.xlu1 %853  ;;  %v947_v57 = vsel %vm935_vm7, %v755_v54, %v852_v31  ;;  %v767_v54 = vsel %vm2891_vm6, 0, %v2862_v20 }
  0x91   : > { %v950_v58 = vsel %vm935_vm7, %v756_v55, %v854_v42  ;;  %v768_v55 = vsel %vm2891_vm6, 0, %v2866_v23 }
  0x93   : > { %v906_v61 = vpop.permute.xlu0 %905 }
  0x94   : > { %v908_v62 = vpop.permute.xlu1 %907  ;;  %v998_v11 = vsel %vm990_vm8, %v947_v57, %v906_v61 }
  0x95   : > { %v1000_v33 = vsel %vm990_vm8, %v950_v58, %v908_v62  ;;  %2418 = vmatprep.mubr.msk.bf16.mxu1 %vm1037_vm9, %v998_v11  ;;  %2453 = vmatmul.mubr.msk.bf16.gmra.mrb[4].mxu0 %vm1037_vm9, %v998_v11 }
  0x96   : > { %2419 = vmatmul.mubr.msk.bf16.gmra.mrb[4].mxu1 %vm1037_vm9, %v1000_v33  ;;  %2456 = vmatprep.mubr.msk.bf16.mxu0 %vm1037_vm9, %v1000_v33 }
  0x97   : > { %v856_v47 = vpop.permute.xlu0 %855 }
  0x98   : > { %v858_v56 = vpop.permute.xlu1 %857  ;;  %v953_v5 = vsel %vm935_vm7, %v757_v63, %v856_v47 }
  0x99   : > { %v956_v6 = vsel %vm935_vm7, %v758_v0, %v858_v56 }
  0x9b   : > { %v910_v3 = vpop.permute.xlu0 %909 }
  0x9c   : > { %v912_v7 = vpop.permute.xlu1 %911  ;;  %v1002_v9 = vsel %vm990_vm8, %v953_v5, %v910_v3 }
  0x9d   : > { %v1004_v10 = vsel %vm990_vm8, %v956_v6, %v912_v7  ;;  %2422 = vmatprep.mubr.msk.bf16.mxu1 %vm1037_vm9, %v1002_v9  ;;  %2457 = vmatmul.mubr.msk.bf16.gmra.mrb[8].mxu0 %vm1037_vm9, %v1002_v9 }
  0x9e   : > { %2423 = vmatmul.mubr.msk.bf16.gmra.mrb[8].mxu1 %vm1037_vm9, %v1004_v10  ;;  %2460 = vmatprep.mubr.msk.bf16.mxu0 %vm1037_vm9, %v1004_v10 }
  0x9f   : > { %v860_v59 = vpop.permute.xlu0 %859 }
  0xa0   : > { %v862_v2 = vpop.permute.xlu1 %861  ;;  %v959_v19 = vsel %vm935_vm7, %v759_v16, %v860_v59 }
  0xa1   : > { %v962_v21 = vsel %vm935_vm7, %v760_v18, %v862_v2 }
  0xa3   : > { %v914_v22 = vpop.permute.xlu0 %913 }
  0xa4   : > { %v916_v24 = vpop.permute.xlu1 %915  ;;  %v1006_v13 = vsel %vm990_vm8, %v959_v19, %v914_v22 }
  0xa5   : > { %v1008_v25 = vsel %vm990_vm8, %v962_v21, %v916_v24  ;;  %2426 = vmatprep.mubr.msk.bf16.mxu1 %vm1037_vm9, %v1006_v13  ;;  %2461 = vmatmul.mubr.msk.bf16.gmra.mrb[12].mxu0 %vm1037_vm9, %v1006_v13 }
  0xa6   : > { %2427 = vmatmul.mubr.msk.bf16.gmra.mrb[12].mxu1 %vm1037_vm9, %v1008_v25  ;;  %2482 = vmatprep.mubr.msk.bf16.mxu0 %vm1037_vm9, %v996_v52 }
  0xa7   : > { %v864_v12 = vpop.permute.xlu0 %863 }
  0xa8   : > { %v866_v41 = vpop.permute.xlu1 %865  ;;  %v965_v27 = vsel %vm935_vm7, %v761_v15, %v864_v12 }
  0xa9   : > { %v968_v28 = vsel %vm935_vm7, %v762_v26, %v866_v41 }
  0xab   : > { %v918_v29 = vpop.permute.xlu0 %917 }
  0xac   : > { %v920_v30 = vpop.permute.xlu1 %919  ;;  %v1010_v32 = vsel %vm990_vm8, %v965_v27, %v918_v29 }
  0xad   : > { %v1012_v34 = vsel %vm990_vm8, %v968_v28, %v920_v30  ;;  %2430 = vmatprep.mubr.msk.bf16.mxu1 %vm1037_vm9, %v1010_v32  ;;  %2483 = vmatmul.mubr.msk.bf16.vlgmr.msra.gmra.mrb[0].mxu0 %vm1037_vm9, %v998_v11 }
  0xae   : > { %2431 = vmatmul.mubr.msk.bf16.gmra.mrb[16].mxu1 %vm1037_vm9, %v1012_v34  ;;  %2486 = vmatprep.mubr.msk.bf16.mxu0 %vm1037_vm9, %v1000_v33 }
  0xaf   : > { %v868_v43 = vpop.permute.xlu0 %867 }
  0xb0   : > { %v870_v44 = vpop.permute.xlu1 %869  ;;  %v971_v38 = vsel %vm935_vm7, %v763_v35, %v868_v43 }
  0xb1   : > { %v974_v1 = vsel %vm935_vm7, %v764_v8, %v870_v44 }
  0xb3   : > { %v922_v17 = vpop.permute.xlu0 %921 }
  0xb4   : > { %v924_v39 = vpop.permute.xlu1 %923  ;;  %v1014_v40 = vsel %vm990_vm8, %v971_v38, %v922_v17 }
  0xb5   : > { %v1016_v45 = vsel %vm990_vm8, %v974_v1, %v924_v39  ;;  %2434 = vmatprep.mubr.msk.bf16.mxu1 %vm1037_vm9, %v1014_v40  ;;  %2487 = vmatmul.mubr.msk.bf16.gmra.mrb[4].mxu0 %vm1037_vm9, %v1002_v9 }
  0xb6   : > { %2435 = vmatmul.mubr.msk.bf16.gmra.mrb[20].mxu1 %vm1037_vm9, %v1016_v45  ;;  %2490 = vmatprep.mubr.msk.bf16.mxu0 %vm1037_vm9, %v1004_v10 }
  0xb7   : > { %v872_v46 = vpop.permute.xlu0 %871 }
  0xb8   : > { %v874_v48 = vpop.permute.xlu1 %873  ;;  %v977_v50 = vsel %vm935_vm7, %v765_v14, %v872_v46 }
  0xb9   : > { %v980_v51 = vsel %vm935_vm7, %v766_v49, %v874_v48 }
  0xbb   : > { %v926_v52 = vpop.permute.xlu0 %925 }
  0xbc   : > { %v928_v53 = vpop.permute.xlu1 %927  ;;  %v1018_v31 = vsel %vm990_vm8, %v977_v50, %v926_v52 }
  0xbd   : > { %v1020_v42 = vsel %vm990_vm8, %v980_v51, %v928_v53  ;;  %2438 = vmatprep.mubr.msk.bf16.mxu1 %vm1037_vm9, %v1018_v31  ;;  %2491 = vmatmul.mubr.msk.bf16.gmra.mrb[8].mxu0 %vm1037_vm9, %v1006_v13 }
  0xbe   : > { %2439 = vmatmul.mubr.msk.bf16.gmra.mrb[24].mxu1 %vm1037_vm9, %v1020_v42  ;;  %2494 = vmatprep.mubr.msk.bf16.mxu0 %vm1037_vm9, %v1008_v25 }
  0xbf   : > { %v876_v60 = vpop.permute.xlu0 %875 }
  0xc0   : > { %v878_v4 = vpop.permute.xlu1 %877  ;;  %v983_v57 = vsel %vm935_vm7, %v767_v54, %v876_v60 }
  0xc1   : > { %v986_v58 = vsel %vm935_vm7, %v768_v55, %v878_v4 }
  0xc3   : > { %v930_v61 = vpop.permute.xlu0 %929 }
  0xc4   : > { %v932_v62 = vpop.permute.xlu1 %931  ;;  %v1022_v11 = vsel %vm990_vm8, %v983_v57, %v930_v61 }
  0xc5   : > { %v1024_v33 = vsel %vm990_vm8, %v986_v58, %v932_v62  ;;  %2442 = vmatprep.mubr.msk.bf16.mxu1 %vm1037_vm9, %v1022_v11  ;;  %2495 = vmatmul.mubr.msk.bf16.gmra.mrb[12].mxu0 %vm1037_vm9, %v1010_v32 }
  0xc6   : > { %2443 = vmatmul.mubr.msk.bf16.gmra.mrb[28].mxu1 %vm1037_vm9, %v1024_v33  ;;  %2498 = vmatprep.mubr.msk.bf16.mxu0 %vm1037_vm9, %v1012_v34 }
  0xc7   : > { %2464 = vmatprep.mubr.msk.bf16.mxu1 %vm1037_vm9, %v1008_v25  ;;  %v880_v20 = vpop.permute.xlu0 %879 }
  0xc8   : > { %v989_v23 = vsel %vm935_vm7, %v2898_v37, %v880_v20  ;;  %v934_v36 = vpop.permute.xlu1 %933 }
  0xc9   : > { %v1026_v47 = vsel %vm990_vm8, %v989_v23, %v934_v36 }
  0xcd   : > { %2499 = vmatmul.mubr.msk.bf16.gmra.mrb[16].mxu0 %vm1037_vm9, %v1014_v40 }
  0xce   : > { %2465 = vmatmul.mubr.msk.bf16.vlgmr.msra.gmra.mrb[16].mxu1 %vm1037_vm9, %v1010_v32  ;;  %2502 = vmatprep.mubr.msk.bf16.mxu0 %vm1037_vm9, %v1016_v45 }
  0xcf   : > { %2468 = vmatprep.mubr.msk.bf16.mxu1 %vm1037_vm9, %v1012_v34 }
  0xd5   : > { %2503 = vmatmul.mubr.msk.bf16.gmra.mrb[20].mxu0 %vm1037_vm9, %v1018_v31 }
  0xd6   : > { %2469 = vmatmul.mubr.msk.bf16.gmra.mrb[20].mxu1 %vm1037_vm9, %v1014_v40  ;;  %2506 = vmatprep.mubr.msk.bf16.mxu0 %vm1037_vm9, %v1020_v42 }
  0xd7   : > { %2472 = vmatprep.mubr.msk.bf16.mxu1 %vm1037_vm9, %v1016_v45 }
  0xdd   : > { %2507 = vmatmul.mubr.msk.bf16.gmra.mrb[24].mxu0 %vm1037_vm9, %v1022_v11 }
  0xde   : > { %2473 = vmatmul.mubr.msk.bf16.gmra.mrb[24].mxu1 %vm1037_vm9, %v1018_v31  ;;  %2510 = vmatprep.mubr.msk.bf16.mxu0 %vm1037_vm9, %v1024_v33 }
  0xdf   : > { %2476 = vmatprep.mubr.msk.bf16.mxu1 %vm1037_vm9, %v1020_v42 }
  0xe5   : > { %2511 = vmatmul.mubr.msk.bf16.gmra.mrb[28].mxu0 %vm1037_vm9, %v1026_v47 }
  0xe6   : > { %2477 = vmatmul.mubr.msk.bf16.gmra.mrb[28].mxu1 %vm1037_vm9, %v1022_v11 }
 0x161   : > { %v2416_v56 = vpop.f32.mrb[0].mxu1 }
 0x162   : > { %v1108_v63 = vpop.f32.mrb[1].mxu1 }
 0x163   : > { %v2417_v0 = vpop.f32.mrb[2].mxu1 }
 0x164   : > { %v1111_v5 = vpop.f32.mrb[3].mxu1 }
 0x169   : > { %v2420_v6 = vpop.f32.mrb[4].mxu1 }
 0x16a   : > { %v1124_v3 = vpop.f32.mrb[5].mxu1 }
 0x16b   : > { %v2421_v7 = vpop.f32.mrb[6].mxu1 }
 0x16c   : > { %v1127_v9 = vpop.f32.mrb[7].mxu1 }
 0x171   : > { %v2424_v10 = vpop.f32.mrb[8].mxu1 }
 0x172   : > { %v1140_v59 = vpop.f32.mrb[9].mxu1 }
 0x173   : > { %v2425_v2 = vpop.f32.mrb[10].mxu1 }
 0x174   : > { %v1143_v37 = vpop.f32.mrb[11].mxu1 }
 0x179   : > { %v3036_v16 = vpop.f32.mrb[12].mxu1 }
 0x17a   : > { %v3038_v18 = vpop.f32.mrb[13].mxu1 }
 0x17b   : > { %v3040_v19 = vpop.f32.mrb[14].mxu1 }
 0x17c   : > { %v3042_v21 = vpop.f32.mrb[15].mxu1 }
 0x180   : > { %v2484_v22 = vpop.f32.mrb[0].mxu0 }
 0x181   : > { %v2516_v24 = vadd.f32 %v2484_v22, %v2416_v56  ;;  %v1453_v13 = vpop.f32.mrb[1].mxu0 }
 0x182   : > { %v2517_v25 = vadd.f32 %v1453_v13, %v1108_v63  ;;  %v2485_v12 = vpop.f32.mrb[2].mxu0 }
 0x183   : > { %v2518_v41 = vadd.f32 %v2485_v12, %v2417_v0  ;;  %v1456_v15 = vpop.f32.mrb[3].mxu0 }
 0x184   : > { %v2519_v26 = vadd.f32 %v1456_v15, %v1111_v5 }
 0x185   : > { %v1613_v27 = vpack.c.bf16 %v2518_v41, %v2516_v24 }
 0x186   : > { %v1612_v28 = vpack.c.bf16 %v2519_v26, %v2517_v25 }
 0x187   : > { %2346 = vst [vmem:[%s3049_s15 + $0x8] sm:$0xff] %v1613_v27   ;;  %v1630_v29 = vunpack.c.l.bf16 %v1613_v27  ;;  %v1631_v43 = vunpack.c.h.bf16 %v1613_v27 }
 0x188   : > { %v1628_v30 = vunpack.c.l.bf16 %v1612_v28  ;;  %v1629_v32 = vunpack.c.h.bf16 %v1612_v28  ;;  %2270 = vst [vmem:[%s3049_s15] sm:$0xff] %v1612_v28   ;;  %v2488_v34 = vpop.f32.mrb[4].mxu0 }
 0x189   : > { %v2520_v44 = vadd.f32 %v2488_v34, %v2420_v6  ;;  %v1469_v35 = vpop.f32.mrb[5].mxu0  ;;  %v1699_v46 = vmul.f32 %v1630_v29, %v1630_v29  ;;  %v1700_v51 = vmul.f32 %v1631_v43, %v1631_v43 }
 0x18a   : > { %v1660_v8 = vadd.f32 %v1629_v32, %v1628_v30  ;;  %v1697_v38 = vmul.f32 %v1628_v30, %v1628_v30  ;;  %v1698_v1 = vmul.f32 %v1629_v32, %v1629_v32  ;;  %v2521_v17 = vadd.f32 %v1469_v35, %v1124_v3  ;;  %v2489_v39 = vpop.f32.mrb[6].mxu0 }
 0x18b   : > { %v2522_v40 = vadd.f32 %v2489_v39, %v2421_v7  ;;  %v1472_v45 = vpop.f32.mrb[7].mxu0 }
 0x18c   : > { %v1661_v48 = vadd.f32 %v1660_v8, %v1630_v29  ;;  %v1729_v14 = vadd.f32 %v1698_v1, %v1697_v38  ;;  %v2523_v49 = vadd.f32 %v1472_v45, %v1127_v9 }
 0x18d   : > { %v1615_v50 = vpack.c.bf16 %v2522_v40, %v2520_v44 }
 0x18e   : > { %v1730_v52 = vadd.f32 %v1729_v14, %v1699_v46  ;;  %v1614_v53 = vpack.c.bf16 %v2523_v49, %v2521_v17  ;;  %v1662_v31 = vadd.f32 %v1661_v48, %v1631_v43 }
 0x18f   : > { %2348 = vst [vmem:[%s3049_s15 + $0x18] sm:$0xff] %v1615_v50   ;;  %v1634_v58 = vunpack.c.l.bf16 %v1615_v50  ;;  %v1635_v20 = vunpack.c.h.bf16 %v1615_v50 }
 0x190   : > { %v1632_v42 = vunpack.c.l.bf16 %v1614_v53  ;;  %v1633_v60 = vunpack.c.h.bf16 %v1614_v53  ;;  %v1731_v4 = vadd.f32 %v1730_v52, %v1700_v51  ;;  %2347 = vst [vmem:[%s3049_s15 + $0x10] sm:$0xff] %v1614_v53   ;;  %v2492_v54 = vpop.f32.mrb[8].mxu0 }
 0x191   : > { %v2524_v55 = vadd.f32 %v2492_v54, %v2424_v10  ;;  %v1485_v57 = vpop.f32.mrb[9].mxu0  ;;  %v1703_v6 = vmul.f32 %v1634_v58, %v1634_v58  ;;  %v1704_v10 = vmul.f32 %v1635_v20, %v1635_v20 }
 0x192   : > { %v1663_v61 = vadd.f32 %v1662_v31, %v1632_v42  ;;  %v1701_v62 = vmul.f32 %v1632_v42, %v1632_v42  ;;  %v2525_v11 = vadd.f32 %v1485_v57, %v1140_v59  ;;  %v2493_v33 = vpop.f32.mrb[10].mxu0  ;;  %v1702_v56 = vmul.f32 %v1633_v60, %v1633_v60 }
 0x193   : > { %v2526_v23 = vadd.f32 %v2493_v33, %v2425_v2  ;;  %v1488_v36 = vpop.f32.mrb[11].mxu0 }
 0x194   : > { %v1664_v47 = vadd.f32 %v1663_v61, %v1633_v60  ;;  %v1732_v63 = vadd.f32 %v1731_v4, %v1701_v62  ;;  %v2527_v0 = vadd.f32 %v1488_v36, %v1143_v37 }
 0x195   : > { %v1617_v5 = vpack.c.bf16 %v2526_v23, %v2524_v55 }
 0x196   : > { %v1665_v3 = vadd.f32 %v1664_v47, %v1634_v58  ;;  %v1733_v7 = vadd.f32 %v1732_v63, %v1702_v56  ;;  %v1616_v9 = vpack.c.bf16 %v2527_v0, %v2525_v11 }
 0x197   : > { %2350 = vst [vmem:[%s3049_s15 + $0x28] sm:$0xff] %v1617_v5   ;;  %v1638_v41 = vunpack.c.l.bf16 %v1617_v5  ;;  %v1639_v28 = vunpack.c.h.bf16 %v1617_v5 }
 0x198   : > { %v1734_v22 = vadd.f32 %v1733_v7, %v1703_v6  ;;  %v1636_v24 = vunpack.c.l.bf16 %v1616_v9  ;;  %v1637_v13 = vunpack.c.h.bf16 %v1616_v9  ;;  %v1666_v59 = vadd.f32 %v1665_v3, %v1635_v20  ;;  %2349 = vst [vmem:[%s3049_s15 + $0x20] sm:$0xff] %v1616_v9   ;;  %v2496_v25 = vpop.f32.mrb[12].mxu0 }
 0x199   : > { %v2528_v2 = vadd.f32 %v2496_v25, %v3036_v16  ;;  %v1501_v12 = vpop.f32.mrb[13].mxu0  ;;  %v1707_v8 = vmul.f32 %v1638_v41, %v1638_v41  ;;  %v1708_v39 = vmul.f32 %v1639_v28, %v1639_v28 }
 0x19a   : > { %v1667_v15 = vadd.f32 %v1666_v59, %v1636_v24  ;;  %v1705_v26 = vmul.f32 %v1636_v24, %v1636_v24  ;;  %v1735_v37 = vadd.f32 %v1734_v22, %v1704_v10  ;;  %v2497_v27 = vpop.f32.mrb[14].mxu0  ;;  %v2529_v29 = vadd.f32 %v1501_v12, %v3038_v18 }
 0x19b   : > { %v2530_v30 = vadd.f32 %v2497_v27, %v3040_v19  ;;  %v1504_v32 = vpop.f32.mrb[15].mxu0  ;;  %v1706_v43 = vmul.f32 %v1637_v13, %v1637_v13 }
 0x19c   : > { %v1668_v34 = vadd.f32 %v1667_v15, %v1637_v13  ;;  %v1736_v44 = vadd.f32 %v1735_v37, %v1705_v26  ;;  %v2531_v35 = vadd.f32 %v1504_v32, %v3042_v21 }
 0x19d   : > { %v1619_v16 = vpack.c.bf16 %v2530_v30, %v2528_v2 }
 0x19e   : > { %v1669_v38 = vadd.f32 %v1668_v34, %v1638_v41  ;;  %v1737_v1 = vadd.f32 %v1736_v44, %v1706_v43  ;;  %v1618_v17 = vpack.c.bf16 %v2531_v35, %v2529_v29 }
 0x19f   : > { %2352 = vst [vmem:[%s3049_s15 + $0x38] sm:$0xff] %v1619_v16   ;;  %v1642_v49 = vunpack.c.l.bf16 %v1619_v16  ;;  %v1643_v31 = vunpack.c.h.bf16 %v1619_v16 }
 0x1a0   : > { %v1738_v40 = vadd.f32 %v1737_v1, %v1707_v8  ;;  %v1640_v45 = vunpack.c.l.bf16 %v1618_v17  ;;  %v1641_v46 = vunpack.c.h.bf16 %v1618_v17  ;;  %v1670_v18 = vadd.f32 %v1669_v38, %v1639_v28  ;;  %2351 = vst [vmem:[%s3049_s15 + $0x30] sm:$0xff] %v1618_v17   ;;  %v2500_v19 = vpop.f32.mrb[16].mxu0 }
 0x1a1   : > { %v2466_v48 = vpop.f32.mrb[16].mxu1  ;;  %v1517_v14 = vpop.f32.mrb[17].mxu0  ;;  %v1711_v33 = vmul.f32 %v1642_v49, %v1642_v49  ;;  %v1712_v56 = vmul.f32 %v1643_v31, %v1643_v31 }
 0x1a2   : > { %v1671_v50 = vadd.f32 %v1670_v18, %v1640_v45  ;;  %v1709_v51 = vmul.f32 %v1640_v45, %v1640_v45  ;;  %v1739_v52 = vadd.f32 %v1738_v40, %v1708_v39  ;;  %v1343_v21 = vpop.f32.mrb[17].mxu1  ;;  %v2501_v53 = vpop.f32.mrb[18].mxu0  ;;  %v2532_v42 = vadd.f32 %v2500_v19, %v2466_v48 }
 0x1a3   : > { %v2533_v60 = vadd.f32 %v1517_v14, %v1343_v21  ;;  %v2467_v4 = vpop.f32.mrb[18].mxu1  ;;  %v1520_v54 = vpop.f32.mrb[19].mxu0  ;;  %v1710_v57 = vmul.f32 %v1641_v46, %v1641_v46 }
 0x1a4   : > { %v1672_v55 = vadd.f32 %v1671_v50, %v1641_v46  ;;  %v1740_v58 = vadd.f32 %v1739_v52, %v1709_v51  ;;  %v2534_v61 = vadd.f32 %v2501_v53, %v2467_v4  ;;  %v1346_v62 = vpop.f32.mrb[19].mxu1 }
 0x1a5   : > { %v2535_v11 = vadd.f32 %v1520_v54, %v1346_v62 }
 0x1a6   : > { %v1673_v20 = vadd.f32 %v1672_v55, %v1642_v49  ;;  %v1741_v23 = vadd.f32 %v1740_v58, %v1710_v57  ;;  %v1621_v36 = vpack.c.bf16 %v2534_v61, %v2532_v42 }
 0x1a7   : > { %v1620_v47 = vpack.c.bf16 %v2535_v11, %v2533_v60 }
 0x1a8   : > { %v1742_v63 = vadd.f32 %v1741_v23, %v1711_v33  ;;  %2354 = vst [vmem:[%s3049_s15 + $0x48] sm:$0xff] %v1621_v36   ;;  %v1674_v0 = vadd.f32 %v1673_v20, %v1643_v31  ;;  %v2504_v5 = vpop.f32.mrb[20].mxu0  ;;  %v1646_v59 = vunpack.c.l.bf16 %v1621_v36  ;;  %v1647_v26 = vunpack.c.h.bf16 %v1621_v36 }
 0x1a9   : > { %v1644_v6 = vunpack.c.l.bf16 %v1620_v47  ;;  %v1645_v3 = vunpack.c.h.bf16 %v1620_v47  ;;  %2353 = vst [vmem:[%s3049_s15 + $0x40] sm:$0xff] %v1620_v47   ;;  %v2470_v7 = vpop.f32.mrb[20].mxu1  ;;  %v1533_v9 = vpop.f32.mrb[21].mxu0 }
 0x1aa   : > { %v1743_v10 = vadd.f32 %v1742_v63, %v1712_v56  ;;  %v2536_v22 = vadd.f32 %v2504_v5, %v2470_v7  ;;  %v1359_v24 = vpop.f32.mrb[21].mxu1  ;;  %v2505_v13 = vpop.f32.mrb[22].mxu0  ;;  %v1715_v43 = vmul.f32 %v1646_v59, %v1646_v59  ;;  %v1716_v8 = vmul.f32 %v1647_v26, %v1647_v26 }
 0x1ab   : > { %v1675_v25 = vadd.f32 %v1674_v0, %v1644_v6  ;;  %v1713_v2 = vmul.f32 %v1644_v6, %v1644_v6  ;;  %v2537_v12 = vadd.f32 %v1533_v9, %v1359_v24  ;;  %v2471_v41 = vpop.f32.mrb[22].mxu1  ;;  %v1536_v15 = vpop.f32.mrb[23].mxu0  ;;  %v1714_v29 = vmul.f32 %v1645_v3, %v1645_v3 }
 0x1ac   : > { %v2538_v37 = vadd.f32 %v2505_v13, %v2471_v41  ;;  %v1362_v27 = vpop.f32.mrb[23].mxu1 }
 0x1ad   : > { %v1676_v28 = vadd.f32 %v1675_v25, %v1645_v3  ;;  %v1744_v30 = vadd.f32 %v1743_v10, %v1713_v2  ;;  %v2539_v32 = vadd.f32 %v1536_v15, %v1362_v27 }
 0x1ae   : > { %v1623_v34 = vpack.c.bf16 %v2538_v37, %v2536_v22 }
 0x1af   : > { %v1677_v44 = vadd.f32 %v1676_v28, %v1646_v59  ;;  %v1745_v35 = vadd.f32 %v1744_v30, %v1714_v29  ;;  %v1622_v16 = vpack.c.bf16 %v2539_v32, %v2537_v12 }
 0x1b0   : > { %2356 = vst [vmem:[%s3049_s15 + $0x58] sm:$0xff] %v1623_v34   ;;  %v2508_v38 = vpop.f32.mrb[24].mxu0  ;;  %v1650_v14 = vunpack.c.l.bf16 %v1623_v34  ;;  %v1651_v53 = vunpack.c.h.bf16 %v1623_v34 }
 0x1b1   : > { %v1746_v1 = vadd.f32 %v1745_v35, %v1715_v43  ;;  %v1648_v17 = vunpack.c.l.bf16 %v1622_v16  ;;  %v1649_v39 = vunpack.c.h.bf16 %v1622_v16  ;;  %v1678_v40 = vadd.f32 %v1677_v44, %v1647_v26  ;;  %2355 = vst [vmem:[%s3049_s15 + $0x50] sm:$0xff] %v1622_v16   ;;  %v2474_v45 = vpop.f32.mrb[24].mxu1  ;;  %v1549_v46 = vpop.f32.mrb[25].mxu0 }
 0x1b2   : > { %v2540_v18 = vadd.f32 %v2508_v38, %v2474_v45  ;;  %v1375_v19 = vpop.f32.mrb[25].mxu1  ;;  %v2509_v48 = vpop.f32.mrb[26].mxu0  ;;  %v1719_v61 = vmul.f32 %v1650_v14, %v1650_v14  ;;  %v1720_v20 = vmul.f32 %v1651_v53, %v1651_v53 }
 0x1b3   : > { %v1679_v49 = vadd.f32 %v1678_v40, %v1648_v17  ;;  %v1717_v50 = vmul.f32 %v1648_v17, %v1648_v17  ;;  %v1747_v51 = vadd.f32 %v1746_v1, %v1716_v8  ;;  %v2475_v52 = vpop.f32.mrb[26].mxu1  ;;  %v1552_v21 = vpop.f32.mrb[27].mxu0  ;;  %v2541_v31 = vadd.f32 %v1549_v46, %v1375_v19 }
 0x1b4   : > { %v2542_v42 = vadd.f32 %v2509_v48, %v2475_v52  ;;  %v1378_v60 = vpop.f32.mrb[27].mxu1  ;;  %v1718_v54 = vmul.f32 %v1649_v39, %v1649_v39 }
 0x1b5   : > { %v1680_v4 = vadd.f32 %v1679_v49, %v1649_v39  ;;  %v1748_v55 = vadd.f32 %v1747_v51, %v1717_v50  ;;  %v2543_v57 = vadd.f32 %v1552_v21, %v1378_v60 }
 0x1b6   : > { %v1625_v58 = vpack.c.bf16 %v2542_v42, %v2540_v18 }
 0x1b7   : > { %v1681_v62 = vadd.f32 %v1680_v4, %v1650_v14  ;;  %v1749_v11 = vadd.f32 %v1748_v55, %v1718_v54  ;;  %v1624_v33 = vpack.c.bf16 %v2543_v57, %v2541_v31 }
 0x1b8   : > { %2358 = vst [vmem:[%s3049_s15 + $0x68] sm:$0xff] %v1625_v58   ;;  %v2512_v23 = vpop.f32.mrb[28].mxu0  ;;  %v1654_v9 = vunpack.c.l.bf16 %v1625_v58  ;;  %v1655_v25 = vunpack.c.h.bf16 %v1625_v58 }
 0x1b9   : > { %v1750_v36 = vadd.f32 %v1749_v11, %v1719_v61  ;;  %v1652_v47 = vunpack.c.l.bf16 %v1624_v33  ;;  %v1653_v56 = vunpack.c.h.bf16 %v1624_v33  ;;  %v1682_v63 = vadd.f32 %v1681_v62, %v1651_v53  ;;  %2357 = vst [vmem:[%s3049_s15 + $0x60] sm:$0xff] %v1624_v33   ;;  %v2478_v0 = vpop.f32.mrb[28].mxu1  ;;  %v1565_v5 = vpop.f32.mrb[29].mxu0 }
 0x1ba   : > { %v2544_v6 = vadd.f32 %v2512_v23, %v2478_v0  ;;  %v1391_v3 = vpop.f32.mrb[29].mxu1  ;;  %v2513_v7 = vpop.f32.mrb[30].mxu0  ;;  %v1723_v29 = vmul.f32 %v1654_v9, %v1654_v9  ;;  %v1724_v43 = vmul.f32 %v1655_v25, %v1655_v25 }
 0x1bb   : > { %v1683_v10 = vadd.f32 %v1682_v63, %v1652_v47  ;;  %v1721_v22 = vmul.f32 %v1652_v47, %v1652_v47  ;;  %v1751_v24 = vadd.f32 %v1750_v36, %v1720_v20  ;;  %v2479_v13 = vpop.f32.mrb[30].mxu1  ;;  %v1568_v59 = vpop.f32.mrb[31].mxu0  ;;  %v2545_v2 = vadd.f32 %v1565_v5, %v1391_v3 }
 0x1bc   : > { %v2546_v12 = vadd.f32 %v2513_v7, %v2479_v13  ;;  %v1394_v41 = vpop.f32.mrb[31].mxu1  ;;  %v1722_v26 = vmul.f32 %v1653_v56, %v1653_v56 }
 0x1bd   : > { %v1684_v15 = vadd.f32 %v1683_v10, %v1653_v56  ;;  %v1752_v37 = vadd.f32 %v1751_v24, %v1721_v22  ;;  %v2547_v27 = vadd.f32 %v1568_v59, %v1394_v41 }
 0x1be   : > { %v1627_v28 = vpack.c.bf16 %v2546_v12, %v2544_v6 }
 0x1bf   : > { %v1685_v30 = vadd.f32 %v1684_v15, %v1654_v9  ;;  %v1753_v32 = vadd.f32 %v1752_v37, %v1722_v26  ;;  %v1626_v34 = vpack.c.bf16 %v2547_v27, %v2545_v2 }
 0x1c0   : > { %2360 = vst [vmem:[%s3049_s15 + $0x78] sm:$0xff] %v1627_v28   ;;  %v1658_v38 = vunpack.c.l.bf16 %v1627_v28  ;;  %v1659_v40 = vunpack.c.h.bf16 %v1627_v28 }
 0x1c1   : > { %v1754_v44 = vadd.f32 %v1753_v32, %v1723_v29  ;;  %v1656_v35 = vunpack.c.l.bf16 %v1626_v34  ;;  %v1657_v16 = vunpack.c.h.bf16 %v1626_v34  ;;  %v1686_v8 = vadd.f32 %v1685_v30, %v1655_v25  ;;  %2359 = vst [vmem:[%s3049_s15 + $0x70] sm:$0xff] %v1626_v34  }
 0x1c2   : > { %v1727_v19 = vmul.f32 %v1658_v38, %v1658_v38  ;;  %v1728_v49 = vmul.f32 %v1659_v40, %v1659_v40 }
 0x1c3   : > { %v1687_v1 = vadd.f32 %v1686_v8, %v1656_v35  ;;  %v1725_v17 = vmul.f32 %v1656_v35, %v1656_v35  ;;  %v1755_v39 = vadd.f32 %v1754_v44, %v1724_v43  ;;  %v1726_v46 = vmul.f32 %v1657_v16, %v1657_v16 }
 0x1c5   : > { %v1688_v45 = vadd.f32 %v1687_v1, %v1657_v16  ;;  %v1756_v18 = vadd.f32 %v1755_v39, %v1725_v17 }
 0x1c7   : > { %v1689_v48 = vadd.f32 %v1688_v45, %v1658_v38  ;;  %v1757_v14 = vadd.f32 %v1756_v18, %v1726_v46 }
 0x1c9   : > { %v1690_v50 = vadd.f32 %v1689_v48, %v1659_v40  ;;  %v1758_v51 = vadd.f32 %v1757_v14, %v1727_v19 }
 0x1cb   : > { %v1691_v52 = vrot.slane %v1690_v50, 4  ;;  %v1759_v21 = vadd.f32 %v1758_v51, %v1728_v49 }
 0x1cd   : > { %v1692_v53 = vadd.f32 %v1691_v52, %v1690_v50  ;;  %v1760_v31 = vrot.slane %v1759_v21, 4 }
 0x1cf   : > { %v1693_v42 = vrot.slane %v1692_v53, 2  ;;  %v1761_v60 = vadd.f32 %v1760_v31, %v1759_v21 }
 0x1d1   : > { %v1694_v4 = vadd.f32 %v1693_v42, %v1692_v53  ;;  %v1762_v54 = vrot.slane %v1761_v60, 2 }
 0x1d3   : > { %v1695_v55 = vrot.slane %v1694_v4, 1  ;;  %v1763_v57 = vadd.f32 %v1762_v54, %v1761_v60 }
 0x1d5   : > { %v1764_v58 = vrot.slane %v1763_v57, 1  ;;  %v1696_v61 = vadd.f32 %v1695_v55, %v1694_v4 }
 0x1d7   : > { %v1765_v62 = vadd.f32 %v1764_v58, %v1763_v57 }
 0x1d9   : > { %v1767_v11 = vsel %vm749_vm4, %v1696_v61, %v1765_v62 }
 0x1da   : > { %1768 = vst [vmem:[%s465_s19] sm:$0x3] %v1767_v11 }
 0x1db PF: > { %s18_s2 = sadd.s32 1, %s2652_s2   ;;  %s3097_s24 = smov %s2648_s1 }
 0x1dc   : > { %p15_p5 = scmp.ge.s32.totalorder %s18_s2, 4   ;;  %s3098_s1 = smov %s3100_s4 }
 0x1de   :  { %17 = sbr.rel (!%p15_p5) target bundleno = 2 (0x2), region = 94 }

// kernel: double_conv.4
= control target key start
LH: loop header
LB: loop body
LE: loop exit
PB: predicated region body
PF: predicated region fallthrough
CT: control target
= control target key end

     0   :  { %s4320_s24 = smov 0   ;;  %s4322_s1 = smov 0   ;;  %s5509_s0 = inlined_call_operand.vmem [shape: bf16[2,16,16,128], index: 0, kind: input, shape index: {}, may-alias: {0,1,2}]   ;;  %s5510_s1 = inlined_call_operand.vmem [shape: bf16[2,16,16,128], index: 1, kind: input, shape index: {}, may-alias: {0,1,2}]   ;;  %s5511_s2 = inlined_call_operand.vmem [shape: bf16[2,16,16,128], index: 2, kind: input, shape index: {}, may-alias: {0,1,2}]   ;;  %s5512_s3 = inlined_call_operand.vmem [shape: bf16[3,384,128], index: 3, kind: input, shape index: {}]   ;;  %s5513_s4 = inlined_call_operand.vmem [shape: f32[1,128], index: 4, kind: input, shape index: {}]   ;;  %s5514_s5 = inlined_call_operand.vmem [shape: f32[1,128], index: 5, kind: input, shape index: {}]   ;;  %s5515_s6 = inlined_call_operand.vmem [shape: bf16[2,16,16,128], index: 6, kind: output, shape index: {0}]   ;;  %s5516_s7 = inlined_call_operand.vmem [shape: f32[2,1,2,128], index: 7, kind: output, shape index: {1}]  }
   0x1   :  { %s4324_s2 = smov 0  }
   0x2 LB: > { %s30_s25 = sadd.s32 1, %s4273_s1  ;;  %p3005_p0 = scmp.ge.s32.totalorder %s4277_s2, 1  ;;  %s4277_s2 = sphi %s4324_s2, %s18_s2   ;;  %s4273_s1 = sphi %s4322_s1, %s5545_s1   ;;  %s4269_s24 = sphi %s4320_s24, %s5544_s24  }
   0x3   : > { %p32_p1 = scmp.ge.s32.totalorder %s30_s25, 2  ;;  %p328_p2 = scmp.lt.s32.totalorder %s4277_s2, 3 }
   0x5   : > { %s5547_s25 = smov (%p32_p1, %s30_s25), 0  ;;  %p329_p3 = pnand %p3005_p0, %p328_p2 }
   0x6   : > { %v4183_v0 = vld [vmem:[%s5512_s3 + $0x100] sm:$0xff] (!%p329_p3)   ;;  %v4186_v3 = vld [vmem:[%s5512_s3 + $0x108] sm:$0xff] (!%p329_p3)   ;;  %v4189_v6 = vld [vmem:[%s5512_s3 + $0x110] sm:$0xff] (!%p329_p3)   ;;  %p404_p4 = scmp.lt.s32.totalorder (!%p329_p3), %s4269_s24, 1  ;;  %vm833_vm0 = vcmask (!%p329_p3), 1040384   ;;  %v5526_v29 = vmov (!%p329_p3), 0  }
   0x7   : > { %332 = sbr.rel (%p329_p3) target bundleno = 575 (0x23f), region = 44  ;;  %v4346_v1 = vld [vmem:[%s5512_s3 + $0x140] sm:$0xff] (!%p329_p3)   ;;  %3430 = vmatprep.subr.bf16.mxu0 (!%p329_p3), %v4183_v0  ;;  %v4359_v4 = vld [vmem:[%s5512_s3 + $0x148] sm:$0xff] (!%p329_p3)   ;;  %v4371_v7 = vld [vmem:[%s5512_s3 + $0x150] sm:$0xff] (!%p329_p3)   ;;  %vm834_vm1 = vsmask.f32 (!%p329_p3), 256 }
   0x8   : > { %v4185_v2 = vld [vmem:[%s5512_s3 + $0xc0] sm:$0xff] (!%p329_p3)   ;;  %3982 = vmatprep.subr.bf16.mxu1 (!%p329_p3), %v4346_v1  ;;  %v4188_v5 = vld [vmem:[%s5512_s3 + $0xc8] sm:$0xff] (!%p329_p3)   ;;  %v4191_v8 = vld [vmem:[%s5512_s3 + $0xd0] sm:$0xff] (!%p329_p3)   ;;  %v692_v30 = vrot.slane (!%p329_p3), %v5526_v29, 7  ;;  %vm909_vm2 = vsmask.f32 (!%p329_p3), 7424 }
   0x9   : > { %3431 = vmatpush3.bf16.msra.mxu0 (!%p329_p3), %v4185_v2  ;;  %3990 = vmatpush3.bf16.msra.mxu1 (!%p329_p3), %v4346_v1  ;;  %v4192_v9 = vld [vmem:[%s5512_s3 + $0x118] sm:$0xff] (!%p329_p3)   ;;  %v4195_v12 = vld [vmem:[%s5512_s3 + $0x120] sm:$0xff] (!%p329_p3)   ;;  %v4198_v15 = vld [vmem:[%s5512_s3 + $0x128] sm:$0xff] (!%p329_p3)   ;;  %vm908_vm4 = vcmask (!%p329_p3), 1047552  }
   0xa   : > { %3432 = vmatprep.subr.bf16.mxu0 (!%p329_p3), %v4186_v3  ;;  %3983 = vmatprep.subr.bf16.mxu1 (!%p329_p3), %v4359_v4  ;;  %v4384_v10 = vld [vmem:[%s5512_s3 + $0x158] sm:$0xff] (!%p329_p3)   ;;  %v4398_v13 = vld [vmem:[%s5512_s3 + $0x160] sm:$0xff] (!%p329_p3)   ;;  %v4414_v16 = vld [vmem:[%s5512_s3 + $0x168] sm:$0xff] (!%p329_p3)  }
   0xb   : > { %v4194_v11 = vld [vmem:[%s5512_s3 + $0xd8] sm:$0xff] (!%p329_p3)   ;;  %v4197_v14 = vld [vmem:[%s5512_s3 + $0xe0] sm:$0xff] (!%p329_p3)   ;;  %v4200_v17 = vld [vmem:[%s5512_s3 + $0xe8] sm:$0xff] (!%p329_p3)  }
   0xc   : > { %v4201_v18 = vld [vmem:[%s5512_s3 + $0x130] sm:$0xff] (!%p329_p3)   ;;  %v4204_v21 = vld [vmem:[%s5512_s3 + $0x138] sm:$0xff] (!%p329_p3)   ;;  %v4448_v23 = vld [vmem:[%s5513_s4] ss:$0 sm:$0xff] (!%p329_p3) }
   0xd   : > { %3433 = vmatpush3.bf16.msra.mxu0 (!%p329_p3), %v4188_v5  ;;  %3991 = vmatpush3.bf16.msra.mxu1 (!%p329_p3), %v4359_v4  ;;  %v4428_v19 = vld [vmem:[%s5512_s3 + $0x170] sm:$0xff] (!%p329_p3)   ;;  %v4454_v24 = vld [vmem:[%s5512_s3 + $0x178] sm:$0xff] (!%p329_p3)   ;;  %v4462_v31 = vld [vmem:[%s5514_s5] ss:$0 sm:$0xff] (!%p329_p3) }
   0xe   : > { %3434 = vmatprep.subr.bf16.mxu0 %v4189_v6  ;;  %3984 = vmatprep.subr.bf16.mxu1 %v4371_v7  ;;  %s5549_s24 = smov (!%p404_p4, %s4269_s24), 1  ;;  %v4203_v20 = vld [vmem:[%s5512_s3 + $0xf0] sm:$0xff]   ;;  %v4206_v36 = vld [vmem:[%s5512_s3 + $0xf8] sm:$0xff]   ;;  %vm4474_vm3 = vmand %vm833_vm0, %vm834_vm1 }
   0xf   : > { %s3219_s16 = sshll.u32 %s5549_s24, 7  ;;  %v4207_v46 = vld [vmem:[%s5512_s3 + $0x40] sm:$0xff]   ;;  %v4492_v51 = vsel %vm4474_vm3, 0, %v692_v30  ;;  %vm4525_vm5 = vmand %vm908_vm4, %vm909_vm2 }
  0x10   : > { %s4435_s27 = scalar_lea.vmem %s5509_s0, %s3219_s16  ;;  %v4999_v41 = vld [vmem:[%s5512_s3 + $0x200] sm:$0xff]   ;;  %s5427_s17 = scalar_lea.vmem %s5515_s6, %s3219_s16 }
  0x11   : > { %3435 = vmatpush3.bf16.msra.mxu0 %v4191_v8  ;;  %3992 = vmatpush3.bf16.msra.mxu1 %v4371_v7  ;;  %v3257_v22 = vld [vmem:[%s4435_s27] sm:$0xff]   ;;  %v3408_v28 = vld [vmem:[%s4435_s27 + $0x48] sm:$0xff]   ;;  %v3409_v56 = vld [vmem:[%s4435_s27 + $0x50] sm:$0xff]   ;;  %s3014_s16 = sshll.u32 %s5549_s24, 1 }
  0x12   : > { %3436 = vmatprep.subr.bf16.mxu0 %v4192_v9  ;;  %3985 = vmatprep.subr.bf16.mxu1 %v4384_v10  ;;  %v3258_v25 = vunpack.c.l.bf16 %v3257_v22  ;;  %v3259_v26 = vunpack.c.h.bf16 %v3257_v22  ;;  %v3407_v27 = vld [vmem:[%s4435_s27 + $0x40] sm:$0xff]   ;;  %v3294_v34 = vunpack.c.l.bf16 %v3408_v28  ;;  %v3295_v35 = vunpack.c.h.bf16 %v3408_v28  ;;  %v3400_v50 = vld [vmem:[%s4435_s27 + $0x8] sm:$0xff]   ;;  %v3410_v57 = vld [vmem:[%s4435_s27 + $0x58] sm:$0xff]   ;;  %s465_s20 = scalar_lea.vmem %s5516_s7, %s3014_s16 }
  0x13   : > { %v3290_v32 = vunpack.c.l.bf16 %v3407_v27  ;;  %v3291_v33 = vunpack.c.h.bf16 %v3407_v27  ;;  %v3262_v55 = vunpack.c.l.bf16 %v3400_v50  ;;  %v3263_v61 = vunpack.c.h.bf16 %v3400_v50  ;;  %v4209_v50 = vld [vmem:[%s5512_s3 + $0x48] sm:$0xff]  }
  0x14   : > { %v538_v37 = vmul.f32 %v3258_v25, %v4448_v23  ;;  %v539_v38 = vmul.f32 %v3259_v26, %v4448_v23  ;;  %v556_v42 = vmul.f32 %v3294_v34, %v4448_v23  ;;  %v557_v45 = vmul.f32 %v3295_v35, %v4448_v23 }
  0x15   : > { %3437 = vmatpush3.bf16.msra.mxu0 %v4194_v11  ;;  %3993 = vmatpush3.bf16.msra.mxu1 %v4384_v10  ;;  %v554_v39 = vmul.f32 %v3290_v32, %v4448_v23  ;;  %v555_v40 = vmul.f32 %v3291_v33, %v4448_v23  ;;  %v540_v0 = vmul.f32 %v3262_v55, %v4448_v23  ;;  %v3298_v2 = vunpack.c.l.bf16 %v3409_v56  ;;  %v3411_v55 = vld [vmem:[%s4435_s27 + $0x60] sm:$0xff]   ;;  %v4249_v33 = vld [vmem:[%s5512_s3 + $0x210] sm:$0xff]  }
  0x16   : > { %3438 = vmatprep.subr.bf16.mxu0 %v4195_v12  ;;  %3986 = vmatprep.subr.bf16.mxu1 %v4398_v13  ;;  %v577_v43 = vadd.f32 %v4462_v31, %v538_v37  ;;  %v578_v44 = vadd.f32 %v4462_v31, %v539_v38  ;;  %v595_v49 = vadd.f32 %v4462_v31, %v556_v42  ;;  %v3299_v6 = vunpack.c.h.bf16 %v3409_v56 }
  0x17   : > { %v593_v47 = vadd.f32 %v4462_v31, %v554_v39  ;;  %v594_v48 = vadd.f32 %v4462_v31, %v555_v40  ;;  %v596_v54 = vadd.f32 %v4462_v31, %v557_v45  ;;  %v541_v5 = vmul.f32 %v3263_v61, %v4448_v23 }
  0x18   : > { %v609_v52 = vmax.f32 %v577_v43, 0.0  ;;  %v610_v53 = vmax.f32 %v578_v44, 0.0  ;;  %v627_v60 = vmax.f32 %v595_v49, 0.0  ;;  %v3302_v8 = vunpack.c.l.bf16 %v3410_v57  ;;  %v3401_v43 = vld [vmem:[%s4435_s27 + $0x10] sm:$0xff]  }
  0x19   : > { %3439 = vmatpush3.bf16.msra.mxu0 %v4197_v14  ;;  %3994 = vmatpush3.bf16.msra.mxu1 %v4398_v13  ;;  %v625_v58 = vmax.f32 %v593_v47, 0.0  ;;  %v626_v59 = vmax.f32 %v594_v48, 0.0  ;;  %v628_v63 = vmax.f32 %v596_v54, 0.0  ;;  %v579_v14 = vadd.f32 %v4462_v31, %v540_v0 }
  0x1a   : > { %3440 = vmatprep.subr.bf16.mxu0 %v4198_v15  ;;  %3987 = vmatprep.subr.bf16.mxu1 %v4414_v16  ;;  %v4498_v62 = vpack.c.bf16 %v610_v53, %v609_v52  ;;  %v559_v30 = vmul.f32 %v3299_v6, %v4448_v23  ;;  %v560_v37 = vmul.f32 %v3302_v8, %v4448_v23  ;;  %v3267_v0 = vunpack.c.h.bf16 %v3401_v43  ;;  %v3412_v8 = vld [vmem:[%s4435_s27 + $0x68] sm:$0xff]  }
  0x1b   : > { %v4502_v3 = vpack.c.bf16 %v626_v59, %v625_v58  ;;  %v4508_v12 = vpack.c.bf16 %v628_v63, %v627_v60  ;;  %v611_v26 = vmax.f32 %v579_v14, 0.0  ;;  %v3266_v59 = vunpack.c.l.bf16 %v3401_v43  ;;  %v4210_v60 = vld [vmem:[%s5512_s3 + $0x8] sm:$0xff]  }
  0x1c   : > { %1202 = vmatprep.mubr.bf16.mxu0 %v4498_v62  ;;  %v5518_v9 = vshrl.u32 %v4498_v62, 16  ;;  %v5523_v11 = vshll.u32 %v4498_v62, 16  ;;  %v598_v40 = vadd.f32 %v4462_v31, %v559_v30  ;;  %v599_v48 = vadd.f32 %v4462_v31, %v560_v37 }
  0x1d   : > { %3441 = vmatpush3.bf16.msra.mxu0 %v4200_v17  ;;  %3995 = vmatpush3.bf16.msra.mxu1 %v4414_v16  ;;  %v753_v15 = vshrl.u32 %v4502_v3, 16  ;;  %v756_v17 = vshll.u32 %v4502_v3, 16  ;;  %v760_v22 = vshrl.u32 %v4508_v12, 16  ;;  %v763_v25 = vshll.u32 %v4508_v12, 16 }
  0x1e   : > { %3442 = vmatprep.subr.bf16.mxu0 %v4201_v18  ;;  %3988 = vmatprep.subr.bf16.mxu1 %v4428_v19  ;;  %v580_v18 = vadd.f32 %v4462_v31, %v541_v5  ;;  %v630_v52 = vmax.f32 %v598_v40, 0.0  ;;  %v631_v58 = vmax.f32 %v599_v48, 0.0  ;;  %v3306_v5 = vunpack.c.l.bf16 %v3411_v55 }
  0x1f   : > { %v872_v27 = vrot.slane %v756_v17, 1  ;;  %v874_v35 = vrot.slane %v763_v25, 1  ;;  %v3307_v6 = vunpack.c.h.bf16 %v3411_v55 }
  0x20   : > { %v612_v28 = vmax.f32 %v580_v18, 0.0  ;;  %v562_v30 = vmul.f32 %v3306_v5, %v4448_v23 }
  0x21   : > { %3443 = vmatpush3.bf16.msra.mxu0 %v4203_v20  ;;  %3996 = vmatpush3.bf16.msra.mxu1 %v4428_v19  ;;  %v558_v20 = vmul.f32 %v3298_v2, %v4448_v23  ;;  %v873_v38 = vor.u32 %v872_v27, %v753_v15  ;;  %v875_v45 = vor.u32 %v874_v35, %v760_v22 }
  0x22   : > { %3444 = vmatprep.subr.bf16.mxu0 %v4204_v21  ;;  %3989 = vmatprep.subr.bf16.mxu1 %v4454_v24  ;;  %v699_v21 = vrot.slane %v5518_v9, 7  ;;  %v4536_v39 = vpack.c.bf16 %v612_v28, %v611_v26  ;;  %v542_v2 = vmul.f32 %v3266_v59, %v4448_v23  ;;  %v543_v26 = vmul.f32 %v3267_v0, %v4448_v23 }
  0x23   : > { %v597_v32 = vadd.f32 %v4462_v31, %v558_v20  ;;  %v4553_v49 = vsel %vm4525_vm5, %v873_v38, 0  ;;  %v4565_v56 = vsel %vm4525_vm5, %v875_v45, 0  ;;  %v3310_v38 = vunpack.c.l.bf16 %v3412_v8 }
  0x24   : > { %v702_v34 = vor.u32 %v5523_v11, %v699_v21  ;;  %v5521_v53 = vshrl.u32 %v4536_v39, 16  ;;  %v707_v54 = vshll.u32 %v4536_v39, 16  ;;  %3870 = vmatprep.mubr.bf16.mxu1 %v4553_v49  ;;  %v4211_v21 = vld [vmem:[%s5512_s3 + $0x50] sm:$0xff]   ;;  %v581_v28 = vadd.f32 %v4462_v31, %v542_v2 }
  0x25   : > { %3445 = vmatpush3.bf16.msra.mxu0 %v4206_v36  ;;  %3997 = vmatpush3.bf16.msra.mxu1 %v4454_v24  ;;  %v3303_v36 = vunpack.c.h.bf16 %v3410_v57  ;;  %v629_v42 = vmax.f32 %v597_v32, 0.0  ;;  %v563_v32 = vmul.f32 %v3307_v6, %v4448_v23  ;;  %v582_v37 = vadd.f32 %v4462_v31, %v543_v26  ;;  %v4215_v6 = vld [vmem:[%s5512_s3 + $0x60] sm:$0xff]  }
  0x26   : > { %3838 = vmatprep.subr.bf16.mxu0 %v4346_v1  ;;  %3566 = vmatprep.subr.bf16.mxu1 %v4207_v46  ;;  %v4542_v44 = vsel %vm4474_vm3, 0, %v702_v34  ;;  %v4208_v46 = vld [vmem:[%s5512_s3] sm:$0xff]   ;;  %v706_v63 = vrot.slane %v5521_v53, 7  ;;  %v3402_v34 = vld [vmem:[%s4435_s27 + $0x18] sm:$0xff]   ;;  %v613_v43 = vmax.f32 %v581_v28, 0.0  ;;  %v601_v45 = vadd.f32 %v4462_v31, %v562_v30 }
  0x27   : > { %v561_v47 = vmul.f32 %v3303_v36, %v4448_v23  ;;  %v4574_v61 = vpack.c.bf16 %v630_v52, %v629_v42  ;;  %v614_v48 = vmax.f32 %v582_v37, 0.0  ;;  %v3311_v52 = vunpack.c.h.bf16 %v3412_v8 }
  0x28   : > { %1203 = vmatmul.mubr.bf16.vlgmr.msra.gmra.mrb[0].mxu0 %v4542_v44  ;;  %3871 = vmatmul.mubr.bf16.vlgmr.msra.gmra.mrb[0].mxu1 %v4565_v56  ;;  %v709_v20 = vor.u32 %v707_v54, %v706_v63  ;;  %v564_v59 = vmul.f32 %v3310_v38, %v4448_v23  ;;  %v3271_v8 = vunpack.c.h.bf16 %v3402_v34  ;;  %v4216_v38 = vld [vmem:[%s5512_s3 + $0x20] sm:$0xff]  }
  0x29   : > { %3839 = vmatpush3.bf16.msra.mxu0 %v4346_v1  ;;  %v600_v57 = vadd.f32 %v4462_v31, %v561_v47  ;;  %1210 = vmatprep.mubr.bf16.mxu0 %v4536_v39  ;;  %v767_v14 = vshrl.u32 %v4574_v61, 16  ;;  %v770_v18 = vshll.u32 %v4574_v61, 16  ;;  %v4213_v47 = vld [vmem:[%s5512_s3 + $0x58] sm:$0xff]   ;;  %v4628_v0 = vpack.c.bf16 %v614_v48, %v613_v43 }
  0x2a   : > { %3567 = vmatpush3.bf16.msra.mxu1 %v4208_v46  ;;  %3840 = vmatprep.subr.bf16.mxu0 %v4359_v4  ;;  %v4600_v36 = vsel %vm4474_vm3, 0, %v709_v20  ;;  %v565_v2 = vmul.f32 %v3311_v52, %v4448_v23 }
  0x2b   : > { %v632_v1 = vmax.f32 %v600_v57, 0.0  ;;  %3568 = vmatprep.subr.bf16.mxu1 %v4209_v50  ;;  %v876_v35 = vrot.slane %v770_v18, 1  ;;  %v602_v50 = vadd.f32 %v4462_v31, %v563_v32  ;;  %v4214_v57 = vld [vmem:[%s5512_s3 + $0x18] sm:$0xff]   ;;  %v5517_v26 = vshrl.u32 %v4628_v0, 16  ;;  %v3413_v32 = vld [vmem:[%s4435_s27 + $0x70] sm:$0xff]  }
  0x2c   : > { %v5520_v28 = vshll.u32 %v4628_v0, 16  ;;  %v604_v30 = vadd.f32 %v4462_v31, %v565_v2 }
  0x2d   : > { %v4589_v27 = vpack.c.bf16 %v632_v1, %v631_v58  ;;  %3841 = vmatpush3.bf16.msra.mxu0 %v4359_v4  ;;  %v4212_v4 = vld [vmem:[%s5512_s3 + $0x10] sm:$0xff]   ;;  %v877_v46 = vor.u32 %v876_v35, %v767_v14  ;;  %v633_v58 = vmax.f32 %v601_v45, 0.0  ;;  %v634_v1 = vmax.f32 %v602_v50, 0.0  ;;  %v3414_v35 = vld [vmem:[%s4435_s27 + $0x78] sm:$0xff]   ;;  %v4217_v50 = vld [vmem:[%s5512_s3 + $0x68] sm:$0xff]  }
  0x2e   : > { %3842 = vmatprep.subr.bf16.mxu0 %v4371_v7  ;;  %3569 = vmatpush3.bf16.msra.mxu1 %v4210_v60  ;;  %v3270_v60 = vunpack.c.l.bf16 %v3402_v34  ;;  %v636_v48 = vmax.f32 %v604_v30, 0.0  ;;  %v3318_v2 = vunpack.c.l.bf16 %v3414_v35  ;;  %v3319_v30 = vunpack.c.h.bf16 %v3414_v35 }
  0x2f   : > { %v774_v40 = vshrl.u32 %v4589_v27, 16  ;;  %v777_v42 = vshll.u32 %v4589_v27, 16  ;;  %3570 = vmatprep.subr.bf16.mxu1 %v4211_v21  ;;  %v4626_v63 = vsel %vm4525_vm5, %v877_v46, 0  ;;  %v4641_v21 = vpack.c.bf16 %v634_v1, %v633_v58 }
  0x30   : > { %1211 = vmatmul.mubr.bf16.gmra.mrb[4].mxu0 %v4600_v36  ;;  %3874 = vmatprep.mubr.bf16.mxu1 %v4626_v63  ;;  %v544_v20 = vmul.f32 %v3270_v60, %v4448_v23  ;;  %v3315_v58 = vunpack.c.h.bf16 %v3413_v32 }
  0x31   : > { %v878_v55 = vrot.slane %v777_v42, 1  ;;  %3843 = vmatpush3.bf16.msra.mxu0 %v4371_v7  ;;  %v603_v7 = vadd.f32 %v4462_v31, %v564_v59  ;;  %1218 = vmatprep.mubr.bf16.mxu0 %v4628_v0  ;;  %v781_v45 = vshrl.u32 %v4641_v21, 16  ;;  %v784_v46 = vshll.u32 %v4641_v21, 16 }
  0x32   : > { %3844 = vmatprep.subr.bf16.mxu0 %v4384_v10  ;;  %3571 = vmatpush3.bf16.msra.mxu1 %v4212_v4  ;;  %v545_v4 = vmul.f32 %v3271_v8, %v4448_v23  ;;  %v583_v43 = vadd.f32 %v4462_v31, %v544_v20  ;;  %v567_v20 = vmul.f32 %v3315_v58, %v4448_v23 }
  0x33   : > { %v879_v5 = vor.u32 %v878_v55, %v774_v40  ;;  %3572 = vmatprep.subr.bf16.mxu1 %v4213_v47  ;;  %v635_v34 = vmax.f32 %v603_v7, 0.0  ;;  %v713_v47 = vrot.slane %v5517_v26, 7  ;;  %v3314_v55 = vunpack.c.l.bf16 %v3413_v32  ;;  %v4221_v26 = vld [vmem:[%s5512_s3 + $0x78] sm:$0xff]  }
  0x34   : > { %v615_v52 = vmax.f32 %v583_v43, 0.0  ;;  %v880_v59 = vrot.slane %v784_v46, 1  ;;  %v4219_v43 = vld [vmem:[%s5512_s3 + $0x70] sm:$0xff]  }
  0x35   : > { %v4650_v37 = vsel %vm4525_vm5, %v879_v5, 0  ;;  %3845 = vmatpush3.bf16.msra.mxu0 %v4384_v10  ;;  %v584_v10 = vadd.f32 %v4462_v31, %v545_v4  ;;  %v716_v60 = vor.u32 %v5520_v28, %v713_v47  ;;  %v4672_v1 = vpack.c.bf16 %v636_v48, %v635_v34  ;;  %v4218_v5 = vld [vmem:[%s5512_s3 + $0x28] sm:$0xff]   ;;  %v3406_v28 = vld [vmem:[%s4435_s27 + $0x38] sm:$0xff]  }
  0x36   : > { %3875 = vmatmul.mubr.bf16.gmra.mrb[4].mxu1 %v4650_v37  ;;  %3846 = vmatprep.subr.bf16.mxu0 %v4398_v13  ;;  %v566_v8 = vmul.f32 %v3314_v55, %v4448_v23  ;;  %v881_v32 = vor.u32 %v880_v59, %v781_v45  ;;  %v606_v47 = vadd.f32 %v4462_v31, %v567_v20  ;;  %v4220_v20 = vld [vmem:[%s5512_s3 + $0x30] sm:$0xff]  }
  0x37   : > { %3573 = vmatpush3.bf16.msra.mxu1 %v4214_v57  ;;  %v3403_v57 = vld [vmem:[%s4435_s27 + $0x20] sm:$0xff]   ;;  %v616_v7 = vmax.f32 %v584_v10, 0.0  ;;  %v788_v34 = vshrl.u32 %v4672_v1, 16  ;;  %v5525_v4 = vshll.u32 %v4672_v1, 16  ;;  %v3404_v10 = vld [vmem:[%s4435_s27 + $0x28] sm:$0xff]   ;;  %v568_v59 = vmul.f32 %v3318_v2, %v4448_v23 }
  0x38   : > { %3574 = vmatprep.subr.bf16.mxu1 %v4215_v6  ;;  %v4685_v6 = vsel %vm4474_vm3, 0, %v716_v60  ;;  %v605_v35 = vadd.f32 %v4462_v31, %v566_v8  ;;  %v3274_v48 = vunpack.c.l.bf16 %v3403_v57  ;;  %v4701_v55 = vsel %vm4525_vm5, %v881_v32, 0 }
  0x39   : > { %3847 = vmatpush3.bf16.msra.mxu0 %v4398_v13  ;;  %v4694_v13 = vpack.c.bf16 %v616_v7, %v615_v52  ;;  %v882_v58 = vrot.slane %v5525_v4, 1  ;;  %3878 = vmatprep.mubr.bf16.mxu1 %v4701_v55  ;;  %v638_v60 = vmax.f32 %v606_v47, 0.0  ;;  %v607_v2 = vadd.f32 %v4462_v31, %v568_v59 }
  0x3a   : > { %3848 = vmatprep.subr.bf16.mxu0 %v4414_v16  ;;  %1219 = vmatmul.mubr.bf16.gmra.mrb[8].mxu0 %v4685_v6  ;;  %v637_v52 = vmax.f32 %v605_v35, 0.0  ;;  %v3275_v32 = vunpack.c.h.bf16 %v3403_v57  ;;  %v3278_v9 = vunpack.c.l.bf16 %v3404_v10 }
  0x3b   : > { %3575 = vmatpush3.bf16.msra.mxu1 %v4216_v38  ;;  %v569_v38 = vmul.f32 %v3319_v30, %v4448_v23  ;;  %1226 = vmatprep.mubr.bf16.mxu0 %v4694_v13  ;;  %v5519_v7 = vshrl.u32 %v4694_v13, 16  ;;  %v5522_v8 = vshll.u32 %v4694_v13, 16 }
  0x3c   : > { %3576 = vmatprep.subr.bf16.mxu1 %v4217_v50  ;;  %v883_v50 = vor.u32 %v882_v58, %v788_v34  ;;  %v4719_v35 = vpack.c.bf16 %v638_v60, %v637_v52  ;;  %v546_v58 = vmul.f32 %v3274_v48, %v4448_v23  ;;  %v547_v59 = vmul.f32 %v3275_v32, %v4448_v23 }
  0x3d   : > { %v608_v30 = vadd.f32 %v4462_v31, %v569_v38  ;;  %3849 = vmatpush3.bf16.msra.mxu0 %v4414_v16  ;;  %v720_v47 = vrot.slane %v5519_v7, 7  ;;  %v639_v16 = vmax.f32 %v607_v2, 0.0  ;;  %v3405_v38 = vld [vmem:[%s4435_s27 + $0x30] sm:$0xff]   ;;  %v3279_v32 = vunpack.c.h.bf16 %v3404_v10  ;;  %v4230_v10 = vld [vmem:[%s5512_s3 + $0x1c0] sm:$0xff]  }
  0x3e   : > { %3850 = vmatprep.subr.bf16.mxu0 %v4428_v19  ;;  %v4730_v57 = vsel %vm4525_vm5, %v883_v50, 0  ;;  %v795_v52 = vshrl.u32 %v4719_v35, 16  ;;  %v5524_v48 = vshll.u32 %v4719_v35, 16  ;;  %v4222_v50 = vld [vmem:[%s5512_s3 + $0x38] sm:$0xff]   ;;  %v585_v2 = vadd.f32 %v4462_v31, %v546_v58 }
  0x3f   : > { %3577 = vmatpush3.bf16.msra.mxu1 %v4218_v5  ;;  %v640_v5 = vmax.f32 %v608_v30, 0.0  ;;  %v723_v60 = vor.u32 %v5522_v8, %v720_v47  ;;  %v548_v7 = vmul.f32 %v3278_v9, %v4448_v23  ;;  %v3282_v58 = vunpack.c.l.bf16 %v3405_v38 }
  0x40   : > { %3578 = vmatprep.subr.bf16.mxu1 %v4219_v43  ;;  %3879 = vmatmul.mubr.bf16.gmra.mrb[8].mxu1 %v4730_v57  ;;  %v586_v43 = vadd.f32 %v4462_v31, %v547_v59  ;;  %v884_v53 = vrot.slane %v5524_v48, 1  ;;  %v617_v8 = vmax.f32 %v585_v2, 0.0  ;;  %v4768_v59 = vld [vmem:[%s5512_s3 + $0x80] sm:$0xff]   ;;  %v3283_v2 = vunpack.c.h.bf16 %v3405_v38 }
  0x41   : > { %v4743_v30 = vpack.c.bf16 %v640_v5, %v639_v16  ;;  %3851 = vmatpush3.bf16.msra.mxu0 %v4428_v19  ;;  %v4753_v47 = vsel %vm4474_vm3, 0, %v723_v60  ;;  %v549_v5 = vmul.f32 %v3279_v32, %v4448_v23  ;;  %v587_v60 = vadd.f32 %v4462_v31, %v548_v7 }
  0x42   : > { %3852 = vmatprep.subr.bf16.mxu0 %v4454_v24  ;;  %1227 = vmatmul.mubr.bf16.gmra.mrb[12].mxu0 %v4753_v47  ;;  %v618_v16 = vmax.f32 %v586_v43, 0.0  ;;  %v550_v11 = vmul.f32 %v3282_v58, %v4448_v23  ;;  %v3286_v32 = vunpack.c.l.bf16 %v3406_v28  ;;  %v551_v7 = vmul.f32 %v3283_v2, %v4448_v23 }
  0x43   : > { %3579 = vmatpush3.bf16.msra.mxu1 %v4220_v20  ;;  %v802_v19 = vshrl.u32 %v4743_v30, 16  ;;  %v805_v9 = vshll.u32 %v4743_v30, 16  ;;  %v885_v20 = vor.u32 %v884_v53, %v795_v52  ;;  %v588_v43 = vadd.f32 %v4462_v31, %v549_v5 }
  0x44   : > { %3580 = vmatprep.subr.bf16.mxu1 %v4221_v26  ;;  %v4774_v26 = vpack.c.bf16 %v618_v16, %v617_v8  ;;  %v619_v4 = vmax.f32 %v587_v60, 0.0  ;;  %v589_v38 = vadd.f32 %v4462_v31, %v550_v11  ;;  %v552_v11 = vmul.f32 %v3286_v32, %v4448_v23 }
  0x45   : > { %v886_v48 = vrot.slane %v805_v9, 1  ;;  %3853 = vmatpush3.bf16.msra.mxu0 %v4454_v24  ;;  %v4780_v53 = vsel %vm4525_vm5, %v885_v20, 0  ;;  %v620_v16 = vmax.f32 %v588_v43, 0.0  ;;  %v3287_v20 = vunpack.c.h.bf16 %v3406_v28 }
  0x46   : > { %3702 = vmatprep.subr.bf16.mxu0 %v4230_v10  ;;  %3882 = vmatprep.mubr.bf16.mxu1 %v4780_v53  ;;  %v725_v24 = vshrl.u32 %v4774_v26, 16  ;;  %v728_v58 = vshll.u32 %v4774_v26, 16  ;;  %v621_v5 = vmax.f32 %v589_v38, 0.0  ;;  %v755_v2 = vrot.slane %v753_v15, 7 }
  0x47   : > { %3581 = vmatpush3.bf16.msra.mxu1 %v4222_v50  ;;  %v887_v8 = vor.u32 %v886_v48, %v802_v19  ;;  %1234 = vmatprep.mubr.bf16.mxu0 %v4774_v26  ;;  %v590_v50 = vadd.f32 %v4462_v31, %v551_v7  ;;  %v4799_v60 = vpack.c.bf16 %v620_v16, %v619_v4  ;;  %v762_v32 = vrot.slane %v760_v22, 7 }
  0x48   : > { %3886 = vmatprep.subr.bf16.mxu1 %v4768_v59  ;;  %v727_v48 = vrot.slane %v725_v24, 7  ;;  %v553_v7 = vmul.f32 %v3287_v20, %v4448_v23  ;;  %v591_v28 = vadd.f32 %v4462_v31, %v552_v11  ;;  %v758_v15 = vor.u32 %v756_v17, %v755_v2 }
  0x49   : > { %v4795_v10 = vsel %vm4525_vm5, %v887_v8, 0  ;;  %v622_v43 = vmax.f32 %v590_v50, 0.0  ;;  %v732_v4 = vshrl.u32 %v4799_v60, 16  ;;  %v735_v8 = vshll.u32 %v4799_v60, 16 }
  0x4a   : > { %3883 = vmatmul.mubr.bf16.gmra.mrb[12].mxu1 %v4795_v10  ;;  %v730_v38 = vor.u32 %v728_v58, %v727_v48  ;;  %v592_v23 = vadd.f32 %v4462_v31, %v553_v7  ;;  %v623_v50 = vmax.f32 %v591_v28, 0.0  ;;  %v765_v22 = vor.u32 %v763_v25, %v762_v32 }
  0x4b   : > { %1668 = vmatprep.mubr.bf16.mxu1 %v5526_v29  ;;  %v4815_v16 = vpack.c.bf16 %v622_v43, %v621_v5  ;;  %v734_v11 = vrot.slane %v732_v4, 7  ;;  %v4828_v48 = vsel %vm4474_vm3, 0, %v758_v15  ;;  %v769_v17 = vrot.slane %v767_v14, 7 }
  0x4c   : > { %v4822_v20 = vsel %vm4474_vm3, 0, %v730_v38  ;;  %v624_v5 = vmax.f32 %v592_v23, 0.0  ;;  %v4837_v2 = vsel %vm4474_vm3, 0, %v765_v22  ;;  %v776_v14 = vrot.slane %v774_v40, 7  ;;  %v4224_v38 = vld [vmem:[%s5512_s3 + $0x88] sm:$0xff]  }
  0x4d   : > { %1235 = vmatmul.mubr.bf16.gmra.mrb[16].mxu0 %v4822_v20  ;;  %v5528_v31 = vshrl.u32 %v4815_v16, 16  ;;  %v742_v25 = vshll.u32 %v4815_v16, 16  ;;  %v737_v43 = vor.u32 %v735_v8, %v734_v11  ;;  %v772_v7 = vor.u32 %v770_v18, %v769_v17 }
  0x4e   : > { %1242 = vmatprep.mubr.bf16.mxu0 %v4799_v60  ;;  %v783_v28 = vrot.slane %v781_v45, 7  ;;  %v4851_v15 = vpack.c.bf16 %v624_v5, %v623_v50  ;;  %v790_v23 = vrot.slane %v788_v34, 7  ;;  %v797_v18 = vrot.slane %v795_v52, 7 }
  0x4f   : > { %v741_v32 = vrot.slane %v5528_v31, 7  ;;  %v858_v40 = vrot.slane %v707_v54, 1  ;;  %v4861_v45 = vsel %vm4474_vm3, 0, %v772_v7  ;;  %v779_v22 = vor.u32 %v777_v42, %v776_v14  ;;  %v4225_v7 = vld [vmem:[%s5512_s3 + $0x90] sm:$0xff]  }
  0x50   : > { %v786_v50 = vor.u32 %v784_v46, %v783_v28  ;;  %v4870_v34 = vsel %vm4474_vm3, 0, %v737_v43  ;;  %v5533_v52 = vshll.u32 %v4672_v1, 16  ;;  %v5534_v46 = vshll.u32 %v4719_v35, 16 }
  0x51   : > { %v4878_v54 = vsel %vm4474_vm3, 0, %v779_v22  ;;  %v804_v5 = vrot.slane %v802_v19, 7  ;;  %v744_v43 = vor.u32 %v742_v25, %v741_v32  ;;  %v5535_v28 = vshll.u32 %v4498_v62, 16 }
  0x52   : > { %1669 = vmatmul.mubr.bf16.vlgmr.msra.gmra.mrb[16].mxu1 %v4492_v51  ;;  %v793_v11 = vor.u32 %v5533_v52, %v790_v23  ;;  %v4882_v42 = vsel %vm4474_vm3, 0, %v786_v50  ;;  %v800_v17 = vor.u32 %v5534_v46, %v797_v18  ;;  %v5536_v32 = vshrl.u32 %v4536_v39, 16 }
  0x53   : > { %3887 = vmatpush3.bf16.msra.mxu1 %v4768_v59  ;;  %1676 = vmatprep.mubr.bf16.mxu1 %v4498_v62  ;;  %v746_v59 = vshrl.u32 %v4851_v15, 16  ;;  %v856_v23 = vrot.slane %v5535_v28, 1  ;;  %v807_v19 = vor.u32 %v805_v9, %v804_v5  ;;  %v5537_v50 = vshll.u32 %v4628_v0, 16 }
  0x54   : > { %3888 = vmatprep.subr.bf16.mxu1 %v4224_v38  ;;  %v4894_v14 = vsel %vm4474_vm3, 0, %v793_v11  ;;  %v4900_v18 = vsel %vm4474_vm3, 0, %v800_v17  ;;  %v859_v22 = vor.u32 %v858_v40, %v5536_v32  ;;  %v749_v11 = vshll.u32 %v4851_v15, 16 }
  0x55   : > { %v860_v52 = vrot.slane %v5537_v50, 1  ;;  %1243 = vmatmul.mubr.bf16.gmra.mrb[20].mxu0 %v4870_v34  ;;  %v5538_v46 = vshrl.u32 %v4498_v62, 16  ;;  %v5539_v29 = vshll.u32 %v4694_v13, 16  ;;  %v864_v31 = vrot.slane %v728_v58, 1 }
  0x56   : > { %1250 = vmatprep.mubr.bf16.mxu0 %v4815_v16  ;;  %v4919_v9 = vsel %vm4474_vm3, 0, %v807_v19  ;;  %v4923_v40 = vsel %vm4525_vm5, %v859_v22, 0  ;;  %v5540_v62 = vshrl.u32 %v4628_v0, 16  ;;  %v868_v50 = vrot.slane %v742_v25, 1 }
  0x57   : > { %v857_v28 = vor.u32 %v856_v23, %v5538_v46  ;;  %v862_v17 = vrot.slane %v5539_v29, 1  ;;  %3889 = vmatpush3.bf16.msra.mxu1 %v4224_v38  ;;  %v866_v23 = vrot.slane %v735_v8, 1  ;;  %v4226_v29 = vld [vmem:[%s5512_s3 + $0x98] sm:$0xff]   ;;  %v5541_v38 = vshrl.u32 %v4694_v13, 16 }
  0x58   : > { %v861_v5 = vor.u32 %v860_v52, %v5540_v62  ;;  %3890 = vmatprep.subr.bf16.mxu1 %v4225_v7  ;;  %v865_v32 = vor.u32 %v864_v31, %v725_v24  ;;  %v870_v52 = vrot.slane %v749_v11, 1  ;;  %v4947_v46 = vsel %vm4474_vm3, 0, %v744_v43 }
  0x59   : > { %v4932_v58 = vsel %vm4525_vm5, %v857_v28, 0  ;;  %v863_v19 = vor.u32 %v862_v17, %v5541_v38  ;;  %v867_v8 = vor.u32 %v866_v23, %v732_v4  ;;  %v748_v31 = vrot.slane %v746_v59, 7  ;;  %v4227_v17 = vld [vmem:[%s5512_s3 + $0xa0] sm:$0xff]  }
  0x5a   : > { %v4940_v22 = vsel %vm4525_vm5, %v861_v5, 0  ;;  %1677 = vmatmul.mubr.bf16.gmra.mrb[20].mxu1 %v4542_v44  ;;  %v4955_v24 = vsel %vm4525_vm5, %v865_v32, 0  ;;  %v5542_v44 = vshrl.u32 %v4815_v16, 16  ;;  %v871_v43 = vor.u32 %v870_v52, %v746_v59  ;;  %v4228_v59 = vld [vmem:[%s5512_s3 + $0xa8] sm:$0xff]   ;;  %v4231_v38 = vld [vmem:[%s5512_s3 + $0x180] sm:$0xff]   ;;  %v4236_v52 = vld [vmem:[%s5512_s3 + $0x1d8] sm:$0xff]  }
  0x5b   : > { %v4951_v28 = vsel %vm4525_vm5, %v863_v19, 0  ;;  %1684 = vmatprep.mubr.bf16.mxu1 %v4536_v39  ;;  %3891 = vmatpush3.bf16.msra.mxu1 %v4225_v7  ;;  %v4960_v4 = vsel %vm4525_vm5, %v867_v8, 0  ;;  %v751_v5 = vor.u32 %v749_v11, %v748_v31  ;;  %v4229_v11 = vld [vmem:[%s5512_s3 + $0xb0] sm:$0xff]   ;;  %v4232_v19 = vld [vmem:[%s5512_s3 + $0x1c8] sm:$0xff]   ;;  %v4237_v31 = vld [vmem:[%s5512_s3 + $0x198] sm:$0xff]  }
  0x5c   : > { %v869_v25 = vor.u32 %v868_v50, %v5542_v44  ;;  %3892 = vmatprep.subr.bf16.mxu1 %v4226_v29  ;;  %v4973_v7 = vsel %vm4525_vm5, %v871_v43, 0  ;;  %v4233_v32 = vld [vmem:[%s5512_s3 + $0x188] sm:$0xff]   ;;  %v4234_v8 = vld [vmem:[%s5512_s3 + $0x1d0] sm:$0xff]   ;;  %v4239_v44 = vld [vmem:[%s5512_s3 + $0x1e0] sm:$0xff]  }
  0x5d   : > { %1251 = vmatmul.mubr.bf16.gmra.mrb[24].mxu0 %v4947_v46  ;;  %v4984_v23 = vsel %vm4474_vm3, 0, %v751_v5  ;;  %v4235_v50 = vld [vmem:[%s5512_s3 + $0x190] sm:$0xff]   ;;  %v4241_v43 = vld [vmem:[%s5512_s3 + $0x1e8] sm:$0xff]  }
  0x5e   : > { %v4969_v62 = vsel %vm4525_vm5, %v869_v25, 0  ;;  %1258 = vmatprep.mubr.bf16.mxu0 %v4851_v15  ;;  %v4240_v25 = vld [vmem:[%s5512_s3 + $0x1a0] sm:$0xff]   ;;  %v4243_v5 = vld [vmem:[%s5512_s3 + $0x1f0] sm:$0xff]  }
  0x5f   : > { %3893 = vmatpush3.bf16.msra.mxu1 %v4226_v29  ;;  %v4238_v29 = vld [vmem:[%s5512_s3 + $0xb8] sm:$0xff]  }
  0x60   : > { %3894 = vmatprep.subr.bf16.mxu1 %v4227_v17 }
  0x62   : > { %1685 = vmatmul.mubr.bf16.gmra.mrb[24].mxu1 %v4600_v36 }
  0x63   : > { %1692 = vmatprep.mubr.bf16.mxu1 %v4628_v0  ;;  %3895 = vmatpush3.bf16.msra.mxu1 %v4227_v17  ;;  %v4242_v17 = vld [vmem:[%s5512_s3 + $0x1a8] sm:$0xff]  }
  0x64   : > { %3896 = vmatprep.subr.bf16.mxu1 %v4228_v59 }
  0x65   : > { %1259 = vmatmul.mubr.bf16.gmra.mrb[28].mxu0 %v4984_v23 }
  0x66   : > { %1266 = vmatprep.mubr.bf16.mxu0 %v4502_v3 }
  0x67   : > { %3897 = vmatpush3.bf16.msra.mxu1 %v4228_v59  ;;  %v4244_v59 = vld [vmem:[%s5512_s3 + $0x1b0] sm:$0xff]  }
  0x68   : > { %3898 = vmatprep.subr.bf16.mxu1 %v4229_v11 }
  0x6a   : > { %1693 = vmatmul.mubr.bf16.gmra.mrb[28].mxu1 %v4685_v6 }
  0x6b   : > { %1700 = vmatprep.mubr.bf16.mxu1 %v4694_v13  ;;  %3899 = vmatpush3.bf16.msra.mxu1 %v4229_v11  ;;  %v4245_v11 = vld [vmem:[%s5512_s3 + $0x1f8] sm:$0xff]  }
  0x6c   : > { %3900 = vmatprep.subr.bf16.mxu1 %v4238_v29 }
  0x6d   : > { %1267 = vmatmul.mubr.bf16.gmra.mrb[32].mxu0 %v4828_v48 }
  0x6e   : > { %1274 = vmatprep.mubr.bf16.mxu0 %v4508_v12 }
  0x6f   : > { %3901 = vmatpush3.bf16.msra.mxu1 %v4238_v29  ;;  %v5543_v29 = vmov 0  }
  0x70   : > { %3934 = vmatprep.subr.bf16.mxu1 %v4999_v41 }
  0x72   : > { %1701 = vmatmul.mubr.bf16.gmra.mrb[32].mxu1 %v4753_v47 }
  0x73   : > { %1708 = vmatprep.mubr.bf16.mxu1 %v4774_v26 }
  0x75   : > { %1275 = vmatmul.mubr.bf16.gmra.mrb[36].mxu0 %v4837_v2 }
  0x76   : > { %1282 = vmatprep.mubr.bf16.mxu0 %v4574_v61 }
  0x7a   : > { %1709 = vmatmul.mubr.bf16.gmra.mrb[36].mxu1 %v4822_v20 }
  0x7b   : > { %1716 = vmatprep.mubr.bf16.mxu1 %v4799_v60 }
  0x7d   : > { %1283 = vmatmul.mubr.bf16.gmra.mrb[40].mxu0 %v4861_v45 }
  0x7e   : > { %1290 = vmatprep.mubr.bf16.mxu0 %v4589_v27 }
  0x82   : > { %1717 = vmatmul.mubr.bf16.gmra.mrb[40].mxu1 %v4870_v34 }
  0x83   : > { %1724 = vmatprep.mubr.bf16.mxu1 %v4815_v16 }
  0x85   : > { %1291 = vmatmul.mubr.bf16.gmra.mrb[44].mxu0 %v4878_v54 }
  0x86   : > { %1298 = vmatprep.mubr.bf16.mxu0 %v4641_v21 }
  0x8a   : > { %1725 = vmatmul.mubr.bf16.gmra.mrb[44].mxu1 %v4947_v46 }
  0x8b   : > { %1732 = vmatprep.mubr.bf16.mxu1 %v4851_v15 }
  0x8d   : > { %1299 = vmatmul.mubr.bf16.gmra.mrb[48].mxu0 %v4882_v42 }
  0x8e   : > { %1306 = vmatprep.mubr.bf16.mxu0 %v4672_v1 }
  0x92   : > { %1733 = vmatmul.mubr.bf16.gmra.mrb[48].mxu1 %v4984_v23 }
  0x93   : > { %1740 = vmatprep.mubr.bf16.mxu1 %v4502_v3 }
  0x95   : > { %1307 = vmatmul.mubr.bf16.gmra.mrb[52].mxu0 %v4894_v14 }
  0x96   : > { %1314 = vmatprep.mubr.bf16.mxu0 %v4719_v35 }
  0x9a   : > { %1741 = vmatmul.mubr.bf16.gmra.mrb[52].mxu1 %v4828_v48 }
  0x9b   : > { %1748 = vmatprep.mubr.bf16.mxu1 %v4508_v12 }
  0x9d   : > { %1315 = vmatmul.mubr.bf16.gmra.mrb[56].mxu0 %v4900_v18 }
  0x9e   : > { %1322 = vmatprep.mubr.bf16.mxu0 %v4743_v30 }
  0xa2   : > { %1749 = vmatmul.mubr.bf16.gmra.mrb[56].mxu1 %v4837_v2 }
  0xa3   : > { %1756 = vmatprep.mubr.bf16.mxu1 %v4574_v61 }
  0xa5   : > { %1323 = vmatmul.mubr.bf16.gmra.mrb[60].mxu0 %v4919_v9 }
  0xa6   : > { %3854 = vmatprep.mubr.bf16.mxu0 %v4932_v58 }
  0xaa   : > { %1757 = vmatmul.mubr.bf16.gmra.mrb[60].mxu1 %v4861_v45 }
  0xab   : > { %1764 = vmatprep.mubr.bf16.mxu1 %v4589_v27 }
  0xad   : > { %3855 = vmatmul.mubr.bf16.vlgmr.msra.gmra.mrb[64].mxu0 %v4923_v40 }
  0xae   : > { %3703 = vmatpush3.bf16.msra.mxu0 %v4231_v38  ;;  %3858 = vmatprep.mubr.bf16.mxu0 %v4940_v22  ;;  %v854_v38 = vrot.slane %v5543_v29, 1 }
  0xaf   : > { %3704 = vmatprep.subr.bf16.mxu0 %v4232_v19  ;;  %v4246_v19 = vld [vmem:[%s5512_s3 + $0x1b8] sm:$0xff]  }
  0xb2   : > { %1765 = vmatmul.mubr.bf16.gmra.mrb[64].mxu1 %v4878_v54  ;;  %3705 = vmatpush3.bf16.msra.mxu0 %v4233_v32  ;;  %v5096_v32 = vsel %vm4525_vm5, %v854_v38, 0 }
  0xb3   : > { %1772 = vmatprep.mubr.bf16.mxu1 %v4641_v21  ;;  %3706 = vmatprep.subr.bf16.mxu0 %v4234_v8  ;;  %v4248_v8 = vld [vmem:[%s5512_s3 + $0x208] sm:$0xff]  }
  0xb5   : > { %3859 = vmatmul.mubr.bf16.gmra.mrb[68].mxu0 %v4951_v28 }
  0xb6   : > { %3707 = vmatpush3.bf16.msra.mxu0 %v4235_v50  ;;  %3862 = vmatprep.mubr.bf16.mxu0 %v4955_v24 }
  0xb7   : > { %3708 = vmatprep.subr.bf16.mxu0 %v4236_v52 }
  0xba   : > { %1773 = vmatmul.mubr.bf16.gmra.mrb[68].mxu1 %v4882_v42  ;;  %3709 = vmatpush3.bf16.msra.mxu0 %v4237_v31 }
  0xbb   : > { %1780 = vmatprep.mubr.bf16.mxu1 %v4672_v1  ;;  %3710 = vmatprep.subr.bf16.mxu0 %v4239_v44 }
  0xbd   : > { %3863 = vmatmul.mubr.bf16.gmra.mrb[72].mxu0 %v4960_v4 }
  0xbe   : > { %3711 = vmatpush3.bf16.msra.mxu0 %v4240_v25  ;;  %3866 = vmatprep.mubr.bf16.mxu0 %v4969_v62 }
  0xbf   : > { %3712 = vmatprep.subr.bf16.mxu0 %v4241_v43 }
  0xc2   : > { %1781 = vmatmul.mubr.bf16.gmra.mrb[72].mxu1 %v4894_v14  ;;  %3713 = vmatpush3.bf16.msra.mxu0 %v4242_v17 }
  0xc3   : > { %1788 = vmatprep.mubr.bf16.mxu1 %v4719_v35  ;;  %3714 = vmatprep.subr.bf16.mxu0 %v4243_v5 }
  0xc5   : > { %3867 = vmatmul.mubr.bf16.gmra.mrb[76].mxu0 %v4973_v7 }
  0xc6   : > { %3715 = vmatpush3.bf16.msra.mxu0 %v4244_v59  ;;  %2183 = vmatprep.mubr.bf16.mxu0 %v4536_v39  ;;  %v4250_v39 = vld [vmem:[%s5512_s3 + $0x218] sm:$0xff]  }
  0xc7   : > { %3716 = vmatprep.subr.bf16.mxu0 %v4245_v11 }
  0xca   : > { %1789 = vmatmul.mubr.bf16.gmra.mrb[76].mxu1 %v4900_v18  ;;  %3717 = vmatpush3.bf16.msra.mxu0 %v4246_v19 }
  0xcb   : > { %3902 = vmatprep.mubr.bf16.mxu1 %v5096_v32 }
  0xcd   : > { %2184 = vmatmul.mubr.bf16.vlgmr.msra.gmra.mrb[80].mxu0 %v4600_v36  ;;  %v4251_v36 = vld [vmem:[%s5512_s3 + $0x220] sm:$0xff]  }
  0xce   : > { %2191 = vmatprep.mubr.bf16.mxu0 %v4628_v0  ;;  %v4252_v0 = vld [vmem:[%s5512_s3 + $0x228] sm:$0xff]  }
  0xd2   : > { %3903 = vmatmul.mubr.bf16.vlgmr.msra.gmra.mrb[80].mxu1 %v4932_v58 }
  0xd3   : > { %3935 = vmatpush3.bf16.msra.mxu1 %v4999_v41  ;;  %3906 = vmatprep.mubr.bf16.mxu1 %v4923_v40 }
  0xd4   : > { %3936 = vmatprep.subr.bf16.mxu1 %v4248_v8 }
  0xd5   : > { %2192 = vmatmul.mubr.bf16.gmra.mrb[84].mxu0 %v4685_v6  ;;  %v4253_v6 = vld [vmem:[%s5512_s3 + $0x230] sm:$0xff]  }
  0xd6   : > { %2199 = vmatprep.mubr.bf16.mxu0 %v4694_v13  ;;  %v4254_v13 = vld [vmem:[%s5512_s3 + $0x238] sm:$0xff]  }
  0xd7   : > { %3937 = vmatpush3.bf16.msra.mxu1 %v4248_v8 }
  0xd8   : > { %3938 = vmatprep.subr.bf16.mxu1 %v4249_v33 }
  0xda   : > { %3907 = vmatmul.mubr.bf16.gmra.mrb[84].mxu1 %v4940_v22 }
  0xdb   : > { %3910 = vmatprep.mubr.bf16.mxu1 %v4951_v28  ;;  %3939 = vmatpush3.bf16.msra.mxu1 %v4249_v33 }
  0xdc   : > { %3940 = vmatprep.subr.bf16.mxu1 %v4250_v39 }
  0xdd   : > { %2200 = vmatmul.mubr.bf16.gmra.mrb[88].mxu0 %v4753_v47 }
  0xde   : > { %2207 = vmatprep.mubr.bf16.mxu0 %v4774_v26 }
  0xdf   : > { %3941 = vmatpush3.bf16.msra.mxu1 %v4250_v39 }
  0xe0   : > { %3942 = vmatprep.subr.bf16.mxu1 %v4251_v36 }
  0xe2   : > { %3911 = vmatmul.mubr.bf16.gmra.mrb[88].mxu1 %v4955_v24 }
  0xe3   : > { %3914 = vmatprep.mubr.bf16.mxu1 %v4960_v4  ;;  %3943 = vmatpush3.bf16.msra.mxu1 %v4251_v36 }
  0xe4   : > { %3944 = vmatprep.subr.bf16.mxu1 %v4252_v0 }
  0xe5   : > { %2208 = vmatmul.mubr.bf16.gmra.mrb[92].mxu0 %v4822_v20 }
  0xe6   : > { %2215 = vmatprep.mubr.bf16.mxu0 %v4799_v60 }
  0xe7   : > { %3945 = vmatpush3.bf16.msra.mxu1 %v4252_v0 }
  0xe8   : > { %3946 = vmatprep.subr.bf16.mxu1 %v4253_v6 }
  0xea   : > { %3915 = vmatmul.mubr.bf16.gmra.mrb[92].mxu1 %v4969_v62 }
  0xeb   : > { %3918 = vmatprep.mubr.bf16.mxu1 %v4973_v7  ;;  %3947 = vmatpush3.bf16.msra.mxu1 %v4253_v6 }
  0xec   : > { %3948 = vmatprep.subr.bf16.mxu1 %v4254_v13 }
  0xed   : > { %2216 = vmatmul.mubr.bf16.gmra.mrb[96].mxu0 %v4870_v34 }
  0xee   : > { %2223 = vmatprep.mubr.bf16.mxu0 %v4815_v16 }
  0xef   : > { %3949 = vmatpush3.bf16.msra.mxu1 %v4254_v13 }
  0xf2   : > { %3919 = vmatmul.mubr.bf16.gmra.mrb[0].mxu1 %v4553_v49 }
  0xf3   : > { %3922 = vmatprep.mubr.bf16.mxu1 %v4565_v56 }
  0xf5   : > { %2224 = vmatmul.mubr.bf16.gmra.mrb[100].mxu0 %v4947_v46 }
  0xf6   : > { %2231 = vmatprep.mubr.bf16.mxu0 %v4851_v15 }
  0xfa   : > { %3923 = vmatmul.mubr.bf16.gmra.mrb[4].mxu1 %v4626_v63 }
  0xfb   : > { %v3446_v47 = vpop.f32.mrb[0].mxu0  ;;  %3926 = vmatprep.mubr.bf16.mxu1 %v4650_v37 }
  0xfc   : > { %v3447_v26 = vpop.f32.mrb[1].mxu0 }
  0xfd   : > { %v5146_v60 = vadd.f32 %v3447_v26, %v3446_v47  ;;  %v3449_v20 = vpop.f32.mrb[2].mxu0  ;;  %2232 = vmatmul.mubr.bf16.gmra.mrb[104].mxu0 %v4984_v23 }
  0xfe   : > { %v3450_v34 = vpop.f32.mrb[3].mxu0  ;;  %2239 = vmatprep.mubr.bf16.mxu0 %v4502_v3 }
  0xff   : > { %v5149_v16 = vadd.f32 %v3450_v34, %v3449_v20 }
 0x102   : > { %3927 = vmatmul.mubr.bf16.gmra.mrb[8].mxu1 %v4701_v55 }
 0x103   : > { %v3452_v58 = vpop.f32.mrb[4].mxu0  ;;  %3930 = vmatprep.mubr.bf16.mxu1 %v4730_v57 }
 0x104   : > { %v3453_v15 = vpop.f32.mrb[5].mxu0 }
 0x105   : > { %v5154_v46 = vadd.f32 %v3453_v15, %v3452_v58  ;;  %v3455_v41 = vpop.f32.mrb[6].mxu0  ;;  %2240 = vmatmul.mubr.bf16.gmra.mrb[108].mxu0 %v4828_v48 }
 0x106   : > { %v3456_v50 = vpop.f32.mrb[7].mxu0  ;;  %2247 = vmatprep.mubr.bf16.mxu0 %v4508_v12 }
 0x107   : > { %v5157_v52 = vadd.f32 %v3456_v50, %v3455_v41 }
 0x10a   : > { %3931 = vmatmul.mubr.bf16.gmra.mrb[12].mxu1 %v4780_v53 }
 0x10b   : > { %3950 = vmatprep.mubr.bf16.mxu1 %v4923_v40 }
 0x10d   : > { %v3458_v3 = vpop.f32.mrb[8].mxu0  ;;  %2248 = vmatmul.mubr.bf16.gmra.mrb[112].mxu0 %v4837_v2 }
 0x10e   : > { %v3459_v23 = vpop.f32.mrb[9].mxu0  ;;  %2255 = vmatprep.mubr.bf16.mxu0 %v4574_v61 }
 0x10f   : > { %v5163_v31 = vadd.f32 %v3459_v23, %v3458_v3  ;;  %v3461_v44 = vpop.f32.mrb[10].mxu0 }
 0x110   : > { %v3462_v25 = vpop.f32.mrb[11].mxu0 }
 0x111   : > { %v5166_v43 = vadd.f32 %v3462_v25, %v3461_v44 }
 0x112   : > { %3951 = vmatmul.mubr.bf16.vlgmr.msra.gmra.mrb[80].mxu1 %v4940_v22 }
 0x113   : > { %3954 = vmatprep.mubr.bf16.mxu1 %v4951_v28 }
 0x115   : > { %2256 = vmatmul.mubr.bf16.gmra.mrb[116].mxu0 %v4861_v45  ;;  %v3464_v12 = vpop.f32.mrb[12].mxu0 }
 0x116   : > { %v3465_v48 = vpop.f32.mrb[13].mxu0  ;;  %2263 = vmatprep.mubr.bf16.mxu0 %v4589_v27 }
 0x117   : > { %v5172_v2 = vadd.f32 %v3465_v48, %v3464_v12  ;;  %v3467_v40 = vpop.f32.mrb[14].mxu0 }
 0x118   : > { %v3468_v17 = vpop.f32.mrb[15].mxu0 }
 0x119   : > { %v5175_v61 = vadd.f32 %v3468_v17, %v3467_v40 }
 0x11a   : > { %3955 = vmatmul.mubr.bf16.gmra.mrb[84].mxu1 %v4955_v24 }
 0x11b   : > { %3958 = vmatprep.mubr.bf16.mxu1 %v4960_v4 }
 0x11d   : > { %2264 = vmatmul.mubr.bf16.gmra.mrb[120].mxu0 %v4878_v54 }
 0x11e   : > { %2271 = vmatprep.mubr.bf16.mxu0 %v4641_v21 }
 0x120   : > { %v3470_v22 = vpop.f32.mrb[16].mxu0 }
 0x121   : > { %v3471_v45 = vpop.f32.mrb[17].mxu0 }
 0x122   : > { %3959 = vmatmul.mubr.bf16.gmra.mrb[88].mxu1 %v4969_v62  ;;  %v5181_v28 = vadd.f32 %v3471_v45, %v3470_v22  ;;  %v3473_v27 = vpop.f32.mrb[18].mxu0 }
 0x123   : > { %3962 = vmatprep.mubr.bf16.mxu1 %v4973_v7  ;;  %v3474_v5 = vpop.f32.mrb[19].mxu0 }
 0x124   : > { %v5184_v24 = vadd.f32 %v3474_v5, %v3473_v27 }
 0x125   : > { %v3582_v59 = vpop.f32.mrb[16].mxu1  ;;  %2272 = vmatmul.mubr.bf16.gmra.mrb[124].mxu0 %v4882_v42 }
 0x126   : > { %v3583_v11 = vpop.f32.mrb[17].mxu1  ;;  %2279 = vmatprep.mubr.bf16.mxu0 %v4672_v1 }
 0x127   : > { %v5187_v4 = vadd.f32 %v3583_v11, %v3582_v59  ;;  %v3585_v54 = vpop.f32.mrb[18].mxu1 }
 0x128   : > { %v3586_v21 = vpop.f32.mrb[19].mxu1  ;;  %v3476_v38 = vpop.f32.mrb[20].mxu0 }
 0x129   : > { %v5190_v62 = vadd.f32 %v3586_v21, %v3585_v54  ;;  %v3477_v19 = vpop.f32.mrb[21].mxu0 }
 0x12a   : > { %3963 = vmatmul.mubr.bf16.gmra.mrb[92].mxu1 %v4553_v49  ;;  %v5193_v7 = vadd.f32 %v3477_v19, %v3476_v38  ;;  %v3479_v8 = vpop.f32.mrb[22].mxu0 }
 0x12b   : > { %3966 = vmatprep.mubr.bf16.mxu1 %v4565_v56  ;;  %v3480_v33 = vpop.f32.mrb[23].mxu0 }
 0x12c   : > { %v5196_v42 = vadd.f32 %v3480_v33, %v3479_v8 }
 0x12d   : > { %v3588_v39 = vpop.f32.mrb[20].mxu1  ;;  %2280 = vmatmul.mubr.bf16.gmra.mrb[128].mxu0 %v4894_v14 }
 0x12e   : > { %v3589_v36 = vpop.f32.mrb[21].mxu1  ;;  %2287 = vmatprep.mubr.bf16.mxu0 %v4719_v35 }
 0x12f   : > { %v5199_v1 = vadd.f32 %v3589_v36, %v3588_v39  ;;  %v3591_v0 = vpop.f32.mrb[22].mxu1 }
 0x130   : > { %v3592_v6 = vpop.f32.mrb[23].mxu1  ;;  %v3482_v13 = vpop.f32.mrb[24].mxu0 }
 0x131   : > { %v5202_v49 = vadd.f32 %v3592_v6, %v3591_v0  ;;  %v3483_v47 = vpop.f32.mrb[25].mxu0 }
 0x132   : > { %3967 = vmatmul.mubr.bf16.gmra.mrb[0].mxu1 %v4626_v63  ;;  %v5205_v56 = vadd.f32 %v3483_v47, %v3482_v13  ;;  %v3485_v26 = vpop.f32.mrb[26].mxu0 }
 0x133   : > { %3970 = vmatprep.mubr.bf16.mxu1 %v4650_v37  ;;  %v3486_v20 = vpop.f32.mrb[27].mxu0 }
 0x134   : > { %v5208_v14 = vadd.f32 %v3486_v20, %v3485_v26 }
 0x135   : > { %v3594_v34 = vpop.f32.mrb[24].mxu1  ;;  %2288 = vmatmul.mubr.bf16.gmra.mrb[132].mxu0 %v4900_v18 }
 0x136   : > { %v3595_v58 = vpop.f32.mrb[25].mxu1  ;;  %2295 = vmatprep.mubr.bf16.mxu0 %v4743_v30 }
 0x137   : > { %v5211_v35 = vadd.f32 %v3595_v58, %v3594_v34  ;;  %v3597_v15 = vpop.f32.mrb[26].mxu1 }
 0x138   : > { %v3598_v41 = vpop.f32.mrb[27].mxu1  ;;  %v3488_v50 = vpop.f32.mrb[28].mxu0 }
 0x139   : > { %v5214_v63 = vadd.f32 %v3598_v41, %v3597_v15  ;;  %v3489_v3 = vpop.f32.mrb[29].mxu0 }
 0x13a   : > { %3971 = vmatmul.mubr.bf16.gmra.mrb[4].mxu1 %v4701_v55  ;;  %v5217_v37 = vadd.f32 %v3489_v3, %v3488_v50  ;;  %v3491_v23 = vpop.f32.mrb[30].mxu0 }
 0x13b   : > { %3974 = vmatprep.mubr.bf16.mxu1 %v4730_v57  ;;  %v3492_v44 = vpop.f32.mrb[31].mxu0 }
 0x13c   : > { %v5220_v18 = vadd.f32 %v3492_v44, %v3491_v23 }
 0x13d   : > { %v3600_v25 = vpop.f32.mrb[28].mxu1  ;;  %2296 = vmatmul.mubr.bf16.gmra.mrb[136].mxu0 %v4919_v9 }
 0x13e   : > { %v3601_v12 = vpop.f32.mrb[29].mxu1  ;;  %2303 = vmatprep.mubr.bf16.mxu0 %v5543_v29 }
 0x13f   : > { %v5223_v30 = vadd.f32 %v3601_v12, %v3600_v25  ;;  %v3603_v48 = vpop.f32.mrb[30].mxu1 }
 0x140   : > { %v3604_v40 = vpop.f32.mrb[31].mxu1  ;;  %v3494_v17 = vpop.f32.mrb[32].mxu0 }
 0x141   : > { %v5226_v55 = vadd.f32 %v3604_v40, %v3603_v48  ;;  %v3495_v22 = vpop.f32.mrb[33].mxu0 }
 0x142   : > { %3975 = vmatmul.mubr.bf16.gmra.mrb[8].mxu1 %v4780_v53  ;;  %v3496_v57 = vadd.f32 %v3495_v22, %v3494_v17  ;;  %v3497_v45 = vpop.f32.mrb[34].mxu0 }
 0x143   : > { %3978 = vmatprep.mubr.bf16.mxu1 %v4795_v10  ;;  %v3498_v27 = vpop.f32.mrb[35].mxu0 }
 0x144   : > { %v3499_v59 = vadd.f32 %v3498_v27, %v3497_v45 }
 0x145   : > { %v3606_v5 = vpop.f32.mrb[32].mxu1  ;;  %2304 = vmatmul.mubr.bf16.gmra.mrb[140].mxu0 %v4492_v51 }
 0x146   : > { %v3607_v9 = vpop.f32.mrb[33].mxu1 }
 0x147   : > { %v5231_v11 = vadd.f32 %v3607_v9, %v3606_v5  ;;  %v3609_v29 = vpop.f32.mrb[34].mxu1 }
 0x148   : > { %v3610_v54 = vpop.f32.mrb[35].mxu1  ;;  %v3500_v38 = vpop.f32.mrb[36].mxu0 }
 0x149   : > { %v5233_v21 = vadd.f32 %v3610_v54, %v3609_v29  ;;  %v3501_v53 = vpop.f32.mrb[37].mxu0 }
 0x14a   : > { %3979 = vmatmul.mubr.bf16.gmra.mrb[12].mxu1 %v5096_v32  ;;  %v3502_v19 = vadd.f32 %v3501_v53, %v3500_v38  ;;  %v3503_v8 = vpop.f32.mrb[38].mxu0 }
 0x14b   : > { %v3504_v33 = vpop.f32.mrb[39].mxu0 }
 0x14c   : > { %v3505_v39 = vadd.f32 %v3504_v33, %v3503_v8 }
 0x14d   : > { %v3612_v10 = vpop.f32.mrb[36].mxu1 }
 0x14e   : > { %v3613_v36 = vpop.f32.mrb[37].mxu1 }
 0x14f   : > { %v5236_v0 = vadd.f32 %v3613_v36, %v3612_v10  ;;  %v3615_v6 = vpop.f32.mrb[38].mxu1 }
 0x150   : > { %v3616_v51 = vpop.f32.mrb[39].mxu1  ;;  %v3506_v47 = vpop.f32.mrb[40].mxu0 }
 0x151   : > { %v5238_v13 = vadd.f32 %v3616_v51, %v3615_v6  ;;  %v3507_v26 = vpop.f32.mrb[41].mxu0 }
 0x152   : > { %v3508_v20 = vadd.f32 %v3507_v26, %v3506_v47  ;;  %v3509_v34 = vpop.f32.mrb[42].mxu0 }
 0x153   : > { %v3510_v58 = vpop.f32.mrb[43].mxu0 }
 0x154   : > { %v3511_v32 = vadd.f32 %v3510_v58, %v3509_v34 }
 0x155   : > { %v3618_v15 = vpop.f32.mrb[40].mxu1 }
 0x156   : > { %v3619_v41 = vpop.f32.mrb[41].mxu1 }
 0x157   : > { %v5240_v50 = vadd.f32 %v3619_v41, %v3618_v15  ;;  %v3621_v3 = vpop.f32.mrb[42].mxu1 }
 0x158   : > { %v3622_v23 = vpop.f32.mrb[43].mxu1  ;;  %v3512_v25 = vpop.f32.mrb[44].mxu0 }
 0x159   : > { %v5242_v44 = vadd.f32 %v3622_v23, %v3621_v3  ;;  %v3513_v12 = vpop.f32.mrb[45].mxu0 }
 0x15a   : > { %v5244_v48 = vadd.f32 %v3513_v12, %v3512_v25  ;;  %v3515_v40 = vpop.f32.mrb[46].mxu0 }
 0x15b   : > { %v3516_v17 = vpop.f32.mrb[47].mxu0 }
 0x15c   : > { %v5246_v45 = vadd.f32 %v3516_v17, %v3515_v40 }
 0x15d   : > { %v3624_v22 = vpop.f32.mrb[44].mxu1 }
 0x15e   : > { %v3625_v27 = vpop.f32.mrb[45].mxu1 }
 0x15f   : > { %v5248_v5 = vadd.f32 %v3625_v27, %v3624_v22  ;;  %v3627_v9 = vpop.f32.mrb[46].mxu1 }
 0x160   : > { %v3628_v29 = vpop.f32.mrb[47].mxu1  ;;  %v3518_v38 = vpop.f32.mrb[48].mxu0 }
 0x161   : > { %v5250_v54 = vadd.f32 %v3628_v29, %v3627_v9  ;;  %v3519_v53 = vpop.f32.mrb[49].mxu0 }
 0x162   : > { %v5252_v8 = vadd.f32 %v3519_v53, %v3518_v38  ;;  %v3521_v33 = vpop.f32.mrb[50].mxu0 }
 0x163   : > { %v3522_v10 = vpop.f32.mrb[51].mxu0 }
 0x164   : > { %v5254_v6 = vadd.f32 %v3522_v10, %v3521_v33 }
 0x165   : > { %v3630_v36 = vpop.f32.mrb[48].mxu1 }
 0x166   : > { %v3631_v51 = vpop.f32.mrb[49].mxu1 }
 0x167   : > { %v3632_v47 = vadd.f32 %v3631_v51, %v3630_v36  ;;  %v3633_v26 = vpop.f32.mrb[50].mxu1 }
 0x168   : > { %v3634_v34 = vpop.f32.mrb[51].mxu1  ;;  %v3524_v41 = vpop.f32.mrb[52].mxu0 }
 0x169   : > { %v5256_v58 = vadd.f32 %v3632_v47, %v3496_v57  ;;  %v3635_v15 = vadd.f32 %v3634_v34, %v3633_v26  ;;  %v3525_v3 = vpop.f32.mrb[53].mxu0 }
 0x16a   : > { %v5260_v25 = vadd.f32 %v3525_v3, %v3524_v41  ;;  %v3527_v12 = vpop.f32.mrb[54].mxu0 }
 0x16b   : > { %v5258_v23 = vadd.f32 %v3635_v15, %v3499_v59  ;;  %v3528_v40 = vpop.f32.mrb[55].mxu0 }
 0x16c   : > { %v5262_v22 = vadd.f32 %v3528_v40, %v3527_v12 }
 0x16d   : > { %v3636_v17 = vpop.f32.mrb[52].mxu1 }
 0x16e   : > { %v3637_v27 = vpop.f32.mrb[53].mxu1 }
 0x16f   : > { %v3638_v9 = vadd.f32 %v3637_v27, %v3636_v17  ;;  %v3639_v29 = vpop.f32.mrb[54].mxu1 }
 0x170   : > { %v3640_v38 = vpop.f32.mrb[55].mxu1  ;;  %v3530_v33 = vpop.f32.mrb[56].mxu0 }
 0x171   : > { %v5264_v53 = vadd.f32 %v3638_v9, %v3502_v19  ;;  %v3641_v57 = vadd.f32 %v3640_v38, %v3639_v29  ;;  %v3531_v10 = vpop.f32.mrb[57].mxu0 }
 0x172   : > { %v5268_v59 = vadd.f32 %v3531_v10, %v3530_v33  ;;  %v3533_v51 = vpop.f32.mrb[58].mxu0 }
 0x173   : > { %v5266_v36 = vadd.f32 %v3641_v57, %v3505_v39  ;;  %v3534_v47 = vpop.f32.mrb[59].mxu0 }
 0x174   : > { %v5270_v34 = vadd.f32 %v3534_v47, %v3533_v51 }
 0x175   : > { %v3642_v26 = vpop.f32.mrb[56].mxu1 }
 0x176   : > { %v3643_v15 = vpop.f32.mrb[57].mxu1 }
 0x177   : > { %v3644_v41 = vadd.f32 %v3643_v15, %v3642_v26  ;;  %v3645_v3 = vpop.f32.mrb[58].mxu1 }
 0x178   : > { %v3646_v12 = vpop.f32.mrb[59].mxu1  ;;  %v3536_v17 = vpop.f32.mrb[60].mxu0 }
 0x179   : > { %v5272_v40 = vadd.f32 %v3644_v41, %v3508_v20  ;;  %v3647_v19 = vadd.f32 %v3646_v12, %v3645_v3  ;;  %v3537_v27 = vpop.f32.mrb[61].mxu0 }
 0x17a   : > { %v5276_v39 = vadd.f32 %v3537_v27, %v3536_v17  ;;  %v3539_v29 = vpop.f32.mrb[62].mxu0 }
 0x17b   : > { %v5274_v9 = vadd.f32 %v3647_v19, %v3511_v32  ;;  %v3540_v38 = vpop.f32.mrb[63].mxu0 }
 0x17c   : > { %v5278_v33 = vadd.f32 %v3540_v38, %v3539_v29 }
 0x17d   : > { %v3648_v57 = vpop.f32.mrb[60].mxu1 }
 0x17e   : > { %v3649_v10 = vpop.f32.mrb[61].mxu1 }
 0x17f   : > { %v3650_v51 = vadd.f32 %v3649_v10, %v3648_v57  ;;  %v3651_v47 = vpop.f32.mrb[62].mxu1 }
 0x180   : > { %v3652_v26 = vpop.f32.mrb[63].mxu1  ;;  %v3856_v41 = vpop.f32.mrb[64].mxu0 }
 0x181   : > { %v5281_v15 = vadd.f32 %v3650_v51, %v5244_v48  ;;  %v3653_v20 = vadd.f32 %v3652_v26, %v3651_v47  ;;  %v1374_v3 = vadd.f32 %v3856_v41, %v5154_v46  ;;  %v1365_v32 = vpop.f32.mrb[65].mxu0 }
 0x182   : > { %v1366_v19 = vadd.f32 %v5146_v60, %v1365_v32  ;;  %v3857_v17 = vpop.f32.mrb[66].mxu0 }
 0x183   : > { %v5285_v12 = vadd.f32 %v3653_v20, %v5246_v45  ;;  %v5289_v27 = vadd.f32 %v5199_v1, %v1374_v3  ;;  %v1377_v29 = vadd.f32 %v3857_v17, %v5157_v52  ;;  %v1368_v38 = vpop.f32.mrb[67].mxu0 }
 0x184   : > { %v5293_v48 = vadd.f32 %v5187_v4, %v1366_v19  ;;  %v1369_v10 = vadd.f32 %v5149_v16, %v1368_v38 }
 0x185   : > { %v3654_v57 = vpop.f32.mrb[64].mxu1  ;;  %v5297_v51 = vadd.f32 %v5202_v49, %v1377_v29 }
 0x186   : > { %v3655_v46 = vpop.f32.mrb[65].mxu1  ;;  %v5300_v60 = vadd.f32 %v5190_v62, %v1369_v10 }
 0x187   : > { %v3656_v45 = vadd.f32 %v3655_v46, %v3654_v57  ;;  %v3657_v47 = vpop.f32.mrb[66].mxu1 }
 0x188   : > { %v3658_v1 = vpop.f32.mrb[67].mxu1  ;;  %v3860_v20 = vpop.f32.mrb[68].mxu0 }
 0x189   : > { %v5303_v26 = vadd.f32 %v3656_v45, %v5252_v8  ;;  %v3659_v52 = vadd.f32 %v3658_v1, %v3657_v47  ;;  %v1390_v4 = vadd.f32 %v3860_v20, %v5172_v2  ;;  %v1381_v41 = vpop.f32.mrb[69].mxu0 }
 0x18a   : > { %v1382_v49 = vadd.f32 %v5163_v31, %v1381_v41  ;;  %v3861_v3 = vpop.f32.mrb[70].mxu0 }
 0x18b   : > { %v5307_v16 = vadd.f32 %v3659_v52, %v5254_v6  ;;  %v5311_v32 = vadd.f32 %v5223_v30, %v1390_v4  ;;  %v1393_v62 = vadd.f32 %v3861_v3, %v5175_v61  ;;  %v1384_v19 = vpop.f32.mrb[71].mxu0 }
 0x18c   : > { %v5315_v8 = vadd.f32 %v5211_v35, %v1382_v49  ;;  %v1385_v29 = vadd.f32 %v5166_v43, %v1384_v19 }
 0x18d   : > { %v3660_v17 = vpop.f32.mrb[68].mxu1  ;;  %v5319_v38 = vadd.f32 %v5226_v55, %v1393_v62 }
 0x18e   : > { %v3661_v2 = vpop.f32.mrb[69].mxu1  ;;  %v5322_v31 = vadd.f32 %v5214_v63, %v1385_v29 }
 0x18f   : > { %v3662_v6 = vadd.f32 %v3661_v2, %v3660_v17  ;;  %v3663_v57 = vpop.f32.mrb[70].mxu1 }
 0x190   : > { %v3664_v30 = vpop.f32.mrb[71].mxu1  ;;  %v3864_v46 = vpop.f32.mrb[72].mxu0 }
 0x191   : > { %v5325_v10 = vadd.f32 %v3662_v6, %v5260_v25  ;;  %v3665_v61 = vadd.f32 %v3664_v30, %v3663_v57  ;;  %v1406_v35 = vadd.f32 %v3864_v46, %v5193_v7  ;;  %v1397_v45 = vpop.f32.mrb[73].mxu0 }
 0x192   : > { %v1398_v55 = vadd.f32 %v5181_v28, %v1397_v45  ;;  %v3865_v47 = vpop.f32.mrb[74].mxu0 }
 0x193   : > { %v5329_v43 = vadd.f32 %v3665_v61, %v5262_v22  ;;  %v5333_v1 = vadd.f32 %v5236_v0, %v1406_v35  ;;  %v1409_v63 = vadd.f32 %v3865_v47, %v5196_v42  ;;  %v1400_v52 = vpop.f32.mrb[75].mxu0 }
 0x194   : > { %v5337_v25 = vadd.f32 %v5231_v11, %v1398_v55  ;;  %v1401_v4 = vadd.f32 %v5184_v24, %v1400_v52 }
 0x195   : > { %v3666_v20 = vpop.f32.mrb[72].mxu1  ;;  %v5341_v41 = vadd.f32 %v5238_v13, %v1409_v63 }
 0x196   : > { %v3667_v7 = vpop.f32.mrb[73].mxu1  ;;  %v5344_v28 = vadd.f32 %v5233_v21, %v1401_v4 }
 0x197   : > { %v3668_v22 = vadd.f32 %v3667_v7, %v3666_v20  ;;  %v3669_v49 = vpop.f32.mrb[74].mxu1 }
 0x198   : > { %v3670_v0 = vpop.f32.mrb[75].mxu1  ;;  %v3868_v62 = vpop.f32.mrb[76].mxu0 }
 0x199   : > { %v5347_v3 = vadd.f32 %v3668_v22, %v5268_v59  ;;  %v3671_v42 = vadd.f32 %v3670_v0, %v3669_v49  ;;  %v1422_v11 = vadd.f32 %v3868_v62, %v5217_v37  ;;  %v1413_v19 = vpop.f32.mrb[77].mxu0 }
 0x19a   : > { %v1414_v13 = vadd.f32 %v5205_v56, %v1413_v19  ;;  %v3869_v17 = vpop.f32.mrb[78].mxu0 }
 0x19b   : > { %v5351_v24 = vadd.f32 %v3671_v42, %v5270_v34  ;;  %v5355_v29 = vadd.f32 %v5248_v5, %v1422_v11  ;;  %v1425_v21 = vadd.f32 %v3869_v17, %v5220_v18  ;;  %v1416_v2 = vpop.f32.mrb[79].mxu0 }
 0x19c   : > { %v5359_v59 = vadd.f32 %v5240_v50, %v1414_v13  ;;  %v1417_v57 = vadd.f32 %v5208_v14, %v1416_v2 }
 0x19d   : > { %v3672_v6 = vpop.f32.mrb[76].mxu1  ;;  %v5363_v30 = vadd.f32 %v5250_v54, %v1425_v21 }
 0x19e   : > { %v3673_v37 = vpop.f32.mrb[77].mxu1  ;;  %v1722_v56 = vadd.f32 %v5242_v44, %v1417_v57 }
 0x19f   : > { %v3674_v34 = vadd.f32 %v3673_v37, %v3672_v6  ;;  %v3675_v61 = vpop.f32.mrb[78].mxu1 }
 0x1a0   : > { %v3676_v46 = vpop.f32.mrb[79].mxu1  ;;  %v3718_v35 = vpop.f32.mrb[80].mxu0 }
 0x1a1   : > { %v5367_v5 = vadd.f32 %v3674_v34, %v5276_v39  ;;  %v3677_v18 = vadd.f32 %v3676_v46, %v3675_v61  ;;  %v3719_v45 = vpop.f32.mrb[81].mxu0 }
 0x1a2   : > { %v3720_v55 = vadd.f32 %v3719_v45, %v3718_v35  ;;  %v3721_v14 = vpop.f32.mrb[82].mxu0 }
 0x1a3   : > { %v5370_v50 = vadd.f32 %v3677_v18, %v5278_v33  ;;  %v3722_v47 = vpop.f32.mrb[83].mxu0 }
 0x1a4   : > { %v3723_v63 = vadd.f32 %v3722_v47, %v3721_v14  ;;  %v5373_v54 = vadd.f32 %v3720_v55, %v5293_v48 }
 0x1a6   : > { %v5376_v52 = vadd.f32 %v3723_v63, %v5300_v60 }
 0x1a8   : > { %v3724_v44 = vpop.f32.mrb[84].mxu0 }
 0x1a9   : > { %v3725_v20 = vpop.f32.mrb[85].mxu0 }
 0x1aa   : > { %v3726_v39 = vadd.f32 %v3725_v20, %v3724_v44  ;;  %v3727_v4 = vpop.f32.mrb[86].mxu0 }
 0x1ab   : > { %v3728_v7 = vpop.f32.mrb[87].mxu0 }
 0x1ac   : > { %v3729_v22 = vadd.f32 %v3728_v7, %v3727_v4  ;;  %v4000_v49 = vadd.f32 %v3726_v39, %v5289_v27 }
 0x1ae   : > { %v4008_v33 = vadd.f32 %v3729_v22, %v5297_v51 }
 0x1b0   : > { %v3730_v0 = vpop.f32.mrb[88].mxu0 }
 0x1b1   : > { %v3731_v42 = vpop.f32.mrb[89].mxu0 }
 0x1b2   : > { %v3732_v62 = vadd.f32 %v3731_v42, %v3730_v0  ;;  %v3733_v11 = vpop.f32.mrb[90].mxu0 }
 0x1b3   : > { %v3734_v19 = vpop.f32.mrb[91].mxu0 }
 0x1b4   : > { %v3735_v48 = vadd.f32 %v3734_v19, %v3733_v11  ;;  %v5381_v13 = vadd.f32 %v3732_v62, %v5315_v8 }
 0x1b6   : > { %v5384_v60 = vadd.f32 %v3735_v48, %v5322_v31 }
 0x1b8   : > { %v3736_v17 = vpop.f32.mrb[92].mxu0 }
 0x1b9   : > { %v3737_v21 = vpop.f32.mrb[93].mxu0 }
 0x1ba   : > { %v3738_v2 = vadd.f32 %v3737_v21, %v3736_v17  ;;  %v3739_v6 = vpop.f32.mrb[94].mxu0 }
 0x1bb   : > { %v3740_v57 = vpop.f32.mrb[95].mxu0 }
 0x1bc   : > { %v3741_v27 = vadd.f32 %v3740_v57, %v3739_v6  ;;  %v5387_v51 = vadd.f32 %v3738_v2, %v5311_v32 }
 0x1be   : > { %v5390_v37 = vadd.f32 %v3741_v27, %v5319_v38 }
 0x1c0   : > { %v3742_v34 = vpop.f32.mrb[96].mxu0 }
 0x1c1   : > { %v3743_v61 = vpop.f32.mrb[97].mxu0 }
 0x1c2   : > { %v3744_v46 = vadd.f32 %v3743_v61, %v3742_v34  ;;  %v3745_v8 = vpop.f32.mrb[98].mxu0 }
 0x1c3   : > { %v3746_v18 = vpop.f32.mrb[99].mxu0 }
 0x1c4   : > { %v3747_v35 = vadd.f32 %v3746_v18, %v3745_v8  ;;  %v5393_v31 = vadd.f32 %v3744_v46, %v5337_v25 }
 0x1c6   : > { %v5396_v45 = vadd.f32 %v3747_v35, %v5344_v28 }
 0x1c8   : > { %v3748_v55 = vpop.f32.mrb[100].mxu0 }
 0x1c9   : > { %v3749_v14 = vpop.f32.mrb[101].mxu0 }
 0x1ca   : > { %v3750_v47 = vadd.f32 %v3749_v14, %v3748_v55  ;;  %v3751_v32 = vpop.f32.mrb[102].mxu0 }
 0x1cb   : > { %v3752_v63 = vpop.f32.mrb[103].mxu0 }
 0x1cc   : > { %v3753_v44 = vadd.f32 %v3752_v63, %v3751_v32  ;;  %v5399_v38 = vadd.f32 %v3750_v47, %v5333_v1 }
 0x1ce   : > { %v5402_v20 = vadd.f32 %v3753_v44, %v5341_v41 }
 0x1d0   : > { %v3754_v39 = vpop.f32.mrb[104].mxu0 }
 0x1d1   : > { %v3755_v4 = vpop.f32.mrb[105].mxu0 }
 0x1d2   : > { %v3756_v7 = vadd.f32 %v3755_v4, %v3754_v39  ;;  %v3757_v25 = vpop.f32.mrb[106].mxu0 }
 0x1d3   : > { %v3758_v22 = vpop.f32.mrb[107].mxu0 }
 0x1d4   : > { %v3759_v0 = vadd.f32 %v3758_v22, %v3757_v25  ;;  %v5405_v28 = vadd.f32 %v3756_v7, %v5359_v59 }
 0x1d6   : > { %v5407_v42 = vadd.f32 %v3759_v0, %v1722_v56 }
 0x1d8   : > { %v3760_v62 = vpop.f32.mrb[108].mxu0 }
 0x1d9   : > { %v3761_v11 = vpop.f32.mrb[109].mxu0 }
 0x1da   : > { %v3762_v19 = vadd.f32 %v3761_v11, %v3760_v62  ;;  %v3763_v48 = vpop.f32.mrb[110].mxu0 }
 0x1db   : > { %v3764_v1 = vpop.f32.mrb[111].mxu0 }
 0x1dc   : > { %v3765_v17 = vadd.f32 %v3764_v1, %v3763_v48  ;;  %v5410_v41 = vadd.f32 %v3762_v19, %v5355_v29 }
 0x1de   : > { %v5413_v21 = vadd.f32 %v3765_v17, %v5363_v30 }
 0x1e0   : > { %v3766_v2 = vpop.f32.mrb[112].mxu0 }
 0x1e1   : > { %v3767_v6 = vpop.f32.mrb[113].mxu0 }
 0x1e2   : > { %v3768_v57 = vadd.f32 %v3767_v6, %v3766_v2  ;;  %v3769_v59 = vpop.f32.mrb[114].mxu0 }
 0x1e3   : > { %v3770_v27 = vpop.f32.mrb[115].mxu0 }
 0x1e4   : > { %v3771_v34 = vadd.f32 %v3770_v27, %v3769_v59  ;;  %v5416_v61 = vadd.f32 %v5256_v58, %v3768_v57 }
 0x1e5   : > { %v3952_v56 = vpop.f32.mrb[80].mxu1 }
 0x1e6   : > { %v4001_v46 = vadd.f32 %v4000_v49, %v3952_v56  ;;  %v2346_v8 = vpop.f32.mrb[81].mxu1  ;;  %v5420_v35 = vadd.f32 %v5258_v23, %v3771_v34 }
 0x1e7   : > { %v4005_v18 = vadd.f32 %v5373_v54, %v2346_v8  ;;  %v3953_v29 = vpop.f32.mrb[82].mxu1 }
 0x1e8   : > { %v4009_v30 = vadd.f32 %v4008_v33, %v3953_v29  ;;  %v2349_v55 = vpop.f32.mrb[83].mxu1  ;;  %v3772_v49 = vpop.f32.mrb[116].mxu0 }
 0x1e9   : > { %v4013_v58 = vadd.f32 %v5376_v52, %v2349_v55  ;;  %v3773_v47 = vpop.f32.mrb[117].mxu0 }
 0x1ea   : > { %v2506_v14 = vpack.c.bf16 %v4009_v30, %v4001_v46  ;;  %v3774_v32 = vadd.f32 %v3773_v47, %v3772_v49  ;;  %v3775_v63 = vpop.f32.mrb[118].mxu0 }
 0x1eb   : > { %v2505_v54 = vpack.c.bf16 %v4013_v58, %v4005_v18  ;;  %v3776_v33 = vpop.f32.mrb[119].mxu0 }
 0x1ec   : > { %v2523_v23 = vunpack.c.l.bf16 %v2506_v14  ;;  %3415 = vst [vmem:[%s5427_s17 + $0x8] sm:$0xff] %v2506_v14   ;;  %v3777_v7 = vadd.f32 %v3776_v33, %v3775_v63  ;;  %v5433_v25 = vadd.f32 %v5264_v53, %v3774_v32  ;;  %v2524_v22 = vunpack.c.h.bf16 %v2506_v14 }
 0x1ed   : > { %v2521_v44 = vunpack.c.l.bf16 %v2505_v54  ;;  %v2522_v39 = vunpack.c.h.bf16 %v2505_v54  ;;  %3324 = vst [vmem:[%s5427_s17] sm:$0xff] %v2505_v54   ;;  %v3956_v4 = vpop.f32.mrb[84].mxu1 }
 0x1ee   : > { %v4017_v52 = vadd.f32 %v5387_v51, %v3956_v4  ;;  %v2362_v0 = vpop.f32.mrb[85].mxu1  ;;  %v5439_v6 = vadd.f32 %v5266_v36, %v3777_v7  ;;  %v2592_v57 = vmul.f32 %v2523_v23, %v2523_v23  ;;  %v2593_v56 = vmul.f32 %v2524_v22, %v2524_v22 }
 0x1ef   : > { %v2553_v62 = vadd.f32 %v2522_v39, %v2521_v44  ;;  %v2590_v11 = vmul.f32 %v2521_v44, %v2521_v44  ;;  %v2591_v19 = vmul.f32 %v2522_v39, %v2522_v39  ;;  %v4021_v48 = vadd.f32 %v5381_v13, %v2362_v0  ;;  %v3957_v1 = vpop.f32.mrb[86].mxu1 }
 0x1f0   : > { %v4025_v17 = vadd.f32 %v5390_v37, %v3957_v1  ;;  %v2365_v2 = vpop.f32.mrb[87].mxu1  ;;  %v3778_v27 = vpop.f32.mrb[120].mxu0 }
 0x1f1   : > { %v2554_v53 = vadd.f32 %v2553_v62, %v2523_v23  ;;  %v2622_v59 = vadd.f32 %v2591_v19, %v2590_v11  ;;  %v4029_v51 = vadd.f32 %v5384_v60, %v2365_v2  ;;  %v3779_v46 = vpop.f32.mrb[121].mxu0 }
 0x1f2   : > { %v2508_v34 = vpack.c.bf16 %v4025_v17, %v4017_v52  ;;  %v3780_v29 = vadd.f32 %v3779_v46, %v3778_v27  ;;  %v3781_v37 = vpop.f32.mrb[122].mxu0 }
 0x1f3   : > { %v2623_v8 = vadd.f32 %v2622_v59, %v2592_v57  ;;  %v2507_v13 = vpack.c.bf16 %v4029_v51, %v4021_v48  ;;  %v2555_v18 = vadd.f32 %v2554_v53, %v2524_v22  ;;  %v3782_v30 = vpop.f32.mrb[123].mxu0 }
 0x1f4   : > { %3417 = vst [vmem:[%s5427_s17 + $0x18] sm:$0xff] %v2508_v34   ;;  %v3783_v14 = vadd.f32 %v3782_v30, %v3781_v37  ;;  %v2527_v47 = vunpack.c.l.bf16 %v2508_v34  ;;  %v5446_v32 = vadd.f32 %v5272_v40, %v3780_v29  ;;  %v2528_v39 = vunpack.c.h.bf16 %v2508_v34 }
 0x1f5   : > { %v2525_v55 = vunpack.c.l.bf16 %v2507_v13  ;;  %v2526_v36 = vunpack.c.h.bf16 %v2507_v13  ;;  %v2624_v58 = vadd.f32 %v2623_v8, %v2593_v56  ;;  %3416 = vst [vmem:[%s5427_s17 + $0x10] sm:$0xff] %v2507_v13   ;;  %v3960_v49 = vpop.f32.mrb[88].mxu1 }
 0x1f6   : > { %v4033_v60 = vadd.f32 %v5399_v38, %v3960_v49  ;;  %v2378_v54 = vpop.f32.mrb[89].mxu1  ;;  %v5451_v22 = vadd.f32 %v5274_v9, %v3783_v14  ;;  %v2596_v11 = vmul.f32 %v2527_v47, %v2527_v47  ;;  %v2597_v57 = vmul.f32 %v2528_v39, %v2528_v39 }
 0x1f7   : > { %v2556_v63 = vadd.f32 %v2555_v18, %v2525_v55  ;;  %v2594_v23 = vmul.f32 %v2525_v55, %v2525_v55  ;;  %v4037_v33 = vadd.f32 %v5393_v31, %v2378_v54  ;;  %v3961_v44 = vpop.f32.mrb[90].mxu1  ;;  %v2595_v0 = vmul.f32 %v2526_v36, %v2526_v36 }
 0x1f8   : > { %v4041_v4 = vadd.f32 %v5402_v20, %v3961_v44  ;;  %v2381_v7 = vpop.f32.mrb[91].mxu1  ;;  %v3784_v40 = vpop.f32.mrb[124].mxu0 }
 0x1f9   : > { %v2557_v52 = vadd.f32 %v2556_v63, %v2526_v36  ;;  %v2625_v38 = vadd.f32 %v2624_v58, %v2594_v23  ;;  %v4045_v62 = vadd.f32 %v5396_v45, %v2381_v7  ;;  %v3785_v48 = vpop.f32.mrb[125].mxu0 }
 0x1fa   : > { %v2510_v19 = vpack.c.bf16 %v4041_v4, %v4033_v60  ;;  %v3786_v2 = vadd.f32 %v3785_v48, %v3784_v40  ;;  %v3787_v20 = vpop.f32.mrb[126].mxu0 }
 0x1fb   : > { %v2558_v31 = vadd.f32 %v2557_v52, %v2527_v47  ;;  %v2626_v1 = vadd.f32 %v2625_v38, %v2595_v0  ;;  %v2509_v17 = vpack.c.bf16 %v4045_v62, %v4037_v33  ;;  %v3788_v53 = vpop.f32.mrb[127].mxu0 }
 0x1fc   : > { %3419 = vst [vmem:[%s5427_s17 + $0x28] sm:$0xff] %v2510_v19   ;;  %v2531_v45 = vunpack.c.l.bf16 %v2510_v19  ;;  %v3789_v8 = vadd.f32 %v3788_v53, %v3787_v20  ;;  %v2532_v13 = vunpack.c.h.bf16 %v2510_v19  ;;  %v4075_v49 = vadd.f32 %v5281_v15, %v3786_v2 }
 0x1fd   : > { %v2627_v9 = vadd.f32 %v2626_v1, %v2596_v11  ;;  %v2529_v59 = vunpack.c.l.bf16 %v2509_v17  ;;  %v2530_v51 = vunpack.c.h.bf16 %v2509_v17  ;;  %v2559_v27 = vadd.f32 %v2558_v31, %v2528_v39  ;;  %3418 = vst [vmem:[%s5427_s17 + $0x20] sm:$0xff] %v2509_v17   ;;  %v3964_v56 = vpop.f32.mrb[92].mxu1 }
 0x1fe   : > { %v4049_v34 = vadd.f32 %v5410_v41, %v3964_v56  ;;  %v2394_v46 = vpop.f32.mrb[93].mxu1  ;;  %v5461_v14 = vadd.f32 %v5285_v12, %v3789_v8  ;;  %v2600_v23 = vmul.f32 %v2531_v45, %v2531_v45  ;;  %v2601_v15 = vmul.f32 %v2532_v13, %v2532_v13 }
 0x1ff   : > { %v2560_v18 = vadd.f32 %v2559_v27, %v2529_v59  ;;  %v2598_v29 = vmul.f32 %v2529_v59, %v2529_v59  ;;  %v2628_v37 = vadd.f32 %v2627_v9, %v2597_v57  ;;  %v3965_v30 = vpop.f32.mrb[94].mxu1  ;;  %v4053_v55 = vadd.f32 %v5405_v28, %v2394_v46 }
 0x200   : > { %v4057_v36 = vadd.f32 %v5413_v21, %v3965_v30  ;;  %v2397_v58 = vpop.f32.mrb[95].mxu1  ;;  %v2599_v41 = vmul.f32 %v2530_v51, %v2530_v51  ;;  %v3790_v63 = vpop.f32.mrb[128].mxu0 }
 0x201   : > { %v2561_v47 = vadd.f32 %v2560_v18, %v2530_v51  ;;  %v2629_v60 = vadd.f32 %v2628_v37, %v2598_v29  ;;  %v4061_v54 = vadd.f32 %v5407_v42, %v2397_v58  ;;  %v3791_v44 = vpop.f32.mrb[129].mxu0 }
 0x202   : > { %v2512_v33 = vpack.c.bf16 %v4057_v36, %v4049_v34  ;;  %v3792_v4 = vadd.f32 %v3791_v44, %v3790_v63  ;;  %v3793_v7 = vpop.f32.mrb[130].mxu0 }
 0x203   : > { %v2562_v28 = vadd.f32 %v2561_v47, %v2531_v45  ;;  %v2630_v39 = vadd.f32 %v2629_v60, %v2599_v41  ;;  %v2511_v21 = vpack.c.bf16 %v4061_v54, %v4053_v55  ;;  %v3794_v52 = vpop.f32.mrb[131].mxu0 }
 0x204   : > { %3421 = vst [vmem:[%s5427_s17 + $0x38] sm:$0xff] %v2512_v33   ;;  %v2535_v42 = vunpack.c.l.bf16 %v2512_v33  ;;  %v3795_v48 = vadd.f32 %v3794_v52, %v3793_v7  ;;  %v2536_v31 = vunpack.c.h.bf16 %v2512_v33  ;;  %v5470_v59 = vadd.f32 %v5303_v26, %v3792_v4 }
 0x205   : > { %v2631_v12 = vadd.f32 %v2630_v39, %v2600_v23  ;;  %v2533_v0 = vunpack.c.l.bf16 %v2511_v21  ;;  %v2534_v38 = vunpack.c.h.bf16 %v2511_v21  ;;  %v2563_v62 = vadd.f32 %v2562_v28, %v2532_v13  ;;  %3420 = vst [vmem:[%s5427_s17 + $0x30] sm:$0xff] %v2511_v21   ;;  %v3968_v40 = vpop.f32.mrb[0].mxu1 }
 0x206   : > { %v4064_v11 = vadd.f32 %v5433_v25, %v3968_v40  ;;  %v2410_v19 = vpop.f32.mrb[1].mxu1  ;;  %v5473_v51 = vadd.f32 %v5307_v16, %v3795_v48  ;;  %v2604_v46 = vmul.f32 %v2535_v42, %v2535_v42  ;;  %v2605_v37 = vmul.f32 %v2536_v31, %v2536_v31 }
 0x207   : > { %v2564_v1 = vadd.f32 %v2563_v62, %v2533_v0  ;;  %v2602_v17 = vmul.f32 %v2533_v0, %v2533_v0  ;;  %v2632_v2 = vadd.f32 %v2631_v12, %v2601_v15  ;;  %v3969_v20 = vpop.f32.mrb[2].mxu1  ;;  %v4067_v57 = vadd.f32 %v5416_v61, %v2410_v19 }
 0x208   : > { %v4070_v53 = vadd.f32 %v5439_v6, %v3969_v20  ;;  %v2413_v9 = vpop.f32.mrb[3].mxu1  ;;  %v2603_v27 = vmul.f32 %v2534_v38, %v2534_v38  ;;  %v3796_v34 = vpop.f32.mrb[132].mxu0 }
 0x209   : > { %v2565_v25 = vadd.f32 %v2564_v1, %v2534_v38  ;;  %v2633_v56 = vadd.f32 %v2632_v2, %v2602_v17  ;;  %v4073_v45 = vadd.f32 %v5420_v35, %v2413_v9  ;;  %v3797_v61 = vpop.f32.mrb[133].mxu0 }
 0x20a   : > { %v2514_v8 = vpack.c.bf16 %v4070_v53, %v4064_v11  ;;  %v3798_v29 = vadd.f32 %v3797_v61, %v3796_v34  ;;  %v3799_v26 = vpop.f32.mrb[134].mxu0 }
 0x20b   : > { %v2566_v13 = vadd.f32 %v2565_v25, %v2535_v42  ;;  %v2634_v6 = vadd.f32 %v2633_v56, %v2603_v27  ;;  %v2513_v18 = vpack.c.bf16 %v4073_v45, %v4067_v57  ;;  %v3800_v30 = vpop.f32.mrb[135].mxu0 }
 0x20c   : > { %3423 = vst [vmem:[%s5427_s17 + $0x48] sm:$0xff] %v2514_v8   ;;  %v2539_v35 = vunpack.c.l.bf16 %v2514_v8  ;;  %v3801_v54 = vadd.f32 %v3800_v30, %v3799_v26  ;;  %v2540_v63 = vunpack.c.h.bf16 %v2514_v8  ;;  %v4087_v7 = vadd.f32 %v5325_v10, %v3798_v29 }
 0x20d   : > { %v2635_v16 = vadd.f32 %v2634_v6, %v2604_v46  ;;  %v2537_v55 = vunpack.c.l.bf16 %v2513_v18  ;;  %v2538_v36 = vunpack.c.h.bf16 %v2513_v18  ;;  %v2567_v58 = vadd.f32 %v2566_v13, %v2536_v31  ;;  %3422 = vst [vmem:[%s5427_s17 + $0x40] sm:$0xff] %v2513_v18   ;;  %v3972_v47 = vpop.f32.mrb[4].mxu1 }
 0x20e   : > { %v4076_v41 = vadd.f32 %v4075_v49, %v3972_v47  ;;  %v2426_v60 = vpop.f32.mrb[5].mxu1  ;;  %v4093_v15 = vadd.f32 %v5329_v43, %v3801_v54  ;;  %v2608_v62 = vmul.f32 %v2539_v35, %v2539_v35  ;;  %v2609_v31 = vmul.f32 %v2540_v63, %v2540_v63 }
 0x20f   : > { %v2568_v23 = vadd.f32 %v2567_v58, %v2537_v55  ;;  %v2606_v33 = vmul.f32 %v2537_v55, %v2537_v55  ;;  %v2636_v44 = vadd.f32 %v2635_v16, %v2605_v37  ;;  %v3973_v28 = vpop.f32.mrb[6].mxu1  ;;  %v4079_v39 = vadd.f32 %v5446_v32, %v2426_v60 }
 0x210   : > { %v4082_v21 = vadd.f32 %v5461_v14, %v3973_v28  ;;  %v2429_v4 = vpop.f32.mrb[7].mxu1  ;;  %v2607_v12 = vmul.f32 %v2538_v36, %v2538_v36  ;;  %v3802_v38 = vpop.f32.mrb[136].mxu0 }
 0x211   : > { %v2569_v52 = vadd.f32 %v2568_v23, %v2538_v36  ;;  %v2637_v49 = vadd.f32 %v2636_v44, %v2606_v33  ;;  %v4085_v0 = vadd.f32 %v5451_v22, %v2429_v4  ;;  %v3803_v42 = vpop.f32.mrb[137].mxu0 }
 0x212   : > { %v2516_v40 = vpack.c.bf16 %v4082_v21, %v4076_v41  ;;  %v3804_v14 = vadd.f32 %v3803_v42, %v3802_v38  ;;  %v3805_v48 = vpop.f32.mrb[138].mxu0 }
 0x213   : > { %v2570_v11 = vadd.f32 %v2569_v52, %v2539_v35  ;;  %v2638_v32 = vadd.f32 %v2637_v49, %v2607_v12  ;;  %v2515_v19 = vpack.c.bf16 %v4085_v0, %v4079_v39  ;;  %v3806_v10 = vpop.f32.mrb[139].mxu0 }
 0x214   : > { %3425 = vst [vmem:[%s5427_s17 + $0x58] sm:$0xff] %v2516_v40   ;;  %v2543_v22 = vunpack.c.l.bf16 %v2516_v40  ;;  %v3807_v9 = vadd.f32 %v3806_v10, %v3805_v48  ;;  %v2544_v25 = vunpack.c.h.bf16 %v2516_v40  ;;  %v4102_v13 = vadd.f32 %v5347_v3, %v3804_v14 }
 0x215   : > { %v2639_v1 = vadd.f32 %v2638_v32, %v2608_v62  ;;  %v2541_v43 = vunpack.c.l.bf16 %v2515_v19  ;;  %v2542_v17 = vunpack.c.h.bf16 %v2515_v19  ;;  %v2571_v2 = vadd.f32 %v2570_v11, %v2540_v63  ;;  %3424 = vst [vmem:[%s5427_s17 + $0x50] sm:$0xff] %v2515_v19   ;;  %v3976_v20 = vpop.f32.mrb[8].mxu1 }
 0x216   : > { %v4088_v57 = vadd.f32 %v4087_v7, %v3976_v20  ;;  %v2442_v53 = vpop.f32.mrb[9].mxu1  ;;  %v4108_v6 = vadd.f32 %v5351_v24, %v3807_v9  ;;  %v2612_v16 = vmul.f32 %v2543_v22, %v2543_v22  ;;  %v2613_v60 = vmul.f32 %v2544_v25, %v2544_v25 }
 0x217   : > { %v2572_v27 = vadd.f32 %v2571_v2, %v2541_v43  ;;  %v2610_v56 = vmul.f32 %v2541_v43, %v2541_v43  ;;  %v2640_v45 = vadd.f32 %v2639_v1, %v2609_v31  ;;  %v3977_v34 = vpop.f32.mrb[10].mxu1  ;;  %v4091_v46 = vadd.f32 %v5470_v59, %v2442_v53 }
 0x218   : > { %v4094_v8 = vadd.f32 %v4093_v15, %v3977_v34  ;;  %v2445_v61 = vpop.f32.mrb[11].mxu1  ;;  %v2611_v29 = vmul.f32 %v2542_v17, %v2542_v17  ;;  %v3808_v30 = vpop.f32.mrb[140].mxu0 }
 0x219   : > { %v2573_v18 = vadd.f32 %v2572_v27, %v2542_v17  ;;  %v2641_v26 = vadd.f32 %v2640_v45, %v2610_v56  ;;  %v4097_v37 = vadd.f32 %v5473_v51, %v2445_v61  ;;  %v3809_v36 = vpop.f32.mrb[141].mxu0 }
 0x21a   : > { %v2518_v55 = vpack.c.bf16 %v4094_v8, %v4088_v57  ;;  %v3810_v35 = vadd.f32 %v3809_v36, %v3808_v30  ;;  %v3811_v41 = vpop.f32.mrb[142].mxu0 }
 0x21b   : > { %v2574_v58 = vadd.f32 %v2573_v18, %v2543_v22  ;;  %v2642_v47 = vadd.f32 %v2641_v26, %v2611_v29  ;;  %v2517_v59 = vpack.c.bf16 %v4097_v37, %v4091_v46  ;;  %v3812_v3 = vpop.f32.mrb[143].mxu0 }
 0x21c   : > { %3427 = vst [vmem:[%s5427_s17 + $0x68] sm:$0xff] %v2518_v55   ;;  %v4099_v51 = vadd.f32 %v5367_v5, %v3810_v35  ;;  %v3813_v28 = vadd.f32 %v3812_v3, %v3811_v41  ;;  %v2547_v39 = vunpack.c.l.bf16 %v2518_v55  ;;  %v2548_v52 = vunpack.c.h.bf16 %v2518_v55 }
 0x21d   : > { %v2643_v54 = vadd.f32 %v2642_v47, %v2612_v16  ;;  %v2545_v24 = vunpack.c.l.bf16 %v2517_v59  ;;  %v2546_v63 = vunpack.c.h.bf16 %v2517_v59  ;;  %v2575_v23 = vadd.f32 %v2574_v58, %v2544_v25  ;;  %3426 = vst [vmem:[%s5427_s17 + $0x60] sm:$0xff] %v2517_v59   ;;  %v3980_v33 = vpop.f32.mrb[12].mxu1 }
 0x21e   : > { %v2458_v44 = vpop.f32.mrb[13].mxu1  ;;  %v4100_v12 = vadd.f32 %v4099_v51, %v3980_v33  ;;  %v4105_v0 = vadd.f32 %v5370_v50, %v3813_v28  ;;  %v2616_v32 = vmul.f32 %v2547_v39, %v2547_v39  ;;  %v2617_v31 = vmul.f32 %v2548_v52, %v2548_v52 }
 0x21f   : > { %v2576_v21 = vadd.f32 %v2575_v23, %v2545_v24  ;;  %v2614_v4 = vmul.f32 %v2545_v24, %v2545_v24  ;;  %v2644_v7 = vadd.f32 %v2643_v54, %v2613_v60  ;;  %v3981_v15 = vpop.f32.mrb[14].mxu1  ;;  %v4103_v49 = vadd.f32 %v4102_v13, %v2458_v44 }
 0x220   : > { %v2461_v38 = vpop.f32.mrb[15].mxu1  ;;  %v2615_v40 = vmul.f32 %v2546_v63, %v2546_v63  ;;  %v4106_v5 = vadd.f32 %v4105_v0, %v3981_v15 }
 0x221   : > { %v2577_v62 = vadd.f32 %v2576_v21, %v2546_v63  ;;  %v2645_v42 = vadd.f32 %v2644_v7, %v2614_v4  ;;  %v4109_v11 = vadd.f32 %v4108_v6, %v2461_v38 }
 0x222   : > { %v2520_v10 = vpack.c.bf16 %v4106_v5, %v4100_v12 }
 0x223   : > { %v2578_v19 = vadd.f32 %v2577_v62, %v2547_v39  ;;  %v2646_v14 = vadd.f32 %v2645_v42, %v2615_v40  ;;  %v2519_v48 = vpack.c.bf16 %v4109_v11, %v4103_v49 }
 0x224   : > { %v2551_v50 = vunpack.c.l.bf16 %v2520_v10  ;;  %3429 = vst [vmem:[%s5427_s17 + $0x78] sm:$0xff] %v2520_v10   ;;  %v2552_v53 = vunpack.c.h.bf16 %v2520_v10 }
 0x225   : > { %v2647_v1 = vadd.f32 %v2646_v14, %v2616_v32  ;;  %v2549_v43 = vunpack.c.l.bf16 %v2519_v48  ;;  %v2550_v17 = vunpack.c.h.bf16 %v2519_v48  ;;  %v2579_v2 = vadd.f32 %v2578_v19, %v2548_v52  ;;  %3428 = vst [vmem:[%s5427_s17 + $0x70] sm:$0xff] %v2519_v48  }
 0x226   : > { %v2620_v9 = vmul.f32 %v2551_v50, %v2551_v50  ;;  %v2621_v46 = vmul.f32 %v2552_v53, %v2552_v53 }
 0x227   : > { %v2580_v20 = vadd.f32 %v2579_v2, %v2549_v43  ;;  %v2618_v22 = vmul.f32 %v2549_v43, %v2549_v43  ;;  %v2648_v57 = vadd.f32 %v2647_v1, %v2617_v31  ;;  %v2619_v27 = vmul.f32 %v2550_v17, %v2550_v17 }
 0x229   : > { %v2581_v25 = vadd.f32 %v2580_v20, %v2550_v17  ;;  %v2649_v56 = vadd.f32 %v2648_v57, %v2618_v22 }
 0x22b   : > { %v2582_v45 = vadd.f32 %v2581_v25, %v2551_v50  ;;  %v2650_v34 = vadd.f32 %v2649_v56, %v2619_v27 }
 0x22d   : > { %v2583_v8 = vadd.f32 %v2582_v45, %v2552_v53  ;;  %v2651_v61 = vadd.f32 %v2650_v34, %v2620_v9 }
 0x22f   : > { %v2584_v13 = vrot.slane %v2583_v8, 4  ;;  %v2652_v6 = vadd.f32 %v2651_v61, %v2621_v46 }
 0x231   : > { %v2585_v18 = vadd.f32 %v2584_v13, %v2583_v8  ;;  %v2653_v29 = vrot.slane %v2652_v6, 4 }
 0x233   : > { %v2586_v26 = vrot.slane %v2585_v18, 2  ;;  %v2654_v37 = vadd.f32 %v2653_v29, %v2652_v6 }
 0x235   : > { %v2587_v30 = vadd.f32 %v2586_v26, %v2585_v18  ;;  %v2655_v16 = vrot.slane %v2654_v37, 2 }
 0x237   : > { %v2588_v55 = vrot.slane %v2587_v30, 1  ;;  %v2656_v36 = vadd.f32 %v2655_v16, %v2654_v37 }
 0x239   : > { %v2657_v58 = vrot.slane %v2656_v36, 1  ;;  %v2589_v47 = vadd.f32 %v2588_v55, %v2587_v30 }
 0x23b   : > { %v2658_v59 = vadd.f32 %v2657_v58, %v2656_v36 }
 0x23d   : > { %v2660_v35 = vsel %vm833_vm0, %v2589_v47, %v2658_v59 }
 0x23e   : > { %2661 = vst [vmem:[%s465_s20] sm:$0x3] %v2660_v35 }
 0x23f PF: > { %s18_s2 = sadd.s32 1, %s4277_s2   ;;  %s5544_s24 = smov %s4273_s1 }
 0x240   : > { %p15_p5 = scmp.ge.s32.totalorder %s18_s2, 4   ;;  %s5545_s1 = smov %s5547_s25 }
 0x242   :  { %17 = sbr.rel (!%p15_p5) target bundleno = 2 (0x2), region = 94 }

</bundles_post_ra>
